<compile_context>
chip_gen: v7x
topology: tpu7x:2x2x1
jax: 0.10.0
libtpu: 0.0.40
codegen_flags: <defaults>
</compile_context>

<pallas_src>
import jax
import jax.numpy as jnp
from jax.experimental import pallas as pl
from jax.experimental.pallas import tpu as pltpu

# ----------------------------- config (small, BERT-shaped) -----------------------------
BATCH = 2
SEQ = 8
BS = BATCH * SEQ
VOCAB = 128            # lane-aligned so the in-kernel one-hot gather is a clean matmul
MAX_POS = 32
HIDDEN = 64            # bert-base uses 768; scaled down
NUM_HEADS = 4
HEAD_DIM = HIDDEN // NUM_HEADS
INTERMEDIATE = 128     # bert-base uses 3072; scaled down
NUM_LAYERS = 2
CLS_HIDDEN = 50        # classifier hidden_size from BertNet.__init__
NUM_LABELS = 3
LN_EPS = 1e-12


# ----------------------------- in-kernel helpers -----------------------------
def _layer_norm(x, gamma, beta, eps=LN_EPS):
    mu = jnp.mean(x, axis=-1, keepdims=True)
    var = jnp.mean(jnp.square(x - mu), axis=-1, keepdims=True)
    return (x - mu) * jax.lax.rsqrt(var + eps) * gamma + beta


def _gelu(x):
    # TODO(synk): HF BERT uses the exact erf-based GELU; tanh approximation is used
    # here for portable Pallas/Mosaic lowering (EUP tanh).
    c = jnp.float32(0.7978845608028654)  # sqrt(2/pi)
    return 0.5 * x * (1.0 + jnp.tanh(c * (x + 0.044715 * x * x * x)))


def _softmax_lastdim(x):
    m = jnp.max(x, axis=-1, keepdims=True)
    p = jnp.exp(x - m)
    return p * pl.reciprocal(jnp.sum(p, axis=-1, keepdims=True), approx=True)


# ----------------------------- the fused kernel -----------------------------
def bert_fused_kernel(ids_ref, mask_ref,
                      word_emb_ref, pos_emb_ref, type_emb_ref, emb_g_ref, emb_b_ref,
                      wq_ref, bq_ref, wk_ref, bk_ref, wv_ref, bv_ref, wo_ref, bo_ref,
                      ln1_g_ref, ln1_b_ref,
                      w1_ref, b1_ref, w2_ref, b2_ref, ln2_g_ref, ln2_b_ref,
                      cls_w1_ref, cls_b1_ref, cls_w2_ref, cls_b2_ref,
                      o_ref):
    f32 = jnp.float32

    # ---- embeddings: one-hot gather on the MXU + positional/type add + LayerNorm ----
    iota = jax.lax.broadcasted_iota(jnp.int32, (BS, VOCAB), 1)
    onehot = (iota == ids_ref[...]).astype(f32)                          # (BS, VOCAB)
    e = jnp.dot(onehot, word_emb_ref[...], preferred_element_type=f32)   # (BS, H)
    e = (e.reshape(BATCH, SEQ, HIDDEN) + pos_emb_ref[...][None, :, :]).reshape(BS, HIDDEN)
    e = e + type_emb_ref[...]                                            # token_type_ids == 0
    x = _layer_norm(e, emb_g_ref[...], emb_b_ref[...])                   # (BS, H)

    # ---- additive attention-mask bias (HF convention), hoisted once for all layers ----
    neg = (1.0 - mask_ref[...]) * f32(-10000.0)                          # (B, S)
    # merged (head, batch) ordering used below is x = h*BATCH + b  ->  tile over heads
    bias_x = jnp.concatenate([neg] * NUM_HEADS, axis=0)[:, None, :]      # (NH*B, 1, S)

    scale = f32(1.0 / (HEAD_DIM ** 0.5))

    # ---- encoder layers (statically unrolled; weights stay resident in VMEM) ----
    for l in range(NUM_LAYERS):
        q = jnp.dot(x, wq_ref[l], preferred_element_type=f32) + bq_ref[l]    # (BS, H)
        k = jnp.dot(x, wk_ref[l], preferred_element_type=f32) + bk_ref[l]
        v = jnp.dot(x, wv_ref[l], preferred_element_type=f32) + bv_ref[l]

        q3 = q.reshape(BATCH, SEQ, HIDDEN)
        k3 = k.reshape(BATCH, SEQ, HIDDEN)
        v3 = v.reshape(BATCH, SEQ, HIDDEN)

        def split_heads(t):
            # (B, S, H) -> (NUM_HEADS*B, S, HEAD_DIM) by stacking lane-slices per head
            return jnp.concatenate(
                [t[:, :, hd * HEAD_DIM:(hd + 1) * HEAD_DIM] for hd in range(NUM_HEADS)],
                axis=0)

        qx, kx, vx = split_heads(q3), split_heads(k3), split_heads(v3)      # (NH*B, S, D)

        s = jnp.einsum('xqd,xkd->xqk', qx, kx, preferred_element_type=f32) * scale
        p = _softmax_lastdim(s + bias_x)                                     # (NH*B, S, S)
        cx = jnp.einsum('xqk,xkd->xqd', p, vx, preferred_element_type=f32)   # (NH*B, S, D)

        # re-concatenate heads along the feature axis and do ONE output projection
        ctx = jnp.concatenate(
            [cx[hd * BATCH:(hd + 1) * BATCH] for hd in range(NUM_HEADS)], axis=-1)
        ctx = ctx.reshape(BS, HIDDEN)
        attn = jnp.dot(ctx, wo_ref[l], preferred_element_type=f32) + bo_ref[l]

        h1 = _layer_norm(x + attn, ln1_g_ref[l], ln1_b_ref[l])

        inter = _gelu(jnp.dot(h1, w1_ref[l], preferred_element_type=f32) + b1_ref[l])
        ffn = jnp.dot(inter, w2_ref[l], preferred_element_type=f32) + b2_ref[l]
        x = _layer_norm(h1 + ffn, ln2_g_ref[l], ln2_b_ref[l])

    # ---- classifier: CLS token -> Linear -> Softmax(dim=1) -> Linear ----
    cls = jnp.concatenate([x[b * SEQ:b * SEQ + 1, :] for b in range(BATCH)], axis=0)  # (B, H)
    h = jnp.dot(cls, cls_w1_ref[...], preferred_element_type=f32) + cls_b1_ref[...]
    p = _softmax_lastdim(h)
    o_ref[...] = jnp.dot(p, cls_w2_ref[...], preferred_element_type=f32) + cls_b2_ref[...]


# ----------------------------- pallas_call wrapper -----------------------------
def _vmem():
    return pl.BlockSpec(memory_space=pltpu.MemorySpace.VMEM)


@jax.jit
def bertnet_forward(params, input_ids, attention_mask):
    ids = input_ids.reshape(BS, 1).astype(jnp.int32)
    mask = attention_mask.astype(jnp.float32)
    args = (
        ids, mask,
        params['word_emb'], params['pos_emb'][:SEQ], params['type_emb'][0:1],
        params['emb_ln_g'], params['emb_ln_b'],
        params['wq'], params['bq'], params['wk'], params['bk'],
        params['wv'], params['bv'], params['wo'], params['bo'],
        params['ln1_g'], params['ln1_b'],
        params['w1'], params['b1'], params['w2'], params['b2'],
        params['ln2_g'], params['ln2_b'],
        params['cls_w1'], params['cls_b1'], params['cls_w2'], params['cls_b2'],
    )
    return pl.pallas_call(
        bert_fused_kernel,
        out_shape=jax.ShapeDtypeStruct((BATCH, NUM_LABELS), jnp.float32),
        in_specs=[_vmem() for _ in args],
        out_specs=_vmem(),
    )(*args)


# ----------------------------- deterministic parameter init -----------------------------
def init_params(key):
    ks = iter(jax.random.split(key, 64))

    def w(shape, scale=0.02):
        return (scale * jax.random.normal(next(ks), shape)).astype(jnp.float32)

    L = NUM_LAYERS
    return {
        'word_emb': w((VOCAB, HIDDEN)),
        'pos_emb': w((MAX_POS, HIDDEN)),
        'type_emb': w((2, HIDDEN)),
        'emb_ln_g': jnp.ones((1, HIDDEN), jnp.float32),
        'emb_ln_b': jnp.zeros((1, HIDDEN), jnp.float32),
        # per-layer weights stacked along a leading NUM_LAYERS axis
        'wq': w((L, HIDDEN, HIDDEN)), 'bq': jnp.zeros((L, 1, HIDDEN), jnp.float32),
        'wk': w((L, HIDDEN, HIDDEN)), 'bk': jnp.zeros((L, 1, HIDDEN), jnp.float32),
        'wv': w((L, HIDDEN, HIDDEN)), 'bv': jnp.zeros((L, 1, HIDDEN), jnp.float32),
        'wo': w((L, HIDDEN, HIDDEN)), 'bo': jnp.zeros((L, 1, HIDDEN), jnp.float32),
        'ln1_g': jnp.ones((L, 1, HIDDEN), jnp.float32),
        'ln1_b': jnp.zeros((L, 1, HIDDEN), jnp.float32),
        'w1': w((L, HIDDEN, INTERMEDIATE)),
        'b1': jnp.zeros((L, 1, INTERMEDIATE), jnp.float32),
        'w2': w((L, INTERMEDIATE, HIDDEN)),
        'b2': jnp.zeros((L, 1, HIDDEN), jnp.float32),
        'ln2_g': jnp.ones((L, 1, HIDDEN), jnp.float32),
        'ln2_b': jnp.zeros((L, 1, HIDDEN), jnp.float32),
        'cls_w1': w((HIDDEN, CLS_HIDDEN)),
        'cls_b1': jnp.zeros((1, CLS_HIDDEN), jnp.float32),
        'cls_w2': w((CLS_HIDDEN, NUM_LABELS)),
        'cls_b2': jnp.zeros((1, NUM_LABELS), jnp.float32),
    }


if __name__ == "__main__":
    key = jax.random.PRNGKey(0)
    k_param, k_ids = jax.random.split(key)

    params = init_params(k_param)

    input_ids = jax.random.randint(k_ids, (BATCH, SEQ), 0, VOCAB, dtype=jnp.int32)
    attention_mask = jnp.ones((BATCH, SEQ), jnp.int32)
    attention_mask = attention_mask.at[1, SEQ - 2:].set(0)  # a little padding

    logits = bertnet_forward(params, input_ids, attention_mask)
    jax.block_until_ready(logits)

    assert logits.shape == (BATCH, NUM_LABELS), logits.shape
    assert logits.dtype == jnp.float32
    assert bool(jnp.all(jnp.isfinite(logits)))
    print("KERNEL_OK")
</pallas_src>

<mosaic_0001>
module attributes {stable_mosaic.version = 11 : i64} {
  func.func @bert_fused_kernel(%arg0: memref<16x1xi32, #tpu.memory_space<vmem>>, %arg1: memref<2x8xf32, #tpu.memory_space<vmem>>, %arg2: memref<128x64xf32, #tpu.memory_space<vmem>>, %arg3: memref<8x64xf32, #tpu.memory_space<vmem>>, %arg4: memref<1x64xf32, #tpu.memory_space<vmem>>, %arg5: memref<1x64xf32, #tpu.memory_space<vmem>>, %arg6: memref<1x64xf32, #tpu.memory_space<vmem>>, %arg7: memref<2x64x64xf32, #tpu.memory_space<vmem>>, %arg8: memref<2x1x64xf32, #tpu.memory_space<vmem>>, %arg9: memref<2x64x64xf32, #tpu.memory_space<vmem>>, %arg10: memref<2x1x64xf32, #tpu.memory_space<vmem>>, %arg11: memref<2x64x64xf32, #tpu.memory_space<vmem>>, %arg12: memref<2x1x64xf32, #tpu.memory_space<vmem>>, %arg13: memref<2x64x64xf32, #tpu.memory_space<vmem>>, %arg14: memref<2x1x64xf32, #tpu.memory_space<vmem>>, %arg15: memref<2x1x64xf32, #tpu.memory_space<vmem>>, %arg16: memref<2x1x64xf32, #tpu.memory_space<vmem>>, %arg17: memref<2x64x128xf32, #tpu.memory_space<vmem>>, %arg18: memref<2x1x128xf32, #tpu.memory_space<vmem>>, %arg19: memref<2x128x64xf32, #tpu.memory_space<vmem>>, %arg20: memref<2x1x64xf32, #tpu.memory_space<vmem>>, %arg21: memref<2x1x64xf32, #tpu.memory_space<vmem>>, %arg22: memref<2x1x64xf32, #tpu.memory_space<vmem>>, %arg23: memref<64x50xf32, #tpu.memory_space<vmem>>, %arg24: memref<1x50xf32, #tpu.memory_space<vmem>>, %arg25: memref<50x3xf32, #tpu.memory_space<vmem>>, %arg26: memref<1x3xf32, #tpu.memory_space<vmem>>, %arg27: memref<2x3xf32, #tpu.memory_space<vmem>>) attributes {dimension_semantics = [], scalar_prefetch = 0 : i64, scratch_operands = 0 : i64, tpu.core_type = #tpu.core_type<tc>} {
    %0 = tpu.iota {dimensions = array<i32: 1>} : vector<16x128xi32>
    %c0 = arith.constant 0 : index
    %c0_0 = arith.constant 0 : index
    %1 = vector.load %arg0[%c0, %c0_0] : memref<16x1xi32, #tpu.memory_space<vmem>>, vector<16x1xi32>
    %2 = vector.broadcast %1 : vector<16x1xi32> to vector<16x128xi32>
    %3 = arith.cmpi eq, %0, %2 : vector<16x128xi32>
    %4 = arith.extui %3 : vector<16x128xi1> to vector<16x128xi32>
    %5 = arith.sitofp %4 : vector<16x128xi32> to vector<16x128xf32>
    %c0_1 = arith.constant 0 : index
    %c0_2 = arith.constant 0 : index
    %6 = vector.load %arg2[%c0_1, %c0_2] : memref<128x64xf32, #tpu.memory_space<vmem>>, vector<128x64xf32>
    %cst = arith.constant dense<0.000000e+00> : vector<16x64xf32>
    %7 = tpu.matmul %5, %6, %cst {dimension_numbers = #tpu.dot_dimension_numbers<[1], [0], [0], [1], [0, 0, 1, 1], [], []>} : vector<16x128xf32>, vector<128x64xf32>, vector<16x64xf32> -> vector<16x64xf32>
    %8 = vector.shape_cast %7 : vector<16x64xf32> to vector<2x8x64xf32>
    %c0_3 = arith.constant 0 : index
    %c0_4 = arith.constant 0 : index
    %9 = vector.load %arg3[%c0_3, %c0_4] : memref<8x64xf32, #tpu.memory_space<vmem>>, vector<8x64xf32>
    %10 = vector.shape_cast %9 : vector<8x64xf32> to vector<1x8x64xf32>
    %11 = vector.broadcast %10 : vector<1x8x64xf32> to vector<2x8x64xf32>
    %12 = arith.addf %8, %11 : vector<2x8x64xf32>
    %13 = vector.shape_cast %12 : vector<2x8x64xf32> to vector<16x64xf32>
    %c0_5 = arith.constant 0 : index
    %c0_6 = arith.constant 0 : index
    %14 = vector.load %arg4[%c0_5, %c0_6] : memref<1x64xf32, #tpu.memory_space<vmem>>, vector<1x64xf32>
    %15 = vector.broadcast %14 : vector<1x64xf32> to vector<16x64xf32>
    %16 = arith.addf %13, %15 : vector<16x64xf32>
    %c0_7 = arith.constant 0 : index
    %c0_8 = arith.constant 0 : index
    %17 = vector.load %arg5[%c0_7, %c0_8] : memref<1x64xf32, #tpu.memory_space<vmem>>, vector<1x64xf32>
    %c0_9 = arith.constant 0 : index
    %c0_10 = arith.constant 0 : index
    %18 = vector.load %arg6[%c0_9, %c0_10] : memref<1x64xf32, #tpu.memory_space<vmem>>, vector<1x64xf32>
    %cst_11 = arith.constant dense<0.000000e+00> : vector<16xf32>
    %19 = vector.multi_reduction <add>, %16, %cst_11 [1] : vector<16x64xf32> to vector<16xf32>
    %20 = vector.shape_cast %19 : vector<16xf32> to vector<16x1xf32>
    %cst_12 = arith.constant 6.400000e+01 : f32
    %21 = vector.broadcast %cst_12 : f32 to vector<16x1xf32>
    %22 = arith.divf %20, %21 : vector<16x1xf32>
    %23 = vector.broadcast %22 : vector<16x1xf32> to vector<16x64xf32>
    %24 = arith.subf %16, %23 : vector<16x64xf32>
    %25 = arith.mulf %24, %24 : vector<16x64xf32>
    %cst_13 = arith.constant dense<0.000000e+00> : vector<16xf32>
    %26 = vector.multi_reduction <add>, %25, %cst_13 [1] : vector<16x64xf32> to vector<16xf32>
    %27 = vector.shape_cast %26 : vector<16xf32> to vector<16x1xf32>
    %cst_14 = arith.constant 6.400000e+01 : f32
    %28 = vector.broadcast %cst_14 : f32 to vector<16x1xf32>
    %29 = arith.divf %27, %28 : vector<16x1xf32>
    %30 = vector.broadcast %22 : vector<16x1xf32> to vector<16x64xf32>
    %31 = arith.subf %16, %30 : vector<16x64xf32>
    %cst_15 = arith.constant 9.99999996E-13 : f32
    %32 = vector.broadcast %cst_15 : f32 to vector<16x1xf32>
    %33 = arith.addf %29, %32 : vector<16x1xf32>
    %34 = math.rsqrt %33 : vector<16x1xf32>
    %35 = vector.broadcast %34 : vector<16x1xf32> to vector<16x64xf32>
    %36 = arith.mulf %31, %35 : vector<16x64xf32>
    %37 = vector.broadcast %17 : vector<1x64xf32> to vector<16x64xf32>
    %38 = arith.mulf %36, %37 : vector<16x64xf32>
    %39 = vector.broadcast %18 : vector<1x64xf32> to vector<16x64xf32>
    %40 = arith.addf %38, %39 : vector<16x64xf32>
    %c0_16 = arith.constant 0 : index
    %c0_17 = arith.constant 0 : index
    %41 = vector.load %arg1[%c0_16, %c0_17] : memref<2x8xf32, #tpu.memory_space<vmem>>, vector<2x8xf32>
    %cst_18 = arith.constant 1.000000e+00 : f32
    %42 = vector.broadcast %cst_18 : f32 to vector<2x8xf32>
    %43 = arith.subf %42, %41 : vector<2x8xf32>
    %cst_19 = arith.constant -1.000000e+04 : f32
    %44 = vector.broadcast %cst_19 : f32 to vector<2x8xf32>
    %45 = arith.mulf %43, %44 : vector<2x8xf32>
    %46 = tpu.concatenate %45, %45, %45, %45 in 0 : vector<2x8xf32>, vector<2x8xf32>, vector<2x8xf32>, vector<2x8xf32> -> vector<8x8xf32>
    %47 = vector.shape_cast %46 : vector<8x8xf32> to vector<8x1x8xf32>
    %c0_20 = arith.constant 0 : index
    %c0_21 = arith.constant 0 : index
    %c0_22 = arith.constant 0 : index
    %48 = vector.load %arg7[%c0_20, %c0_21, %c0_22] : memref<2x64x64xf32, #tpu.memory_space<vmem>>, vector<1x64x64xf32>
    %49 = vector.shape_cast %48 : vector<1x64x64xf32> to vector<64x64xf32>
    %cst_23 = arith.constant dense<0.000000e+00> : vector<16x64xf32>
    %50 = tpu.matmul %40, %49, %cst_23 {dimension_numbers = #tpu.dot_dimension_numbers<[1], [0], [0], [1], [0, 0, 1, 1], [], []>} : vector<16x64xf32>, vector<64x64xf32>, vector<16x64xf32> -> vector<16x64xf32>
    %c0_24 = arith.constant 0 : index
    %c0_25 = arith.constant 0 : index
    %c0_26 = arith.constant 0 : index
    %51 = vector.load %arg8[%c0_24, %c0_25, %c0_26] : memref<2x1x64xf32, #tpu.memory_space<vmem>>, vector<1x1x64xf32>
    %52 = vector.shape_cast %51 : vector<1x1x64xf32> to vector<1x64xf32>
    %53 = vector.broadcast %52 : vector<1x64xf32> to vector<16x64xf32>
    %54 = arith.addf %50, %53 : vector<16x64xf32>
    %c0_27 = arith.constant 0 : index
    %c0_28 = arith.constant 0 : index
    %c0_29 = arith.constant 0 : index
    %55 = vector.load %arg9[%c0_27, %c0_28, %c0_29] : memref<2x64x64xf32, #tpu.memory_space<vmem>>, vector<1x64x64xf32>
    %56 = vector.shape_cast %55 : vector<1x64x64xf32> to vector<64x64xf32>
    %cst_30 = arith.constant dense<0.000000e+00> : vector<16x64xf32>
    %57 = tpu.matmul %40, %56, %cst_30 {dimension_numbers = #tpu.dot_dimension_numbers<[1], [0], [0], [1], [0, 0, 1, 1], [], []>} : vector<16x64xf32>, vector<64x64xf32>, vector<16x64xf32> -> vector<16x64xf32>
    %c0_31 = arith.constant 0 : index
    %c0_32 = arith.constant 0 : index
    %c0_33 = arith.constant 0 : index
    %58 = vector.load %arg10[%c0_31, %c0_32, %c0_33] : memref<2x1x64xf32, #tpu.memory_space<vmem>>, vector<1x1x64xf32>
    %59 = vector.shape_cast %58 : vector<1x1x64xf32> to vector<1x64xf32>
    %60 = vector.broadcast %59 : vector<1x64xf32> to vector<16x64xf32>
    %61 = arith.addf %57, %60 : vector<16x64xf32>
    %c0_34 = arith.constant 0 : index
    %c0_35 = arith.constant 0 : index
    %c0_36 = arith.constant 0 : index
    %62 = vector.load %arg11[%c0_34, %c0_35, %c0_36] : memref<2x64x64xf32, #tpu.memory_space<vmem>>, vector<1x64x64xf32>
    %63 = vector.shape_cast %62 : vector<1x64x64xf32> to vector<64x64xf32>
    %cst_37 = arith.constant dense<0.000000e+00> : vector<16x64xf32>
    %64 = tpu.matmul %40, %63, %cst_37 {dimension_numbers = #tpu.dot_dimension_numbers<[1], [0], [0], [1], [0, 0, 1, 1], [], []>} : vector<16x64xf32>, vector<64x64xf32>, vector<16x64xf32> -> vector<16x64xf32>
    %c0_38 = arith.constant 0 : index
    %c0_39 = arith.constant 0 : index
    %c0_40 = arith.constant 0 : index
    %65 = vector.load %arg12[%c0_38, %c0_39, %c0_40] : memref<2x1x64xf32, #tpu.memory_space<vmem>>, vector<1x1x64xf32>
    %66 = vector.shape_cast %65 : vector<1x1x64xf32> to vector<1x64xf32>
    %67 = vector.broadcast %66 : vector<1x64xf32> to vector<16x64xf32>
    %68 = arith.addf %64, %67 : vector<16x64xf32>
    %69 = vector.shape_cast %54 : vector<16x64xf32> to vector<2x8x64xf32>
    %70 = vector.shape_cast %61 : vector<16x64xf32> to vector<2x8x64xf32>
    %71 = vector.shape_cast %68 : vector<16x64xf32> to vector<2x8x64xf32>
    %72 = vector.extract_strided_slice %69 {offsets = [0, 0, 0], sizes = [2, 8, 16], strides = [1, 1, 1]} : vector<2x8x64xf32> to vector<2x8x16xf32>
    %73 = vector.extract_strided_slice %69 {offsets = [0, 0, 16], sizes = [2, 8, 16], strides = [1, 1, 1]} : vector<2x8x64xf32> to vector<2x8x16xf32>
    %74 = vector.extract_strided_slice %69 {offsets = [0, 0, 32], sizes = [2, 8, 16], strides = [1, 1, 1]} : vector<2x8x64xf32> to vector<2x8x16xf32>
    %75 = vector.extract_strided_slice %69 {offsets = [0, 0, 48], sizes = [2, 8, 16], strides = [1, 1, 1]} : vector<2x8x64xf32> to vector<2x8x16xf32>
    %76 = tpu.concatenate %72, %73, %74, %75 in 0 : vector<2x8x16xf32>, vector<2x8x16xf32>, vector<2x8x16xf32>, vector<2x8x16xf32> -> vector<8x8x16xf32>
    %77 = vector.extract_strided_slice %70 {offsets = [0, 0, 0], sizes = [2, 8, 16], strides = [1, 1, 1]} : vector<2x8x64xf32> to vector<2x8x16xf32>
    %78 = vector.extract_strided_slice %70 {offsets = [0, 0, 16], sizes = [2, 8, 16], strides = [1, 1, 1]} : vector<2x8x64xf32> to vector<2x8x16xf32>
    %79 = vector.extract_strided_slice %70 {offsets = [0, 0, 32], sizes = [2, 8, 16], strides = [1, 1, 1]} : vector<2x8x64xf32> to vector<2x8x16xf32>
    %80 = vector.extract_strided_slice %70 {offsets = [0, 0, 48], sizes = [2, 8, 16], strides = [1, 1, 1]} : vector<2x8x64xf32> to vector<2x8x16xf32>
    %81 = tpu.concatenate %77, %78, %79, %80 in 0 : vector<2x8x16xf32>, vector<2x8x16xf32>, vector<2x8x16xf32>, vector<2x8x16xf32> -> vector<8x8x16xf32>
    %82 = vector.extract_strided_slice %71 {offsets = [0, 0, 0], sizes = [2, 8, 16], strides = [1, 1, 1]} : vector<2x8x64xf32> to vector<2x8x16xf32>
    %83 = vector.extract_strided_slice %71 {offsets = [0, 0, 16], sizes = [2, 8, 16], strides = [1, 1, 1]} : vector<2x8x64xf32> to vector<2x8x16xf32>
    %84 = vector.extract_strided_slice %71 {offsets = [0, 0, 32], sizes = [2, 8, 16], strides = [1, 1, 1]} : vector<2x8x64xf32> to vector<2x8x16xf32>
    %85 = vector.extract_strided_slice %71 {offsets = [0, 0, 48], sizes = [2, 8, 16], strides = [1, 1, 1]} : vector<2x8x64xf32> to vector<2x8x16xf32>
    %86 = tpu.concatenate %82, %83, %84, %85 in 0 : vector<2x8x16xf32>, vector<2x8x16xf32>, vector<2x8x16xf32>, vector<2x8x16xf32> -> vector<8x8x16xf32>
    "tpu.trace_start"() <{level = 10 : i32, message = "xqd,xkd->xqk"}> : () -> ()
    %cst_41 = arith.constant dense<0.000000e+00> : vector<8x8x8xf32>
    %87 = tpu.matmul %76, %81, %cst_41 {dimension_numbers = #tpu.dot_dimension_numbers<[2], [2], [1], [1], [0, 0, 0, 1, 1, 1], [0], [0]>} : vector<8x8x16xf32>, vector<8x8x16xf32>, vector<8x8x8xf32> -> vector<8x8x8xf32>
    "tpu.trace_stop"() : () -> ()
    %cst_42 = arith.constant 2.500000e-01 : f32
    %88 = vector.broadcast %cst_42 : f32 to vector<8x8x8xf32>
    %89 = arith.mulf %87, %88 : vector<8x8x8xf32>
    %90 = vector.broadcast %47 : vector<8x1x8xf32> to vector<8x8x8xf32>
    %91 = arith.addf %89, %90 : vector<8x8x8xf32>
    %cst_43 = arith.constant dense<0xFF800000> : vector<8x8xf32>
    %92 = vector.multi_reduction <maximumf>, %91, %cst_43 [2] : vector<8x8x8xf32> to vector<8x8xf32>
    %93 = vector.shape_cast %92 : vector<8x8xf32> to vector<8x8x1xf32>
    %94 = vector.broadcast %93 : vector<8x8x1xf32> to vector<8x8x8xf32>
    %95 = arith.subf %91, %94 : vector<8x8x8xf32>
    %96 = math.exp %95 : vector<8x8x8xf32>
    %cst_44 = arith.constant dense<0.000000e+00> : vector<8x8xf32>
    %97 = vector.multi_reduction <add>, %96, %cst_44 [2] : vector<8x8x8xf32> to vector<8x8xf32>
    %98 = vector.shape_cast %97 : vector<8x8xf32> to vector<8x8x1xf32>
    %99 = tpu.reciprocal %98 {approx = true} : vector<8x8x1xf32> -> vector<8x8x1xf32>
    %100 = vector.broadcast %99 : vector<8x8x1xf32> to vector<8x8x8xf32>
    %101 = arith.mulf %96, %100 : vector<8x8x8xf32>
    "tpu.trace_start"() <{level = 10 : i32, message = "xqk,xkd->xqd"}> : () -> ()
    %cst_45 = arith.constant dense<0.000000e+00> : vector<8x8x16xf32>
    %102 = tpu.matmul %101, %86, %cst_45 {dimension_numbers = #tpu.dot_dimension_numbers<[2], [1], [1], [2], [0, 0, 0, 1, 1, 2], [0], [0]>} : vector<8x8x8xf32>, vector<8x8x16xf32>, vector<8x8x16xf32> -> vector<8x8x16xf32>
    "tpu.trace_stop"() : () -> ()
    %103 = vector.extract_strided_slice %102 {offsets = [0, 0, 0], sizes = [2, 8, 16], strides = [1, 1, 1]} : vector<8x8x16xf32> to vector<2x8x16xf32>
    %104 = vector.extract_strided_slice %102 {offsets = [2, 0, 0], sizes = [2, 8, 16], strides = [1, 1, 1]} : vector<8x8x16xf32> to vector<2x8x16xf32>
    %105 = vector.extract_strided_slice %102 {offsets = [4, 0, 0], sizes = [2, 8, 16], strides = [1, 1, 1]} : vector<8x8x16xf32> to vector<2x8x16xf32>
    %106 = vector.extract_strided_slice %102 {offsets = [6, 0, 0], sizes = [2, 8, 16], strides = [1, 1, 1]} : vector<8x8x16xf32> to vector<2x8x16xf32>
    %107 = tpu.concatenate %103, %104, %105, %106 in 2 : vector<2x8x16xf32>, vector<2x8x16xf32>, vector<2x8x16xf32>, vector<2x8x16xf32> -> vector<2x8x64xf32>
    %108 = vector.shape_cast %107 : vector<2x8x64xf32> to vector<16x64xf32>
    %c0_46 = arith.constant 0 : index
    %c0_47 = arith.constant 0 : index
    %c0_48 = arith.constant 0 : index
    %109 = vector.load %arg13[%c0_46, %c0_47, %c0_48] : memref<2x64x64xf32, #tpu.memory_space<vmem>>, vector<1x64x64xf32>
    %110 = vector.shape_cast %109 : vector<1x64x64xf32> to vector<64x64xf32>
    %cst_49 = arith.constant dense<0.000000e+00> : vector<16x64xf32>
    %111 = tpu.matmul %108, %110, %cst_49 {dimension_numbers = #tpu.dot_dimension_numbers<[1], [0], [0], [1], [0, 0, 1, 1], [], []>} : vector<16x64xf32>, vector<64x64xf32>, vector<16x64xf32> -> vector<16x64xf32>
    %c0_50 = arith.constant 0 : index
    %c0_51 = arith.constant 0 : index
    %c0_52 = arith.constant 0 : index
    %112 = vector.load %arg14[%c0_50, %c0_51, %c0_52] : memref<2x1x64xf32, #tpu.memory_space<vmem>>, vector<1x1x64xf32>
    %113 = vector.shape_cast %112 : vector<1x1x64xf32> to vector<1x64xf32>
    %114 = vector.broadcast %113 : vector<1x64xf32> to vector<16x64xf32>
    %115 = arith.addf %111, %114 : vector<16x64xf32>
    %116 = arith.addf %40, %115 : vector<16x64xf32>
    %c0_53 = arith.constant 0 : index
    %c0_54 = arith.constant 0 : index
    %c0_55 = arith.constant 0 : index
    %117 = vector.load %arg15[%c0_53, %c0_54, %c0_55] : memref<2x1x64xf32, #tpu.memory_space<vmem>>, vector<1x1x64xf32>
    %118 = vector.shape_cast %117 : vector<1x1x64xf32> to vector<1x64xf32>
    %c0_56 = arith.constant 0 : index
    %c0_57 = arith.constant 0 : index
    %c0_58 = arith.constant 0 : index
    %119 = vector.load %arg16[%c0_56, %c0_57, %c0_58] : memref<2x1x64xf32, #tpu.memory_space<vmem>>, vector<1x1x64xf32>
    %120 = vector.shape_cast %119 : vector<1x1x64xf32> to vector<1x64xf32>
    %cst_59 = arith.constant dense<0.000000e+00> : vector<16xf32>
    %121 = vector.multi_reduction <add>, %116, %cst_59 [1] : vector<16x64xf32> to vector<16xf32>
    %122 = vector.shape_cast %121 : vector<16xf32> to vector<16x1xf32>
    %cst_60 = arith.constant 6.400000e+01 : f32
    %123 = vector.broadcast %cst_60 : f32 to vector<16x1xf32>
    %124 = arith.divf %122, %123 : vector<16x1xf32>
    %125 = vector.broadcast %124 : vector<16x1xf32> to vector<16x64xf32>
    %126 = arith.subf %116, %125 : vector<16x64xf32>
    %127 = arith.mulf %126, %126 : vector<16x64xf32>
    %cst_61 = arith.constant dense<0.000000e+00> : vector<16xf32>
    %128 = vector.multi_reduction <add>, %127, %cst_61 [1] : vector<16x64xf32> to vector<16xf32>
    %129 = vector.shape_cast %128 : vector<16xf32> to vector<16x1xf32>
    %cst_62 = arith.constant 6.400000e+01 : f32
    %130 = vector.broadcast %cst_62 : f32 to vector<16x1xf32>
    %131 = arith.divf %129, %130 : vector<16x1xf32>
    %132 = vector.broadcast %124 : vector<16x1xf32> to vector<16x64xf32>
    %133 = arith.subf %116, %132 : vector<16x64xf32>
    %cst_63 = arith.constant 9.99999996E-13 : f32
    %134 = vector.broadcast %cst_63 : f32 to vector<16x1xf32>
    %135 = arith.addf %131, %134 : vector<16x1xf32>
    %136 = math.rsqrt %135 : vector<16x1xf32>
    %137 = vector.broadcast %136 : vector<16x1xf32> to vector<16x64xf32>
    %138 = arith.mulf %133, %137 : vector<16x64xf32>
    %139 = vector.broadcast %118 : vector<1x64xf32> to vector<16x64xf32>
    %140 = arith.mulf %138, %139 : vector<16x64xf32>
    %141 = vector.broadcast %120 : vector<1x64xf32> to vector<16x64xf32>
    %142 = arith.addf %140, %141 : vector<16x64xf32>
    %c0_64 = arith.constant 0 : index
    %c0_65 = arith.constant 0 : index
    %c0_66 = arith.constant 0 : index
    %143 = vector.load %arg17[%c0_64, %c0_65, %c0_66] : memref<2x64x128xf32, #tpu.memory_space<vmem>>, vector<1x64x128xf32>
    %144 = vector.shape_cast %143 : vector<1x64x128xf32> to vector<64x128xf32>
    %cst_67 = arith.constant dense<0.000000e+00> : vector<16x128xf32>
    %145 = tpu.matmul %142, %144, %cst_67 {dimension_numbers = #tpu.dot_dimension_numbers<[1], [0], [0], [1], [0, 0, 1, 1], [], []>} : vector<16x64xf32>, vector<64x128xf32>, vector<16x128xf32> -> vector<16x128xf32>
    %c0_68 = arith.constant 0 : index
    %c0_69 = arith.constant 0 : index
    %c0_70 = arith.constant 0 : index
    %146 = vector.load %arg18[%c0_68, %c0_69, %c0_70] : memref<2x1x128xf32, #tpu.memory_space<vmem>>, vector<1x1x128xf32>
    %147 = vector.shape_cast %146 : vector<1x1x128xf32> to vector<1x128xf32>
    %148 = vector.broadcast %147 : vector<1x128xf32> to vector<16x128xf32>
    %149 = arith.addf %145, %148 : vector<16x128xf32>
    %cst_71 = arith.constant 5.000000e-01 : f32
    %150 = vector.broadcast %cst_71 : f32 to vector<16x128xf32>
    %151 = arith.mulf %150, %149 : vector<16x128xf32>
    %cst_72 = arith.constant 4.471500e-02 : f32
    %152 = vector.broadcast %cst_72 : f32 to vector<16x128xf32>
    %153 = arith.mulf %152, %149 : vector<16x128xf32>
    %154 = arith.mulf %153, %149 : vector<16x128xf32>
    %155 = arith.mulf %154, %149 : vector<16x128xf32>
    %156 = arith.addf %149, %155 : vector<16x128xf32>
    %cst_73 = arith.constant 0.797884583 : f32
    %157 = vector.broadcast %cst_73 : f32 to vector<16x128xf32>
    %158 = arith.mulf %157, %156 : vector<16x128xf32>
    %159 = math.tanh %158 : vector<16x128xf32>
    %cst_74 = arith.constant 1.000000e+00 : f32
    %160 = vector.broadcast %cst_74 : f32 to vector<16x128xf32>
    %161 = arith.addf %160, %159 : vector<16x128xf32>
    %162 = arith.mulf %151, %161 : vector<16x128xf32>
    %c0_75 = arith.constant 0 : index
    %c0_76 = arith.constant 0 : index
    %c0_77 = arith.constant 0 : index
    %163 = vector.load %arg19[%c0_75, %c0_76, %c0_77] : memref<2x128x64xf32, #tpu.memory_space<vmem>>, vector<1x128x64xf32>
    %164 = vector.shape_cast %163 : vector<1x128x64xf32> to vector<128x64xf32>
    %cst_78 = arith.constant dense<0.000000e+00> : vector<16x64xf32>
    %165 = tpu.matmul %162, %164, %cst_78 {dimension_numbers = #tpu.dot_dimension_numbers<[1], [0], [0], [1], [0, 0, 1, 1], [], []>} : vector<16x128xf32>, vector<128x64xf32>, vector<16x64xf32> -> vector<16x64xf32>
    %c0_79 = arith.constant 0 : index
    %c0_80 = arith.constant 0 : index
    %c0_81 = arith.constant 0 : index
    %166 = vector.load %arg20[%c0_79, %c0_80, %c0_81] : memref<2x1x64xf32, #tpu.memory_space<vmem>>, vector<1x1x64xf32>
    %167 = vector.shape_cast %166 : vector<1x1x64xf32> to vector<1x64xf32>
    %168 = vector.broadcast %167 : vector<1x64xf32> to vector<16x64xf32>
    %169 = arith.addf %165, %168 : vector<16x64xf32>
    %170 = arith.addf %142, %169 : vector<16x64xf32>
    %c0_82 = arith.constant 0 : index
    %c0_83 = arith.constant 0 : index
    %c0_84 = arith.constant 0 : index
    %171 = vector.load %arg21[%c0_82, %c0_83, %c0_84] : memref<2x1x64xf32, #tpu.memory_space<vmem>>, vector<1x1x64xf32>
    %172 = vector.shape_cast %171 : vector<1x1x64xf32> to vector<1x64xf32>
    %c0_85 = arith.constant 0 : index
    %c0_86 = arith.constant 0 : index
    %c0_87 = arith.constant 0 : index
    %173 = vector.load %arg22[%c0_85, %c0_86, %c0_87] : memref<2x1x64xf32, #tpu.memory_space<vmem>>, vector<1x1x64xf32>
    %174 = vector.shape_cast %173 : vector<1x1x64xf32> to vector<1x64xf32>
    %cst_88 = arith.constant dense<0.000000e+00> : vector<16xf32>
    %175 = vector.multi_reduction <add>, %170, %cst_88 [1] : vector<16x64xf32> to vector<16xf32>
    %176 = vector.shape_cast %175 : vector<16xf32> to vector<16x1xf32>
    %cst_89 = arith.constant 6.400000e+01 : f32
    %177 = vector.broadcast %cst_89 : f32 to vector<16x1xf32>
    %178 = arith.divf %176, %177 : vector<16x1xf32>
    %179 = vector.broadcast %178 : vector<16x1xf32> to vector<16x64xf32>
    %180 = arith.subf %170, %179 : vector<16x64xf32>
    %181 = arith.mulf %180, %180 : vector<16x64xf32>
    %cst_90 = arith.constant dense<0.000000e+00> : vector<16xf32>
    %182 = vector.multi_reduction <add>, %181, %cst_90 [1] : vector<16x64xf32> to vector<16xf32>
    %183 = vector.shape_cast %182 : vector<16xf32> to vector<16x1xf32>
    %cst_91 = arith.constant 6.400000e+01 : f32
    %184 = vector.broadcast %cst_91 : f32 to vector<16x1xf32>
    %185 = arith.divf %183, %184 : vector<16x1xf32>
    %186 = vector.broadcast %178 : vector<16x1xf32> to vector<16x64xf32>
    %187 = arith.subf %170, %186 : vector<16x64xf32>
    %cst_92 = arith.constant 9.99999996E-13 : f32
    %188 = vector.broadcast %cst_92 : f32 to vector<16x1xf32>
    %189 = arith.addf %185, %188 : vector<16x1xf32>
    %190 = math.rsqrt %189 : vector<16x1xf32>
    %191 = vector.broadcast %190 : vector<16x1xf32> to vector<16x64xf32>
    %192 = arith.mulf %187, %191 : vector<16x64xf32>
    %193 = vector.broadcast %172 : vector<1x64xf32> to vector<16x64xf32>
    %194 = arith.mulf %192, %193 : vector<16x64xf32>
    %195 = vector.broadcast %174 : vector<1x64xf32> to vector<16x64xf32>
    %196 = arith.addf %194, %195 : vector<16x64xf32>
    %c1 = arith.constant 1 : index
    %c0_93 = arith.constant 0 : index
    %c0_94 = arith.constant 0 : index
    %197 = vector.load %arg7[%c1, %c0_93, %c0_94] : memref<2x64x64xf32, #tpu.memory_space<vmem>>, vector<1x64x64xf32>
    %198 = vector.shape_cast %197 : vector<1x64x64xf32> to vector<64x64xf32>
    %cst_95 = arith.constant dense<0.000000e+00> : vector<16x64xf32>
    %199 = tpu.matmul %196, %198, %cst_95 {dimension_numbers = #tpu.dot_dimension_numbers<[1], [0], [0], [1], [0, 0, 1, 1], [], []>} : vector<16x64xf32>, vector<64x64xf32>, vector<16x64xf32> -> vector<16x64xf32>
    %c1_96 = arith.constant 1 : index
    %c0_97 = arith.constant 0 : index
    %c0_98 = arith.constant 0 : index
    %200 = vector.load %arg8[%c1_96, %c0_97, %c0_98] : memref<2x1x64xf32, #tpu.memory_space<vmem>>, vector<1x1x64xf32>
    %201 = vector.shape_cast %200 : vector<1x1x64xf32> to vector<1x64xf32>
    %202 = vector.broadcast %201 : vector<1x64xf32> to vector<16x64xf32>
    %203 = arith.addf %199, %202 : vector<16x64xf32>
    %c1_99 = arith.constant 1 : index
    %c0_100 = arith.constant 0 : index
    %c0_101 = arith.constant 0 : index
    %204 = vector.load %arg9[%c1_99, %c0_100, %c0_101] : memref<2x64x64xf32, #tpu.memory_space<vmem>>, vector<1x64x64xf32>
    %205 = vector.shape_cast %204 : vector<1x64x64xf32> to vector<64x64xf32>
    %cst_102 = arith.constant dense<0.000000e+00> : vector<16x64xf32>
    %206 = tpu.matmul %196, %205, %cst_102 {dimension_numbers = #tpu.dot_dimension_numbers<[1], [0], [0], [1], [0, 0, 1, 1], [], []>} : vector<16x64xf32>, vector<64x64xf32>, vector<16x64xf32> -> vector<16x64xf32>
    %c1_103 = arith.constant 1 : index
    %c0_104 = arith.constant 0 : index
    %c0_105 = arith.constant 0 : index
    %207 = vector.load %arg10[%c1_103, %c0_104, %c0_105] : memref<2x1x64xf32, #tpu.memory_space<vmem>>, vector<1x1x64xf32>
    %208 = vector.shape_cast %207 : vector<1x1x64xf32> to vector<1x64xf32>
    %209 = vector.broadcast %208 : vector<1x64xf32> to vector<16x64xf32>
    %210 = arith.addf %206, %209 : vector<16x64xf32>
    %c1_106 = arith.constant 1 : index
    %c0_107 = arith.constant 0 : index
    %c0_108 = arith.constant 0 : index
    %211 = vector.load %arg11[%c1_106, %c0_107, %c0_108] : memref<2x64x64xf32, #tpu.memory_space<vmem>>, vector<1x64x64xf32>
    %212 = vector.shape_cast %211 : vector<1x64x64xf32> to vector<64x64xf32>
    %cst_109 = arith.constant dense<0.000000e+00> : vector<16x64xf32>
    %213 = tpu.matmul %196, %212, %cst_109 {dimension_numbers = #tpu.dot_dimension_numbers<[1], [0], [0], [1], [0, 0, 1, 1], [], []>} : vector<16x64xf32>, vector<64x64xf32>, vector<16x64xf32> -> vector<16x64xf32>
    %c1_110 = arith.constant 1 : index
    %c0_111 = arith.constant 0 : index
    %c0_112 = arith.constant 0 : index
    %214 = vector.load %arg12[%c1_110, %c0_111, %c0_112] : memref<2x1x64xf32, #tpu.memory_space<vmem>>, vector<1x1x64xf32>
    %215 = vector.shape_cast %214 : vector<1x1x64xf32> to vector<1x64xf32>
    %216 = vector.broadcast %215 : vector<1x64xf32> to vector<16x64xf32>
    %217 = arith.addf %213, %216 : vector<16x64xf32>
    %218 = vector.shape_cast %203 : vector<16x64xf32> to vector<2x8x64xf32>
    %219 = vector.shape_cast %210 : vector<16x64xf32> to vector<2x8x64xf32>
    %220 = vector.shape_cast %217 : vector<16x64xf32> to vector<2x8x64xf32>
    %221 = vector.extract_strided_slice %218 {offsets = [0, 0, 0], sizes = [2, 8, 16], strides = [1, 1, 1]} : vector<2x8x64xf32> to vector<2x8x16xf32>
    %222 = vector.extract_strided_slice %218 {offsets = [0, 0, 16], sizes = [2, 8, 16], strides = [1, 1, 1]} : vector<2x8x64xf32> to vector<2x8x16xf32>
    %223 = vector.extract_strided_slice %218 {offsets = [0, 0, 32], sizes = [2, 8, 16], strides = [1, 1, 1]} : vector<2x8x64xf32> to vector<2x8x16xf32>
    %224 = vector.extract_strided_slice %218 {offsets = [0, 0, 48], sizes = [2, 8, 16], strides = [1, 1, 1]} : vector<2x8x64xf32> to vector<2x8x16xf32>
    %225 = tpu.concatenate %221, %222, %223, %224 in 0 : vector<2x8x16xf32>, vector<2x8x16xf32>, vector<2x8x16xf32>, vector<2x8x16xf32> -> vector<8x8x16xf32>
    %226 = vector.extract_strided_slice %219 {offsets = [0, 0, 0], sizes = [2, 8, 16], strides = [1, 1, 1]} : vector<2x8x64xf32> to vector<2x8x16xf32>
    %227 = vector.extract_strided_slice %219 {offsets = [0, 0, 16], sizes = [2, 8, 16], strides = [1, 1, 1]} : vector<2x8x64xf32> to vector<2x8x16xf32>
    %228 = vector.extract_strided_slice %219 {offsets = [0, 0, 32], sizes = [2, 8, 16], strides = [1, 1, 1]} : vector<2x8x64xf32> to vector<2x8x16xf32>
    %229 = vector.extract_strided_slice %219 {offsets = [0, 0, 48], sizes = [2, 8, 16], strides = [1, 1, 1]} : vector<2x8x64xf32> to vector<2x8x16xf32>
    %230 = tpu.concatenate %226, %227, %228, %229 in 0 : vector<2x8x16xf32>, vector<2x8x16xf32>, vector<2x8x16xf32>, vector<2x8x16xf32> -> vector<8x8x16xf32>
    %231 = vector.extract_strided_slice %220 {offsets = [0, 0, 0], sizes = [2, 8, 16], strides = [1, 1, 1]} : vector<2x8x64xf32> to vector<2x8x16xf32>
    %232 = vector.extract_strided_slice %220 {offsets = [0, 0, 16], sizes = [2, 8, 16], strides = [1, 1, 1]} : vector<2x8x64xf32> to vector<2x8x16xf32>
    %233 = vector.extract_strided_slice %220 {offsets = [0, 0, 32], sizes = [2, 8, 16], strides = [1, 1, 1]} : vector<2x8x64xf32> to vector<2x8x16xf32>
    %234 = vector.extract_strided_slice %220 {offsets = [0, 0, 48], sizes = [2, 8, 16], strides = [1, 1, 1]} : vector<2x8x64xf32> to vector<2x8x16xf32>
    %235 = tpu.concatenate %231, %232, %233, %234 in 0 : vector<2x8x16xf32>, vector<2x8x16xf32>, vector<2x8x16xf32>, vector<2x8x16xf32> -> vector<8x8x16xf32>
    "tpu.trace_start"() <{level = 10 : i32, message = "xqd,xkd->xqk"}> : () -> ()
    %cst_113 = arith.constant dense<0.000000e+00> : vector<8x8x8xf32>
    %236 = tpu.matmul %225, %230, %cst_113 {dimension_numbers = #tpu.dot_dimension_numbers<[2], [2], [1], [1], [0, 0, 0, 1, 1, 1], [0], [0]>} : vector<8x8x16xf32>, vector<8x8x16xf32>, vector<8x8x8xf32> -> vector<8x8x8xf32>
    "tpu.trace_stop"() : () -> ()
    %cst_114 = arith.constant 2.500000e-01 : f32
    %237 = vector.broadcast %cst_114 : f32 to vector<8x8x8xf32>
    %238 = arith.mulf %236, %237 : vector<8x8x8xf32>
    %239 = vector.broadcast %47 : vector<8x1x8xf32> to vector<8x8x8xf32>
    %240 = arith.addf %238, %239 : vector<8x8x8xf32>
    %cst_115 = arith.constant dense<0xFF800000> : vector<8x8xf32>
    %241 = vector.multi_reduction <maximumf>, %240, %cst_115 [2] : vector<8x8x8xf32> to vector<8x8xf32>
    %242 = vector.shape_cast %241 : vector<8x8xf32> to vector<8x8x1xf32>
    %243 = vector.broadcast %242 : vector<8x8x1xf32> to vector<8x8x8xf32>
    %244 = arith.subf %240, %243 : vector<8x8x8xf32>
    %245 = math.exp %244 : vector<8x8x8xf32>
    %cst_116 = arith.constant dense<0.000000e+00> : vector<8x8xf32>
    %246 = vector.multi_reduction <add>, %245, %cst_116 [2] : vector<8x8x8xf32> to vector<8x8xf32>
    %247 = vector.shape_cast %246 : vector<8x8xf32> to vector<8x8x1xf32>
    %248 = tpu.reciprocal %247 {approx = true} : vector<8x8x1xf32> -> vector<8x8x1xf32>
    %249 = vector.broadcast %248 : vector<8x8x1xf32> to vector<8x8x8xf32>
    %250 = arith.mulf %245, %249 : vector<8x8x8xf32>
    "tpu.trace_start"() <{level = 10 : i32, message = "xqk,xkd->xqd"}> : () -> ()
    %cst_117 = arith.constant dense<0.000000e+00> : vector<8x8x16xf32>
    %251 = tpu.matmul %250, %235, %cst_117 {dimension_numbers = #tpu.dot_dimension_numbers<[2], [1], [1], [2], [0, 0, 0, 1, 1, 2], [0], [0]>} : vector<8x8x8xf32>, vector<8x8x16xf32>, vector<8x8x16xf32> -> vector<8x8x16xf32>
    "tpu.trace_stop"() : () -> ()
    %252 = vector.extract_strided_slice %251 {offsets = [0, 0, 0], sizes = [2, 8, 16], strides = [1, 1, 1]} : vector<8x8x16xf32> to vector<2x8x16xf32>
    %253 = vector.extract_strided_slice %251 {offsets = [2, 0, 0], sizes = [2, 8, 16], strides = [1, 1, 1]} : vector<8x8x16xf32> to vector<2x8x16xf32>
    %254 = vector.extract_strided_slice %251 {offsets = [4, 0, 0], sizes = [2, 8, 16], strides = [1, 1, 1]} : vector<8x8x16xf32> to vector<2x8x16xf32>
    %255 = vector.extract_strided_slice %251 {offsets = [6, 0, 0], sizes = [2, 8, 16], strides = [1, 1, 1]} : vector<8x8x16xf32> to vector<2x8x16xf32>
    %256 = tpu.concatenate %252, %253, %254, %255 in 2 : vector<2x8x16xf32>, vector<2x8x16xf32>, vector<2x8x16xf32>, vector<2x8x16xf32> -> vector<2x8x64xf32>
    %257 = vector.shape_cast %256 : vector<2x8x64xf32> to vector<16x64xf32>
    %c1_118 = arith.constant 1 : index
    %c0_119 = arith.constant 0 : index
    %c0_120 = arith.constant 0 : index
    %258 = vector.load %arg13[%c1_118, %c0_119, %c0_120] : memref<2x64x64xf32, #tpu.memory_space<vmem>>, vector<1x64x64xf32>
    %259 = vector.shape_cast %258 : vector<1x64x64xf32> to vector<64x64xf32>
    %cst_121 = arith.constant dense<0.000000e+00> : vector<16x64xf32>
    %260 = tpu.matmul %257, %259, %cst_121 {dimension_numbers = #tpu.dot_dimension_numbers<[1], [0], [0], [1], [0, 0, 1, 1], [], []>} : vector<16x64xf32>, vector<64x64xf32>, vector<16x64xf32> -> vector<16x64xf32>
    %c1_122 = arith.constant 1 : index
    %c0_123 = arith.constant 0 : index
    %c0_124 = arith.constant 0 : index
    %261 = vector.load %arg14[%c1_122, %c0_123, %c0_124] : memref<2x1x64xf32, #tpu.memory_space<vmem>>, vector<1x1x64xf32>
    %262 = vector.shape_cast %261 : vector<1x1x64xf32> to vector<1x64xf32>
    %263 = vector.broadcast %262 : vector<1x64xf32> to vector<16x64xf32>
    %264 = arith.addf %260, %263 : vector<16x64xf32>
    %265 = arith.addf %196, %264 : vector<16x64xf32>
    %c1_125 = arith.constant 1 : index
    %c0_126 = arith.constant 0 : index
    %c0_127 = arith.constant 0 : index
    %266 = vector.load %arg15[%c1_125, %c0_126, %c0_127] : memref<2x1x64xf32, #tpu.memory_space<vmem>>, vector<1x1x64xf32>
    %267 = vector.shape_cast %266 : vector<1x1x64xf32> to vector<1x64xf32>
    %c1_128 = arith.constant 1 : index
    %c0_129 = arith.constant 0 : index
    %c0_130 = arith.constant 0 : index
    %268 = vector.load %arg16[%c1_128, %c0_129, %c0_130] : memref<2x1x64xf32, #tpu.memory_space<vmem>>, vector<1x1x64xf32>
    %269 = vector.shape_cast %268 : vector<1x1x64xf32> to vector<1x64xf32>
    %cst_131 = arith.constant dense<0.000000e+00> : vector<16xf32>
    %270 = vector.multi_reduction <add>, %265, %cst_131 [1] : vector<16x64xf32> to vector<16xf32>
    %271 = vector.shape_cast %270 : vector<16xf32> to vector<16x1xf32>
    %cst_132 = arith.constant 6.400000e+01 : f32
    %272 = vector.broadcast %cst_132 : f32 to vector<16x1xf32>
    %273 = arith.divf %271, %272 : vector<16x1xf32>
    %274 = vector.broadcast %273 : vector<16x1xf32> to vector<16x64xf32>
    %275 = arith.subf %265, %274 : vector<16x64xf32>
    %276 = arith.mulf %275, %275 : vector<16x64xf32>
    %cst_133 = arith.constant dense<0.000000e+00> : vector<16xf32>
    %277 = vector.multi_reduction <add>, %276, %cst_133 [1] : vector<16x64xf32> to vector<16xf32>
    %278 = vector.shape_cast %277 : vector<16xf32> to vector<16x1xf32>
    %cst_134 = arith.constant 6.400000e+01 : f32
    %279 = vector.broadcast %cst_134 : f32 to vector<16x1xf32>
    %280 = arith.divf %278, %279 : vector<16x1xf32>
    %281 = vector.broadcast %273 : vector<16x1xf32> to vector<16x64xf32>
    %282 = arith.subf %265, %281 : vector<16x64xf32>
    %cst_135 = arith.constant 9.99999996E-13 : f32
    %283 = vector.broadcast %cst_135 : f32 to vector<16x1xf32>
    %284 = arith.addf %280, %283 : vector<16x1xf32>
    %285 = math.rsqrt %284 : vector<16x1xf32>
    %286 = vector.broadcast %285 : vector<16x1xf32> to vector<16x64xf32>
    %287 = arith.mulf %282, %286 : vector<16x64xf32>
    %288 = vector.broadcast %267 : vector<1x64xf32> to vector<16x64xf32>
    %289 = arith.mulf %287, %288 : vector<16x64xf32>
    %290 = vector.broadcast %269 : vector<1x64xf32> to vector<16x64xf32>
    %291 = arith.addf %289, %290 : vector<16x64xf32>
    %c1_136 = arith.constant 1 : index
    %c0_137 = arith.constant 0 : index
    %c0_138 = arith.constant 0 : index
    %292 = vector.load %arg17[%c1_136, %c0_137, %c0_138] : memref<2x64x128xf32, #tpu.memory_space<vmem>>, vector<1x64x128xf32>
    %293 = vector.shape_cast %292 : vector<1x64x128xf32> to vector<64x128xf32>
    %cst_139 = arith.constant dense<0.000000e+00> : vector<16x128xf32>
    %294 = tpu.matmul %291, %293, %cst_139 {dimension_numbers = #tpu.dot_dimension_numbers<[1], [0], [0], [1], [0, 0, 1, 1], [], []>} : vector<16x64xf32>, vector<64x128xf32>, vector<16x128xf32> -> vector<16x128xf32>
    %c1_140 = arith.constant 1 : index
    %c0_141 = arith.constant 0 : index
    %c0_142 = arith.constant 0 : index
    %295 = vector.load %arg18[%c1_140, %c0_141, %c0_142] : memref<2x1x128xf32, #tpu.memory_space<vmem>>, vector<1x1x128xf32>
    %296 = vector.shape_cast %295 : vector<1x1x128xf32> to vector<1x128xf32>
    %297 = vector.broadcast %296 : vector<1x128xf32> to vector<16x128xf32>
    %298 = arith.addf %294, %297 : vector<16x128xf32>
    %cst_143 = arith.constant 5.000000e-01 : f32
    %299 = vector.broadcast %cst_143 : f32 to vector<16x128xf32>
    %300 = arith.mulf %299, %298 : vector<16x128xf32>
    %cst_144 = arith.constant 4.471500e-02 : f32
    %301 = vector.broadcast %cst_144 : f32 to vector<16x128xf32>
    %302 = arith.mulf %301, %298 : vector<16x128xf32>
    %303 = arith.mulf %302, %298 : vector<16x128xf32>
    %304 = arith.mulf %303, %298 : vector<16x128xf32>
    %305 = arith.addf %298, %304 : vector<16x128xf32>
    %cst_145 = arith.constant 0.797884583 : f32
    %306 = vector.broadcast %cst_145 : f32 to vector<16x128xf32>
    %307 = arith.mulf %306, %305 : vector<16x128xf32>
    %308 = math.tanh %307 : vector<16x128xf32>
    %cst_146 = arith.constant 1.000000e+00 : f32
    %309 = vector.broadcast %cst_146 : f32 to vector<16x128xf32>
    %310 = arith.addf %309, %308 : vector<16x128xf32>
    %311 = arith.mulf %300, %310 : vector<16x128xf32>
    %c1_147 = arith.constant 1 : index
    %c0_148 = arith.constant 0 : index
    %c0_149 = arith.constant 0 : index
    %312 = vector.load %arg19[%c1_147, %c0_148, %c0_149] : memref<2x128x64xf32, #tpu.memory_space<vmem>>, vector<1x128x64xf32>
    %313 = vector.shape_cast %312 : vector<1x128x64xf32> to vector<128x64xf32>
    %cst_150 = arith.constant dense<0.000000e+00> : vector<16x64xf32>
    %314 = tpu.matmul %311, %313, %cst_150 {dimension_numbers = #tpu.dot_dimension_numbers<[1], [0], [0], [1], [0, 0, 1, 1], [], []>} : vector<16x128xf32>, vector<128x64xf32>, vector<16x64xf32> -> vector<16x64xf32>
    %c1_151 = arith.constant 1 : index
    %c0_152 = arith.constant 0 : index
    %c0_153 = arith.constant 0 : index
    %315 = vector.load %arg20[%c1_151, %c0_152, %c0_153] : memref<2x1x64xf32, #tpu.memory_space<vmem>>, vector<1x1x64xf32>
    %316 = vector.shape_cast %315 : vector<1x1x64xf32> to vector<1x64xf32>
    %317 = vector.broadcast %316 : vector<1x64xf32> to vector<16x64xf32>
    %318 = arith.addf %314, %317 : vector<16x64xf32>
    %319 = arith.addf %291, %318 : vector<16x64xf32>
    %c1_154 = arith.constant 1 : index
    %c0_155 = arith.constant 0 : index
    %c0_156 = arith.constant 0 : index
    %320 = vector.load %arg21[%c1_154, %c0_155, %c0_156] : memref<2x1x64xf32, #tpu.memory_space<vmem>>, vector<1x1x64xf32>
    %321 = vector.shape_cast %320 : vector<1x1x64xf32> to vector<1x64xf32>
    %c1_157 = arith.constant 1 : index
    %c0_158 = arith.constant 0 : index
    %c0_159 = arith.constant 0 : index
    %322 = vector.load %arg22[%c1_157, %c0_158, %c0_159] : memref<2x1x64xf32, #tpu.memory_space<vmem>>, vector<1x1x64xf32>
    %323 = vector.shape_cast %322 : vector<1x1x64xf32> to vector<1x64xf32>
    %cst_160 = arith.constant dense<0.000000e+00> : vector<16xf32>
    %324 = vector.multi_reduction <add>, %319, %cst_160 [1] : vector<16x64xf32> to vector<16xf32>
    %325 = vector.shape_cast %324 : vector<16xf32> to vector<16x1xf32>
    %cst_161 = arith.constant 6.400000e+01 : f32
    %326 = vector.broadcast %cst_161 : f32 to vector<16x1xf32>
    %327 = arith.divf %325, %326 : vector<16x1xf32>
    %328 = vector.broadcast %327 : vector<16x1xf32> to vector<16x64xf32>
    %329 = arith.subf %319, %328 : vector<16x64xf32>
    %330 = arith.mulf %329, %329 : vector<16x64xf32>
    %cst_162 = arith.constant dense<0.000000e+00> : vector<16xf32>
    %331 = vector.multi_reduction <add>, %330, %cst_162 [1] : vector<16x64xf32> to vector<16xf32>
    %332 = vector.shape_cast %331 : vector<16xf32> to vector<16x1xf32>
    %cst_163 = arith.constant 6.400000e+01 : f32
    %333 = vector.broadcast %cst_163 : f32 to vector<16x1xf32>
    %334 = arith.divf %332, %333 : vector<16x1xf32>
    %335 = vector.broadcast %327 : vector<16x1xf32> to vector<16x64xf32>
    %336 = arith.subf %319, %335 : vector<16x64xf32>
    %cst_164 = arith.constant 9.99999996E-13 : f32
    %337 = vector.broadcast %cst_164 : f32 to vector<16x1xf32>
    %338 = arith.addf %334, %337 : vector<16x1xf32>
    %339 = math.rsqrt %338 : vector<16x1xf32>
    %340 = vector.broadcast %339 : vector<16x1xf32> to vector<16x64xf32>
    %341 = arith.mulf %336, %340 : vector<16x64xf32>
    %342 = vector.broadcast %321 : vector<1x64xf32> to vector<16x64xf32>
    %343 = arith.mulf %341, %342 : vector<16x64xf32>
    %344 = vector.broadcast %323 : vector<1x64xf32> to vector<16x64xf32>
    %345 = arith.addf %343, %344 : vector<16x64xf32>
    %346 = vector.extract_strided_slice %345 {offsets = [0, 0], sizes = [1, 64], strides = [1, 1]} : vector<16x64xf32> to vector<1x64xf32>
    %347 = vector.extract_strided_slice %345 {offsets = [8, 0], sizes = [1, 64], strides = [1, 1]} : vector<16x64xf32> to vector<1x64xf32>
    %348 = tpu.concatenate %346, %347 in 0 : vector<1x64xf32>, vector<1x64xf32> -> vector<2x64xf32>
    %c0_165 = arith.constant 0 : index
    %c0_166 = arith.constant 0 : index
    %349 = vector.load %arg23[%c0_165, %c0_166] : memref<64x50xf32, #tpu.memory_space<vmem>>, vector<64x50xf32>
    %cst_167 = arith.constant dense<0.000000e+00> : vector<2x50xf32>
    %350 = tpu.matmul %348, %349, %cst_167 {dimension_numbers = #tpu.dot_dimension_numbers<[1], [0], [0], [1], [0, 0, 1, 1], [], []>} : vector<2x64xf32>, vector<64x50xf32>, vector<2x50xf32> -> vector<2x50xf32>
    %c0_168 = arith.constant 0 : index
    %c0_169 = arith.constant 0 : index
    %351 = vector.load %arg24[%c0_168, %c0_169] : memref<1x50xf32, #tpu.memory_space<vmem>>, vector<1x50xf32>
    %352 = vector.broadcast %351 : vector<1x50xf32> to vector<2x50xf32>
    %353 = arith.addf %350, %352 : vector<2x50xf32>
    %cst_170 = arith.constant dense<0xFF800000> : vector<2xf32>
    %354 = vector.multi_reduction <maximumf>, %353, %cst_170 [1] : vector<2x50xf32> to vector<2xf32>
    %355 = vector.shape_cast %354 : vector<2xf32> to vector<2x1xf32>
    %356 = vector.broadcast %355 : vector<2x1xf32> to vector<2x50xf32>
    %357 = arith.subf %353, %356 : vector<2x50xf32>
    %358 = math.exp %357 : vector<2x50xf32>
    %cst_171 = arith.constant dense<0.000000e+00> : vector<2xf32>
    %359 = vector.multi_reduction <add>, %358, %cst_171 [1] : vector<2x50xf32> to vector<2xf32>
    %360 = vector.shape_cast %359 : vector<2xf32> to vector<2x1xf32>
    %361 = tpu.reciprocal %360 {approx = true} : vector<2x1xf32> -> vector<2x1xf32>
    %362 = vector.broadcast %361 : vector<2x1xf32> to vector<2x50xf32>
    %363 = arith.mulf %358, %362 : vector<2x50xf32>
    %c0_172 = arith.constant 0 : index
    %c0_173 = arith.constant 0 : index
    %364 = vector.load %arg25[%c0_172, %c0_173] : memref<50x3xf32, #tpu.memory_space<vmem>>, vector<50x3xf32>
    %cst_174 = arith.constant dense<0.000000e+00> : vector<2x3xf32>
    %365 = tpu.matmul %363, %364, %cst_174 {dimension_numbers = #tpu.dot_dimension_numbers<[1], [0], [0], [1], [0, 0, 1, 1], [], []>} : vector<2x50xf32>, vector<50x3xf32>, vector<2x3xf32> -> vector<2x3xf32>
    %c0_175 = arith.constant 0 : index
    %c0_176 = arith.constant 0 : index
    %366 = vector.load %arg26[%c0_175, %c0_176] : memref<1x3xf32, #tpu.memory_space<vmem>>, vector<1x3xf32>
    %367 = vector.broadcast %366 : vector<1x3xf32> to vector<2x3xf32>
    %368 = arith.addf %365, %367 : vector<2x3xf32>
    %c0_177 = arith.constant 0 : index
    %c0_178 = arith.constant 0 : index
    %369 = vector.load %arg27[%c0_177, %c0_178] : memref<2x3xf32, #tpu.memory_space<vmem>>, vector<2x3xf32>
    tpu.vector_store %arg27[%c0_177, %c0_178], %368 {strides = array<i32>} : memref<2x3xf32, #tpu.memory_space<vmem>>, vector<2x3xf32>,
    return
  }
}

</mosaic_0001>

<bundles_post_ra>
// kernel: bertnet_forward.1
= control target key start
LH: loop header
LB: loop body
LE: loop exit
PB: predicated region body
PF: predicated region fallthrough
CT: control target
= control target key end

     0   :  { %s7590_s0 = inlined_call_operand.vmem [shape: s32[16,1], index: 0, kind: input, shape index: {}]   ;;  %s7591_s1 = inlined_call_operand.vmem [shape: f32[2,8], index: 1, kind: input, shape index: {}]   ;;  %s7592_s2 = inlined_call_operand.vmem [shape: f32[128,64], index: 2, kind: input, shape index: {}]   ;;  %s7593_s3 = inlined_call_operand.vmem [shape: f32[8,64], index: 3, kind: input, shape index: {}]   ;;  %s7594_s4 = inlined_call_operand.vmem [shape: f32[1,64], index: 4, kind: input, shape index: {}]   ;;  %s7595_s5 = inlined_call_operand.hbm [shape: f32[1,64], index: 5, kind: input, shape index: {}]   ;;  %s7596_s6 = inlined_call_operand.hbm [shape: f32[1,64], index: 6, kind: input, shape index: {}]   ;;  %s7597_s7 = inlined_call_operand.vmem [shape: f32[2,64,64], index: 7, kind: input, shape index: {}]   ;;  %s7598_s8 = inlined_call_operand.vmem [shape: f32[2,1,64], index: 8, kind: input, shape index: {}]   ;;  %s7599_s9 = inlined_call_operand.vmem [shape: f32[2,64,64], index: 9, kind: input, shape index: {}]   ;;  %s7600_s10 = inlined_call_operand.hbm [shape: f32[2,1,64], index: 10, kind: input, shape index: {}]   ;;  %s7601_s11 = inlined_call_operand.vmem [shape: f32[2,64,64], index: 11, kind: input, shape index: {}]   ;;  %s7602_s12 = inlined_call_operand.hbm [shape: f32[2,1,64], index: 12, kind: input, shape index: {}]   ;;  %s7603_s13 = inlined_call_operand.vmem [shape: f32[2,64,64], index: 13, kind: input, shape index: {}]   ;;  %s7604_s14 = inlined_call_operand.hbm [shape: f32[2,1,64], index: 14, kind: input, shape index: {}]   ;;  %s7605_s15 = inlined_call_operand.vmem [shape: f32[2,1,64], index: 15, kind: input, shape index: {}]   ;;  %s7606_s16 = inlined_call_operand.hbm [shape: f32[2,1,64], index: 16, kind: input, shape index: {}]   ;;  %s7607_s17 = inlined_call_operand.vmem [shape: f32[2,64,128], index: 17, kind: input, shape index: {}]   ;;  %s7608_s18 = inlined_call_operand.hbm [shape: f32[2,1,128], index: 18, kind: input, shape index: {}]   ;;  %s7609_s19 = inlined_call_operand.vmem [shape: f32[2,128,64], index: 19, kind: input, shape index: {}]   ;;  %s7610_s20 = inlined_call_operand.hbm [shape: f32[2,1,64], index: 20, kind: input, shape index: {}]   ;;  %s7611_s21 = inlined_call_operand.vmem [shape: f32[2,1,64], index: 21, kind: input, shape index: {}]   ;;  %s7612_s22 = inlined_call_operand.hbm [shape: f32[2,1,64], index: 22, kind: input, shape index: {}]   ;;  %s7613_s23 = inlined_call_operand.vmem [shape: f32[64,50], index: 23, kind: input, shape index: {}]   ;;  %s7614_s24 = inlined_call_operand.hbm [shape: f32[1,50], index: 24, kind: input, shape index: {}]   ;;  %s7615_s25 = inlined_call_operand.vmem [shape: f32[50,3], index: 25, kind: input, shape index: {}]   ;;  %s7616_s26 = inlined_call_operand.hbm [shape: f32[1,3], index: 26, kind: input, shape index: {}]   ;;  %s7617_s27 = inlined_call_operand.hbm [shape: f32[2,3], index: 27, kind: output, shape index: {}]  }
   0x1   :  { %7627 = sst [smem:[#allocation28_spill]] %s7590_s0 }
   0x2   :  { %7628 = sst [smem:[#allocation29_spill]] %s7591_s1 }
   0x3   :  { %7629 = sst [smem:[#allocation30_spill]] %s7592_s2 }
   0x4   :  { %7630 = sst [smem:[#allocation31_spill]] %s7593_s3 }
   0x5   :  { %7631 = sst [smem:[#allocation32_spill]] %s7594_s4 }
   0x6   :  { %7632 = sst [smem:[#allocation33_spill]] %s7595_s5 }
   0x7   :  { %7633 = sst [smem:[#allocation34_spill]] %s7596_s6 }
   0x8   :  { %7634 = sst [smem:[#allocation35_spill]] %s7597_s7 }
   0x9   :  { %7635 = sst [smem:[#allocation36_spill]] %s7598_s8 }
   0xa   :  { %7636 = sst [smem:[#allocation37_spill]] %s7599_s9 }
   0xb   :  { %7637 = sst [smem:[#allocation38_spill]] %s7600_s10 }
   0xc   :  { %7638 = sst [smem:[#allocation39_spill]] %s7601_s11 }
   0xd   :  { %32 = vsyncpa [#allocation3], 0 }
   0xe   :  { %33 = vsyncpa [#allocation6], 0 }
   0xf   :  { %34 = vsyncpa [#allocation9], 0 }
  0x10   :  { %35 = vsyncpa [#allocation12], 0 }
  0x11   :  { %36 = vsyncpa [#allocation15], 0 }
  0x12   :  { %37 = vsyncpa [#allocation18], 0 }
  0x13   :  { %38 = vsyncpa [#allocation4], 0  ;;  %s6367_s7 = smov [#allocation5]   ;;  %s7639_s9 = sld [smem:[#allocation34_spill]] }
  0x14   :  { %s65_s4 = sshll.u32 %s6367_s7, 4  ;;  %s66_s4 = int_to_ptr.vmem [resolvable:$true] %s65_s4 }
  0x19   :  { %s6089_s5 = scalar_lea.hbm %s7639_s9, 16 }
  0x1a   :  { %p6090_p0 = scmp.ne.s32.totalorder %s7639_s9, %s6089_s5  ;;  %p6093_p1 = scmp.lt.u32.totalorder %s6089_s5, %s7639_s9 }
  0x1c   :  { %p6095_p2 = pnand %p6093_p1, %p6090_p0 }
  0x1e   :  { %6098 = shalt.err (!%p6095_p2)
}
  0x1f   :  { %s6099_s1 = scalar_lea.vmem %s66_s4, 16  ;;  %s6103_s6 = scalar_lea.vmem %s66_s4, 32 }
  0x20   :  { %p6100_p3 = scmp.ne.s32.totalorder %s66_s4, %s6099_s1  ;;  %p6104_p4 = scmp.lt.s32.totalorder %s66_s4, %s66_s4 }
  0x21   :  { %p6105_p5 = scmp.lt.s32.totalorder %s6103_s6, %s6099_s1 }
  0x23   :  { %p6106_p6 = por %p6105_p5, %p6104_p4 }
  0x25   :  { %p6107_p7 = pnand %p6106_p6, %p6100_p3 }
  0x27   :  { %6110 = shalt.err (!%p6107_p7)
}
  0x28   :  { %68 = dma.hbm_to_vmem [thread:$0]  %s7639_s9, 16, %s66_s4, [#allocation6]  }
  0x29   :  { %s6368_s3 = smov [#allocation8]   ;;  %s6369_s8 = smov [#allocation11]  }
  0x2a   :  { %s94_s7 = sshll.u32 %s6368_s3, 4  ;;  %s122_s30 = sshll.u32 %s6369_s8, 4  ;;  %s95_s7 = int_to_ptr.vmem [resolvable:$true] %s94_s7  ;;  %s123_s30 = int_to_ptr.vmem [resolvable:$true] %s122_s30 }
  0x2b   :  { %s6111_s0 = scalar_lea.hbm %s7602_s12, 32 }
  0x2c   :  { %p6112_p8 = scmp.ne.s32.totalorder %s7602_s12, %s6111_s0  ;;  %p6115_p9 = scmp.lt.u32.totalorder %s6111_s0, %s7602_s12 }
  0x2e   :  { %p6117_p10 = pnand %p6115_p9, %p6112_p8 }
  0x30   :  { %6120 = shalt.err (!%p6117_p10)
}
  0x31   :  { %s6121_s4 = scalar_lea.vmem %s95_s7, 32  ;;  %p6126_p12 = scmp.lt.s32.totalorder %s95_s7, %s95_s7 }
  0x32   :  { %p6122_p11 = scmp.ne.s32.totalorder %s95_s7, %s6121_s4  ;;  %p6127_p13 = scmp.lt.s32.totalorder %s6121_s4, %s6121_s4 }
  0x34   :  { %p6128_p0 = por %p6127_p13, %p6126_p12 }
  0x36   :  { %p6129_p1 = pnand %p6128_p0, %p6122_p11 }
  0x38   :  { %6132 = shalt.err (!%p6129_p1)
}
  0x39   :  { %s6370_s9 = smov 16   ;;  %s6371_s11 = smov 1  }
  0x3a   :  { %100 = dma.hbm_to_vmem [thread:$0]  %s7602_s12, 32, %s95_s7, [#allocation9], %s6370_s9, %s6370_s9, %s6371_s11  }
  0x3b   :  { %s6133_s28 = scalar_lea.hbm %s7606_s16, 32 }
  0x3c   :  { %p6134_p2 = scmp.ne.s32.totalorder %s7606_s16, %s6133_s28  ;;  %p6137_p3 = scmp.lt.u32.totalorder %s6133_s28, %s7606_s16 }
  0x3e   :  { %p6139_p4 = pnand %p6137_p3, %p6134_p2 }
  0x40   :  { %6142 = shalt.err (!%p6139_p4)
}
  0x41   :  { %s6143_s6 = scalar_lea.vmem %s123_s30, 32  ;;  %p6148_p6 = scmp.lt.s32.totalorder %s123_s30, %s123_s30 }
  0x42   :  { %p6144_p5 = scmp.ne.s32.totalorder %s123_s30, %s6143_s6  ;;  %p6149_p7 = scmp.lt.s32.totalorder %s6143_s6, %s6143_s6 }
  0x44   :  { %p6150_p8 = por %p6149_p7, %p6148_p6 }
  0x46   :  { %p6151_p9 = pnand %p6150_p8, %p6144_p5 }
  0x48   :  { %6154 = shalt.err (!%p6151_p9)
}
  0x49   :  { %128 = dma.hbm_to_vmem [thread:$0]  %s7606_s16, 32, %s123_s30, [#allocation12], %s6370_s9, %s6370_s9, %s6371_s11  }
  0x4a   :  { %s6372_s4 = smov [#allocation14]   ;;  %s6373_s3 = smov [#allocation17]  }
  0x4b   :  { %s150_s2 = sshll.u32 %s6372_s4, 4  ;;  %s179_s8 = sshll.u32 %s6373_s3, 4  ;;  %s151_s2 = int_to_ptr.vmem [resolvable:$true] %s150_s2  ;;  %s180_s8 = int_to_ptr.vmem [resolvable:$true] %s179_s8 }
  0x4c   :  { %s6155_s0 = scalar_lea.hbm %s7610_s20, 32 }
  0x4d   :  { %p6156_p10 = scmp.ne.s32.totalorder %s7610_s20, %s6155_s0  ;;  %p6159_p11 = scmp.lt.u32.totalorder %s6155_s0, %s7610_s20 }
  0x4f   :  { %p6161_p12 = pnand %p6159_p11, %p6156_p10 }
  0x51   :  { %6164 = shalt.err (!%p6161_p12)
}
  0x52   :  { %s6165_s16 = scalar_lea.vmem %s151_s2, 32  ;;  %p6170_p0 = scmp.lt.s32.totalorder %s151_s2, %s151_s2 }
  0x53   :  { %p6166_p13 = scmp.ne.s32.totalorder %s151_s2, %s6165_s16  ;;  %p6171_p1 = scmp.lt.s32.totalorder %s6165_s16, %s6165_s16 }
  0x55   :  { %p6172_p2 = por %p6171_p1, %p6170_p0 }
  0x57   :  { %p6173_p3 = pnand %p6172_p2, %p6166_p13 }
  0x59   :  { %6176 = shalt.err (!%p6173_p3)
}
  0x5a   :  { %156 = dma.hbm_to_vmem [thread:$0]  %s7610_s20, 32, %s151_s2, [#allocation15], %s6370_s9, %s6370_s9, %s6371_s11  }
  0x5b   :  { %s6177_s3 = scalar_lea.hbm %s7614_s24, 16 }
  0x5c   :  { %p6178_p4 = scmp.ne.s32.totalorder %s7614_s24, %s6177_s3  ;;  %p6181_p5 = scmp.lt.u32.totalorder %s6177_s3, %s7614_s24 }
  0x5e   :  { %p6183_p6 = pnand %p6181_p5, %p6178_p4 }
  0x60   :  { %6186 = shalt.err (!%p6183_p6)
}
  0x61   :  { %s6187_s29 = scalar_lea.vmem %s180_s8, 16  ;;  %s6191_s1 = scalar_lea.vmem %s180_s8, 32 }
  0x62   :  { %p6188_p7 = scmp.ne.s32.totalorder %s180_s8, %s6187_s29  ;;  %p6192_p8 = scmp.lt.s32.totalorder %s180_s8, %s180_s8 }
  0x63   :  { %p6193_p9 = scmp.lt.s32.totalorder %s6191_s1, %s6187_s29 }
  0x65   :  { %p6194_p10 = por %p6193_p9, %p6192_p8 }
  0x67   :  { %p6195_p11 = pnand %p6194_p10, %p6188_p7 }
  0x69   :  { %6198 = shalt.err (!%p6195_p11)
}
  0x6a   :  { %182 = dma.hbm_to_vmem [thread:$0]  %s7614_s24, 16, %s180_s8, [#allocation18]  }
  0x6b   :  { %s6374_s6 = smov [#allocation2]   ;;  %s6375_s30 = smov [#allocation7]  }
  0x6c   :  { %s55_s16 = sshll.u32 %s6374_s6, 4  ;;  %s80_s12 = sshll.u32 %s6375_s30, 4  ;;  %s56_s16 = int_to_ptr.vmem [resolvable:$true] %s55_s16  ;;  %s81_s12 = int_to_ptr.vmem [resolvable:$true] %s80_s12 }
  0x6d   :  { %s7640_s3 = sld [smem:[#allocation33_spill]] }
  0x73   :  { %s6199_s5 = scalar_lea.hbm %s7640_s3, 16 }
  0x74   :  { %p6200_p12 = scmp.ne.s32.totalorder %s7640_s3, %s6199_s5  ;;  %p6203_p13 = scmp.lt.u32.totalorder %s6199_s5, %s7640_s3 }
  0x76   :  { %p6205_p0 = pnand %p6203_p13, %p6200_p12 }
  0x78   :  { %6208 = shalt.err (!%p6205_p0)
}
  0x79   :  { %s6209_s24 = scalar_lea.vmem %s56_s16, 16  ;;  %s6213_s8 = scalar_lea.vmem %s56_s16, 32 }
  0x7a   :  { %p6210_p1 = scmp.ne.s32.totalorder %s56_s16, %s6209_s24  ;;  %p6214_p2 = scmp.lt.s32.totalorder %s56_s16, %s56_s16 }
  0x7b   :  { %p6215_p3 = scmp.lt.s32.totalorder %s6213_s8, %s6209_s24 }
  0x7d   :  { %p6216_p4 = por %p6215_p3, %p6214_p2 }
  0x7f   :  { %p6217_p5 = pnand %p6216_p4, %p6210_p1 }
  0x81   :  { %6220 = shalt.err (!%p6217_p5)
}
  0x82   :  { %58 = dma.hbm_to_vmem [thread:$0]  %s7640_s3, 16, %s56_s16, [#allocation3]  }
  0x83   :  { %s7641_s30 = sld [smem:[#allocation38_spill]] }
  0x89   :  { %s6221_s7 = scalar_lea.hbm %s7641_s30, 32 }
  0x8a   :  { %p6222_p6 = scmp.ne.s32.totalorder %s7641_s30, %s6221_s7  ;;  %p6225_p7 = scmp.lt.u32.totalorder %s6221_s7, %s7641_s30 }
  0x8c   :  { %p6227_p8 = pnand %p6225_p7, %p6222_p6 }
  0x8e   :  { %6230 = shalt.err (!%p6227_p8)
}
  0x8f   :  { %s6231_s10 = scalar_lea.vmem %s81_s12, 32  ;;  %p6236_p10 = scmp.lt.s32.totalorder %s81_s12, %s81_s12 }
  0x90   :  { %p6232_p9 = scmp.ne.s32.totalorder %s81_s12, %s6231_s10  ;;  %p6237_p11 = scmp.lt.s32.totalorder %s6231_s10, %s6231_s10 }
  0x92   :  { %p6238_p12 = por %p6237_p11, %p6236_p10 }
  0x94   :  { %p6239_p13 = pnand %p6238_p12, %p6232_p9 }
  0x96   :  { %6242 = shalt.err (!%p6239_p13)
}
  0x97   :  { %86 = dma.hbm_to_vmem [thread:$0]  %s7641_s30, 32, %s81_s12, [#allocation6], %s6370_s9, %s6370_s9, %s6371_s11  }
  0x98   :  { %s6376_s29 = smov [#allocation10]   ;;  %s6377_s8 = smov [#allocation13]  }
  0x99   :  { %s108_s24 = sshll.u32 %s6376_s29, 4  ;;  %s136_s1 = sshll.u32 %s6377_s8, 4  ;;  %s109_s24 = int_to_ptr.vmem [resolvable:$true] %s108_s24  ;;  %s137_s1 = int_to_ptr.vmem [resolvable:$true] %s136_s1 }
  0x9a   :  { %s6243_s6 = scalar_lea.hbm %s7604_s14, 32 }
  0x9b   :  { %p6244_p0 = scmp.ne.s32.totalorder %s7604_s14, %s6243_s6  ;;  %p6247_p1 = scmp.lt.u32.totalorder %s6243_s6, %s7604_s14 }
  0x9d   :  { %p6249_p2 = pnand %p6247_p1, %p6244_p0 }
  0x9f   :  { %6252 = shalt.err (!%p6249_p2)
}
  0xa0   :  { %s6253_s12 = scalar_lea.vmem %s109_s24, 32  ;;  %p6258_p4 = scmp.lt.s32.totalorder %s109_s24, %s109_s24 }
  0xa1   :  { %p6254_p3 = scmp.ne.s32.totalorder %s109_s24, %s6253_s12  ;;  %p6259_p5 = scmp.lt.s32.totalorder %s6253_s12, %s6253_s12 }
  0xa3   :  { %p6260_p6 = por %p6259_p5, %p6258_p4 }
  0xa5   :  { %p6261_p7 = pnand %p6260_p6, %p6254_p3 }
  0xa7   :  { %6264 = shalt.err (!%p6261_p7)
}
  0xa8   :  { %114 = dma.hbm_to_vmem [thread:$0]  %s7604_s14, 32, %s109_s24, [#allocation9], %s6370_s9, %s6370_s9, %s6371_s11  }
  0xa9   :  { %s6265_s3 = scalar_lea.hbm %s7608_s18, 32 }
  0xaa   :  { %p6266_p8 = scmp.ne.s32.totalorder %s7608_s18, %s6265_s3  ;;  %p6269_p9 = scmp.lt.u32.totalorder %s6265_s3, %s7608_s18 }
  0xac   :  { %p6271_p10 = pnand %p6269_p9, %p6266_p8 }
  0xae   :  { %6274 = shalt.err (!%p6271_p10)
}
  0xaf   :  { %s6275_s6 = scalar_lea.vmem %s137_s1, 32  ;;  %p6280_p12 = scmp.lt.s32.totalorder %s137_s1, %s137_s1 }
  0xb0   :  { %p6276_p11 = scmp.ne.s32.totalorder %s137_s1, %s6275_s6  ;;  %p6281_p13 = scmp.lt.s32.totalorder %s6275_s6, %s6275_s6 }
  0xb2   :  { %p6282_p0 = por %p6281_p13, %p6280_p12 }
  0xb4   :  { %p6283_p1 = pnand %p6282_p0, %p6276_p11 }
  0xb6   :  { %6286 = shalt.err (!%p6283_p1)
}
  0xb7   :  { %142 = dma.hbm_to_vmem [thread:$0]  %s7608_s18, 32, %s137_s1, [#allocation12], %s6370_s9, %s6370_s9, %s6371_s11  }
  0xb8   :  { %s6378_s7 = smov [#allocation16]   ;;  %s6379_s5 = smov [#allocation19]  }
  0xb9   :  { %s164_s4 = sshll.u32 %s6378_s7, 4  ;;  %s191_s28 = sshll.u32 %s6379_s5, 4  ;;  %s165_s4 = int_to_ptr.vmem [resolvable:$true] %s164_s4  ;;  %s192_s28 = int_to_ptr.vmem [resolvable:$true] %s191_s28 }
  0xba   :  { %s6287_s0 = scalar_lea.hbm %s7612_s22, 32 }
  0xbb   :  { %p6288_p2 = scmp.ne.s32.totalorder %s7612_s22, %s6287_s0  ;;  %p6291_p3 = scmp.lt.u32.totalorder %s6287_s0, %s7612_s22 }
  0xbd   :  { %p6293_p4 = pnand %p6291_p3, %p6288_p2 }
  0xbf   :  { %6296 = shalt.err (!%p6293_p4)
}
  0xc0   :  { %s6297_s18 = scalar_lea.vmem %s165_s4, 32  ;;  %p6302_p6 = scmp.lt.s32.totalorder %s165_s4, %s165_s4 }
  0xc1   :  { %p6298_p5 = scmp.ne.s32.totalorder %s165_s4, %s6297_s18  ;;  %p6303_p7 = scmp.lt.s32.totalorder %s6297_s18, %s6297_s18 }
  0xc3   :  { %p6304_p8 = por %p6303_p7, %p6302_p6 }
  0xc5   :  { %p6305_p9 = pnand %p6304_p8, %p6298_p5 }
  0xc7   :  { %6308 = shalt.err (!%p6305_p9)
}
  0xc8   :  { %170 = dma.hbm_to_vmem [thread:$0]  %s7612_s22, 32, %s165_s4, [#allocation15], %s6370_s9, %s6370_s9, %s6371_s11  }
  0xc9   :  { %s6309_s6 = scalar_lea.hbm %s7616_s26, 16 }
  0xca   :  { %p6310_p10 = scmp.ne.s32.totalorder %s7616_s26, %s6309_s6  ;;  %p6313_p11 = scmp.lt.u32.totalorder %s6309_s6, %s7616_s26 }
  0xcc   :  { %p6315_p12 = pnand %p6313_p11, %p6310_p10 }
  0xce   :  { %6318 = shalt.err (!%p6315_p12)
}
  0xcf   :  { %s6319_s12 = scalar_lea.vmem %s192_s28, 16  ;;  %s6323_s30 = scalar_lea.vmem %s192_s28, 32 }
  0xd0   :  { %p6320_p13 = scmp.ne.s32.totalorder %s192_s28, %s6319_s12  ;;  %p6324_p0 = scmp.lt.s32.totalorder %s192_s28, %s192_s28 }
  0xd1   :  { %p6325_p1 = scmp.lt.s32.totalorder %s6323_s30, %s6319_s12 }
  0xd3   :  { %p6326_p2 = por %p6325_p1, %p6324_p0 }
  0xd5   :  { %p6327_p3 = pnand %p6326_p2, %p6320_p13 }
  0xd7   :  { %6330 = shalt.err (!%p6327_p3)
}
  0xd8   :  { %194 = dma.hbm_to_vmem [thread:$0]  %s7616_s26, 16, %s192_s28, [#allocation18]  }
  0xd9   :  { %6353 = dma.done.wait [#allocation3], 16  }
  0xda   :  { %6354 = vsyncadd [#allocation3], 4294967280 }
  0xdb   :  { %6355 = dma.done.wait [#allocation6], 48  }
  0xdc   :  { %6356 = vsyncadd [#allocation6], 4294967248 }
  0xdd   :  { %6357 = dma.done.wait [#allocation9], 64  }
  0xde   :  { %6358 = vsyncadd [#allocation9], 4294967232 }
  0xdf   :  { %6359 = dma.done.wait [#allocation12], 64  }
  0xe0   :  { %6360 = vsyncadd [#allocation12], 4294967232 }
  0xe1   :  { %6361 = dma.done.wait [#allocation15], 64  }
  0xe2   :  { %6362 = vsyncadd [#allocation15], 4294967232 }
  0xe3   :  { %6363 = dma.done.wait [#allocation18], 32  }
  0xe4   :  { %6364 = vsyncadd [#allocation18], 4294967264  ;;  %v6380_v0 = vmov 0   ;;  %s7642_s10 = sld [smem:[#allocation28_spill]]  ;;  %s7643_s28 = sld [smem:[#allocation30_spill]]  ;;  %v228_v27 = vlaneseq  ;;  %v6381_v30 = vmov 1.0  }
  0xe5   :  { %5992 = vset.pattern.permute.xlu0 %v6380_v0  ;;  %s7644_s30 = sld [smem:[#allocation31_spill]]  ;;  %s7645_s11 = sld [smem:[#allocation32_spill]]  ;;  %vm349_vm2 = vcmask 523264   ;;  %vm6383_vm3 = vmmov 0   ;;  %vm783_vm4 = vcmask 130048   ;;  %vm403_vm5 = vcmask 1041408  }
  0xe6   :  { %v229_v28 = vand.u32 127, %v228_v27  ;;  %s7647_s18 = sld [smem:[#allocation39_spill]]  ;;  %s7648_s5 = sld [smem:[#allocation37_spill]]  ;;  %vm405_vm6 = vcmask 1043456   ;;  %vm407_vm7 = vcmask 1045504   ;;  %vm1432_vm8 = vcmask 64512  }
  0xe7   :  { %s7649_s14 = sld [smem:[#allocation36_spill]]  ;;  %s6384_s24 = smov 112   ;;  %vm2131_vm9 = vcmask 261120   ;;  %vm2134_vm10 = vcmask 392192   ;;  %vm4590_vm11 = vcmask 1040384   ;;  %vm4680_vm12 = vcmask 402432  }
  0xe8   :  { %s6385_s7 = smov 96   ;;  %s6386_s12 = smov 80   ;;  %vm4706_vm13 = vcmask 408576   ;;  %vm4783_vm14 = vcmask 17408  }
  0xe9   :  { %s7650_s22 = sld [smem:[#allocation29_spill]]  ;;  %s6388_s4 = smov 32  }
  0xea   :  { %v230_v1 = vld [vmem:[%s7642_s10] sm:$0xff]  ;;  %v245_v3 = vld [vmem:[%s7643_s28 + $0x8] sm:$0xff]  ;;  %v246_v4 = vld [vmem:[%s7643_s28 + $0x10] sm:$0xff]  ;;  %s6389_s0 = smov 48  }
  0xeb   :  { %v244_v2 = vld [vmem:[%s7643_s28] sm:$0xff]  ;;  %233 = vperm.xlu0 %5992, %v230_v1   ;;  %v247_v5 = vld [vmem:[%s7643_s28 + $0x18] sm:$0xff]  ;;  %v231_v6 = vld [vmem:[%s7642_s10 + $0x8] sm:$0xff]  ;;  %s7646_s10 = sld [smem:[#allocation35_spill]] }
  0xec   :  { %v5690_v7 = vpack.c.bf16 %v245_v3, %v244_v2  ;;  %v5694_v8 = vpack.c.bf16 %v247_v5, %v246_v4  ;;  %v248_v9 = vld [vmem:[%s7643_s28 + $0x20] sm:$0xff]  ;;  %v249_v10 = vld [vmem:[%s7643_s28 + $0x28] sm:$0xff]  ;;  %v250_v12 = vld [vmem:[%s7643_s28 + $0x30] sm:$0xff] }
  0xed   :  { %v5698_v11 = vpack.c.bf16 %v249_v10, %v248_v9  ;;  %v251_v13 = vld [vmem:[%s7643_s28 + $0x38] sm:$0xff]  ;;  %v252_v15 = vld [vmem:[%s7643_s28 + $0x40] sm:$0xff]  ;;  %v253_v16 = vld [vmem:[%s7643_s28 + $0x48] sm:$0xff] }
  0xee   :  { %5691 = vmatprep.subr.bf16.mxu0 %v5690_v7  ;;  %v5702_v14 = vpack.c.bf16 %v251_v13, %v250_v12  ;;  %v5706_v17 = vpack.c.bf16 %v253_v16, %v252_v15  ;;  %v254_v18 = vld [vmem:[%s7643_s28 + $0x50] sm:$0xff]  ;;  %v255_v19 = vld [vmem:[%s7643_s28 + $0x58] sm:$0xff]  ;;  %v256_v21 = vld [vmem:[%s7643_s28 + $0x60] sm:$0xff] }
  0xef   :  { %236 = vperm.xlu0 %5992, %v231_v6   ;;  %5693 = vmatpush3.bf16.msra.mxu0 %v5690_v7  ;;  %v5710_v20 = vpack.c.bf16 %v255_v19, %v254_v18  ;;  %v257_v22 = vld [vmem:[%s7643_s28 + $0x68] sm:$0xff]  ;;  %v258_v24 = vld [vmem:[%s7643_s28 + $0x70] sm:$0xff]  ;;  %v259_v25 = vld [vmem:[%s7643_s28 + $0x78] sm:$0xff] }
  0xf0   :  { %5695 = vmatprep.subr.bf16.mxu0 %v5694_v8  ;;  %v5714_v23 = vpack.c.bf16 %v257_v22, %v256_v21  ;;  %v5718_v26 = vpack.c.bf16 %v259_v25, %v258_v24  ;;  %v335_v32 = vld [vmem:[%s7644_s30] sm:$0xff]  ;;  %v646_v56 = vld [vmem:[%s7647_s18 + $0x8] sm:$0xff]  ;;  %v647_v60 = vld [vmem:[%s7647_s18 + $0x10] sm:$0xff] }
  0xf1   :  { %v4809_v35 = vld [vmem:[%s7645_s11] ss:$0 sm:$0xff]  ;;  %v460_v53 = vld [vmem:[%s7646_s10 + $0x8] sm:$0xff]  ;;  %v461_v58 = vld [vmem:[%s7646_s10 + $0x10] sm:$0xff] }
  0xf2   :  { %v459_v52 = vld [vmem:[%s7646_s10] sm:$0xff]  ;;  %v462_v59 = vld [vmem:[%s7646_s10 + $0x18] sm:$0xff]  ;;  %v464_v0 = vld [vmem:[%s7646_s10 + $0x28] sm:$0xff] }
  0xf3   :  { %5697 = vmatpush3.bf16.msra.mxu0 %v5694_v8  ;;  %v5722_v54 = vpack.c.bf16 %v460_v53, %v459_v52  ;;  %v645_v55 = vld [vmem:[%s7647_s18] sm:$0xff]  ;;  %v5726_v61 = vpack.c.bf16 %v462_v59, %v461_v58  ;;  %v648_v62 = vld [vmem:[%s7647_s18 + $0x18] sm:$0xff]  ;;  %v650_v4 = vld [vmem:[%s7647_s18 + $0x28] sm:$0xff] }
  0xf4   :  { %5699 = vmatprep.subr.bf16.mxu0 %v5698_v11  ;;  %v5754_v57 = vpack.c.bf16 %v646_v56, %v645_v55  ;;  %v463_v63 = vld [vmem:[%s7646_s10 + $0x20] sm:$0xff]  ;;  %v5758_v1 = vpack.c.bf16 %v648_v62, %v647_v60  ;;  %v465_v6 = vld [vmem:[%s7646_s10 + $0x30] sm:$0xff]  ;;  %v466_v7 = vld [vmem:[%s7646_s10 + $0x38] sm:$0xff] }
  0xf5   :  { %5723 = vmatprep.subr.bf16.mxu1 %v5722_v54  ;;  %v5730_v2 = vpack.c.bf16 %v464_v0, %v463_v63  ;;  %v649_v3 = vld [vmem:[%s7647_s18 + $0x20] sm:$0xff]  ;;  %v5734_v8 = vpack.c.bf16 %v466_v7, %v465_v6  ;;  %v651_v9 = vld [vmem:[%s7647_s18 + $0x30] sm:$0xff]  ;;  %v652_v10 = vld [vmem:[%s7647_s18 + $0x38] sm:$0xff] }
  0xf6   :  { %5725 = vmatpush3.bf16.msra.mxu1 %v5722_v54  ;;  %v5762_v5 = vpack.c.bf16 %v650_v4, %v649_v3  ;;  %v555_v12 = vld [vmem:[%s7648_s5] sm:$0xff]  ;;  %v556_v13 = vld [vmem:[%s7648_s5 + $0x8] sm:$0xff] }
  0xf7   :  { %5701 = vmatpush3.bf16.msra.mxu0 %v5698_v11  ;;  %5727 = vmatprep.subr.bf16.mxu1 %v5726_v61  ;;  %v5766_v11 = vpack.c.bf16 %v652_v10, %v651_v9  ;;  %v4810_v22 = vld [vmem:[#allocation2] ss:$0 sm:$0xff]  ;;  %v4811_v24 = vld [vmem:[#allocation5] ss:$0 sm:$0xff]  ;;  %v4818_v63 = vld [vmem:[#allocation8] ss:$0 sm:$0xff] }
  0xf8   :  { %5703 = vmatprep.subr.bf16.mxu0 %v5702_v14  ;;  %v6387_v9 = vmov 1966171168  }
  0xf9   :  { %v412_v10 = vunpack.c.l.s4 %v6387_v9 }
  0xfa   :  { %5729 = vmatpush3.bf16.msra.mxu1 %v5726_v61 }
  0xfb   :  { %5705 = vmatpush3.bf16.msra.mxu0 %v5702_v14  ;;  %5731 = vmatprep.subr.bf16.mxu1 %v5730_v2  ;;  %v5738_v14 = vpack.c.bf16 %v556_v13, %v555_v12  ;;  %v413_v13 = vunpack.c.0.s8 %v412_v10 }
  0xfc   :  { %5707 = vmatprep.subr.bf16.mxu0 %v5706_v17 }
  0xfe   :  { %5733 = vmatpush3.bf16.msra.mxu1 %v5730_v2 }
  0xff   :  { %5709 = vmatpush3.bf16.msra.mxu0 %v5706_v17  ;;  %5735 = vmatprep.subr.bf16.mxu1 %v5734_v8 }
 0x100   :  { %5711 = vmatprep.subr.bf16.mxu0 %v5710_v20 }
 0x102   :  { %5737 = vmatpush3.bf16.msra.mxu1 %v5734_v8 }
 0x103   :  { %5713 = vmatpush3.bf16.msra.mxu0 %v5710_v20  ;;  %5739 = vmatprep.subr.bf16.mxu1 %v5738_v14 }
 0x104   :  { %5715 = vmatprep.subr.bf16.mxu0 %v5714_v23 }
 0x107   :  { %5717 = vmatpush3.bf16.msra.mxu0 %v5714_v23 }
 0x108   :  { %5719 = vmatprep.subr.bf16.mxu0 %v5718_v26 }
 0x10b   :  { %5721 = vmatpush3.bf16.msra.mxu0 %v5718_v26 }
 0x10c   :  { %5755 = vmatprep.subr.bf16.mxu0 %v5754_v57 }
 0x16a   :  { %v234_v29 = vpop.permute.xlu0 %233 }
 0x16b   :  { %vm238_vm0 = vcmp.eq.s32.totalorder %v229_v28, %v234_v29 }
 0x16c   :  { %5231 = vmatprep.mubr.msk.f32.mxu0 %vm238_vm0, %v6381_v30 }
 0x16e   :  { %v237_v31 = vpop.permute.xlu0 %236 }
 0x16f   :  { %vm239_vm1 = vcmp.eq.s32.totalorder %v229_v28, %v237_v31  ;;  %v558_v31 = vld [vmem:[%s7648_s5 + $0x18] sm:$0xff] }
 0x170   :  { %5232 = vmatmul.mubr.msk.f32.vlgmr.msra.gmra.mrb[0].mxu0 %vm239_vm1, %v6381_v30  ;;  %v557_v30 = vld [vmem:[%s7648_s5 + $0x10] sm:$0xff] }
 0x171   :  { %5757 = vmatpush3.bf16.msra.mxu0 %v5754_v57 }
 0x172   :  { %5759 = vmatprep.subr.bf16.mxu0 %v5758_v1 }
 0x175   :  { %5761 = vmatpush3.bf16.msra.mxu0 %v5758_v1 }
 0x176   :  { %5763 = vmatprep.subr.bf16.mxu0 %v5762_v5 }
 0x179   :  { %5765 = vmatpush3.bf16.msra.mxu0 %v5762_v5  ;;  %v393_v5 = vld [vmem:[%s7650_s22] sm:$0x3] }
 0x17a   :  { %5767 = vmatprep.subr.bf16.mxu0 %v5766_v11  ;;  %v394_v6 = vsub.f32 1.0, %v393_v5 }
 0x17c   :  { %v395_v7 = vmul.f32 -10000.0, %v394_v6 }
 0x17d   :  { %5769 = vmatpush3.bf16.msra.mxu0 %v5766_v11 }
 0x17e   :  { %v397_v8 = vrot.slane %v395_v7, 6  ;;  %v399_v11 = vrot.slane %v395_v7, 4 }
 0x180   :  { %v404_v12 = vsel %vm403_vm5, %v395_v7, %v397_v8 }
 0x243   :  { %v5233_v33 = vpop.f32.mrb[0].mxu0 }
 0x244   :  { %v326_v34 = vpop.f32.mrb[1].mxu0  ;;  %v337_v36 = vadd.f32 %v5233_v33, %v335_v32 }
 0x245   :  { %v336_v37 = vadd.f32 %v335_v32, %v326_v34  ;;  %v5742_v34 = vpack.c.bf16 %v558_v31, %v557_v30 }
 0x246   :  { %v346_v40 = vadd.f32 %v4809_v35, %v337_v36  ;;  %v560_v36 = vld [vmem:[%s7648_s5 + $0x28] sm:$0xff] }
 0x247   :  { %v345_v38 = vadd.f32 %v4809_v35, %v336_v37  ;;  %v559_v35 = vld [vmem:[%s7648_s5 + $0x20] sm:$0xff] }
 0x248   :  { %v353_v41 = vsel %vm349_vm2, %v346_v40, 0.0  ;;  %v5746_v37 = vpack.c.bf16 %v560_v36, %v559_v35 }
 0x249   :  { %v350_v39 = vsel %vm349_vm2, %v345_v38, 0.0 }
 0x24a   :  { %351 = vadd.xlane.f32.xlu1 %v350_v39  ;;  %v562_v39 = vld [vmem:[%s7648_s5 + $0x38] sm:$0xff] }
 0x24e   :  { %354 = vadd.xlane.f32.xlu1 %v353_v41  ;;  %v6382_v41 = vmov 0.0  }
 0x24f   :  { %5311 = vmatprep.subr.mxu0 %v6382_v41 }
 0x2d7   :  { %v352_v42 = vpop.xlane.xlu1 %351 }
 0x2d8   :  { %v357_v43 = vmul.f32 0.015625, %v352_v42  ;;  %v4812_v42 = vld [vmem:[%s7649_s14] ss:$0 sm:$0xff] }
 0x2da   :  { %v6748_v44 = vsub.f32 %v345_v38, %v357_v43  ;;  %v561_v38 = vld [vmem:[%s7648_s5 + $0x30] sm:$0xff] }
 0x2db   :  { %v355_v45 = vpop.xlane.xlu1 %354 }
 0x2dc   :  { %v358_v46 = vmul.f32 0.015625, %v355_v45  ;;  %v361_v47 = vmul.f32 %v6748_v44, %v6748_v44 }
 0x2de   :  { %v6752_v48 = vsub.f32 %v346_v40, %v358_v46  ;;  %v363_v49 = vsel %vm349_vm2, %v361_v47, 0.0  ;;  %v5750_v40 = vpack.c.bf16 %v562_v39, %v561_v38 }
 0x2df   :  { %364 = vadd.xlane.f32.xlu0 %v363_v49  ;;  %v4815_v49 = vld [vmem:[#allocation7] ss:$0 sm:$0xff] }
 0x2e0   :  { %v362_v50 = vmul.f32 %v6752_v48, %v6752_v48 }
 0x2e2   :  { %v366_v51 = vsel %vm349_vm2, %v362_v50, 0.0 }
 0x2e3   :  { %367 = vadd.xlane.f32.xlu1 %v366_v51 }
 0x36c   :  { %v365_v15 = vpop.xlane.xlu0 %364 }
 0x36d   :  { %v369_v16 = vmul.f32 0.015625, %v365_v15  ;;  %v401_v15 = vrot.slane %v395_v7, 2 }
 0x36f   :  { %v371_v17 = vadd.f32 1e-12, %v369_v16  ;;  %v406_v16 = vsel %vm405_vm6, %v404_v12, %v399_v11 }
 0x370   :  { %v368_v18 = vpop.xlane.xlu1 %367 }
 0x371   :  { %5993 = vrsqrt.f32 %v371_v17  ;;  %v370_v19 = vmul.f32 0.015625, %v368_v18  ;;  %v408_v18 = vsel %vm407_vm7, %v406_v16, %v401_v15 }
 0x372   :  { %v410_v38 = vcombine.high %v408_v18, %v408_v18 }
 0x373   :  { %v372_v20 = vadd.f32 1e-12, %v370_v19 }
 0x375   :  { %5995 = vrsqrt.f32 %v372_v20 }
 0x37b   :  { %v5994_v21 = vpop.eup %5993 }
 0x37c   :  { %v375_v23 = vmul.f32 %v5994_v21, %v6748_v44 }
 0x37e   :  { %v383_v25 = vmul.f32 %v4810_v22, %v375_v23 }
 0x37f   :  { %v5996_v26 = vpop.eup %5995 }
 0x380   :  { %v6813_v28 = vadd.f32 %v4811_v24, %v383_v25  ;;  %v376_v29 = vmul.f32 %v5996_v26, %v6752_v48 }
 0x382   :  { %5250 = vmatprep.mubr.msk.f32.mxu1 %vm349_vm2, %v6813_v28  ;;  %5288 = vmatprep.mubr.msk.f32.mxu0 %vm349_vm2, %v6813_v28  ;;  %v384_v32 = vmul.f32 %v4810_v22, %v376_v29 }
 0x384   :  { %v6826_v33 = vadd.f32 %v4811_v24, %v384_v32 }
 0x386   :  { %5251 = vmatmul.mubr.msk.f32.vlgmr.msra.gmra.mrb[0].mxu1 %vm349_vm2, %v6826_v33  ;;  %5289 = vmatmul.mubr.msk.f32.vlgmr.msra.gmra.mrb[2].mxu0 %vm349_vm2, %v6826_v33 }
 0x387   :  { %5741 = vmatpush3.bf16.msra.mxu1 %v5738_v14  ;;  %5269 = vmatprep.mubr.msk.f32.mxu1 %vm349_vm2, %v6813_v28  ;;  %v415_v14 = vshrl.u32 %v228_v27, 7 }
 0x388   :  { %5743 = vmatprep.subr.bf16.mxu1 %v5742_v34  ;;  %5313 = vmatprep.mubr.msk.f32.mxu0 %vm6383_vm3, %v6382_v41 }
 0x389   :  { %v416_v17 = vsub.s32 %v413_v13, %v415_v14  ;;  %v1386_v20 = vsub.s32 0, %v415_v14 }
 0x38b   :  { %5745 = vmatpush3.bf16.msra.mxu1 %v5742_v34  ;;  %v417_v19 = vrot.slane %v408_v18, %v416_v17 }
 0x38c   :  { %5747 = vmatprep.subr.bf16.mxu1 %v5746_v37 }
 0x38d   :  { %v433_v21 = vrot.slane %v417_v19, %v416_v17  ;;  %v425_v22 = vcombine.high %v417_v19, %v417_v19 }
 0x38f   :  { %5749 = vmatpush3.bf16.msra.mxu1 %v5746_v37  ;;  %v6925_v23 = vrot.slane %v433_v21, %v1386_v20  ;;  %v447_v24 = vrot.slane %v425_v22, %v416_v17  ;;  %v455_v39 = vcombine.high %v433_v21, %v433_v21 }
 0x390   :  { %5751 = vmatprep.subr.bf16.mxu1 %v5750_v40 }
 0x391   :  { %v6930_v27 = vrot.slane %v447_v24, %v1386_v20 }
 0x393   :  { %5753 = vmatpush3.bf16.msra.mxu1 %v5750_v40  ;;  %v424_v40 = vrot.slane %v410_v38, %v416_v17 }
 0x394   :  { %5291 = vmatprep.subr.mxu1 %v6382_v41 }
 0x396   :  { %5270 = vmatmul.mubr.msk.f32.vlgmr.msra.gmra.mrb[2].mxu1 %vm349_vm2, %v6826_v33 }
 0x397   :  { %5293 = vmatprep.mubr.msk.f32.mxu1 %vm6383_vm3, %v6382_v41 }
 0x459   :  { %v5252_v43 = vpop.f32.mrb[0].mxu1  ;;  %v6857_v44 = vpop.f32.mrb[2].mxu0 }
 0x45a   :  { %v552_v45 = vadd.f32 %v5252_v43, %v4812_v42  ;;  %v546_v46 = vpop.f32.mrb[1].mxu1  ;;  %v726_v47 = vpop.f32.mrb[3].mxu0  ;;  %v6908_v3 = vadd.f32 %v6857_v44, %v4818_v63  ;;  %v457_v43 = vcombine.high %v447_v24, %v447_v24 }
 0x45b   :  { %v547_v48 = vadd.f32 %v4812_v42, %v546_v46  ;;  %v6905_v1 = vadd.f32 %v4818_v63, %v726_v47  ;;  %v6936_v42 = vrot.slane %v455_v39, %v1386_v20  ;;  %v426_v46 = vcombine.high %v424_v40, %v424_v40 }
 0x45c   :  { %739 = vrot.lane.b32.xlu1 %v552_v45, %s6384_s24 }
 0x460   :  { %737 = vrot.lane.b32.xlu1 %v547_v48, %s6384_s24 }
 0x469   :  { %v5271_v50 = vpop.f32.mrb[2].mxu1 }
 0x46a   :  { %v642_v51 = vadd.f32 %v5271_v50, %v4815_v49  ;;  %v636_v52 = vpop.f32.mrb[3].mxu1  ;;  %v6939_v50 = vrot.slane %v457_v43, %v1386_v20 }
 0x46b   :  { %v637_v53 = vadd.f32 %v4815_v49, %v636_v52 }
 0x46c   :  { %753 = vrot.lane.b32.xlu1 %v642_v51, %s6384_s24 }
 0x46d   :  { %755 = vrot.lane.b32.xlu0 %v637_v53, %s6385_s7  ;;  %5292 = vmatpush3.xpose.msk.msra.mxu1 %vm783_vm4, %v637_v53 }
 0x46e   :  { %5296 = vmatprep.subr.mxu1 %v6382_v41 }
 0x470   :  { %751 = vrot.lane.b32.xlu1 %v637_v53, %s6384_s24  ;;  %5294 = vmatmul.mubr.msk.f32.vlgmr.msra.gmra.mrb[4].mxu1 %vm783_vm4, %v547_v48 }
 0x471   :  { %745 = vrot.lane.b32.xlu0 %v547_v48, %s6386_s12  ;;  %5297 = vmatpush3.xpose.msk.msra.mxu1 %vm783_vm4, %v642_v51 }
 0x472   :  { %5298 = vmatprep.mubr.msk.f32.mxu1 %vm6383_vm3, %v6382_v41  ;;  %5301 = vmatprep.subr.mxu1 %v6382_v41 }
 0x474   :  { %757 = vrot.lane.b32.xlu1 %v642_v51, %s6385_s7  ;;  %5299 = vmatmul.mubr.msk.f32.vlgmr.msra.gmra.mrb[6].mxu1 %vm783_vm4, %v552_v45 }
 0x475   :  { %5303 = vmatprep.mubr.msk.f32.mxu1 %vm6383_vm3, %v6382_v41 }
 0x478   :  { %741 = vrot.lane.b32.xlu1 %v547_v48, %s6385_s7 }
 0x47c   :  { %743 = vrot.lane.b32.xlu1 %v552_v45, %s6385_s7 }
 0x480   :  { %761 = vrot.lane.b32.xlu1 %v642_v51, %s6386_s12 }
 0x484   :  { %759 = vrot.lane.b32.xlu1 %v637_v53, %s6386_s12  ;;  %v454_v53 = vrot.slane %v426_v46, %v416_v17 }
 0x486   :  { %v458_v9 = vcombine.high %v454_v53, %v454_v53 }
 0x488   :  { %747 = vrot.lane.b32.xlu1 %v552_v45, %s6386_s12  ;;  %v440_v45 = vrot.slane %v424_v40, %v416_v17  ;;  %v6954_v12 = vrot.slane %v458_v9, %v1386_v20 }
 0x48a   :  { %v6941_v52 = vrot.slane %v440_v45, %v1386_v20  ;;  %v456_v8 = vcombine.high %v440_v45, %v440_v45 }
 0x48c   :  { %v6952_v10 = vrot.slane %v456_v8, %v1386_v20 }
 0x4ce   :  { %v740_v54 = vpop.permute.xlu1 %739 }
 0x4d2   :  { %v738_v55 = vpop.permute.xlu1 %737 }
 0x4de   :  { %v754_v56 = vpop.permute.xlu1 %753 }
 0x4df   :  { %v756_v57 = vpop.permute.xlu0 %755 }
 0x4e0   :  { %5312 = vmatpush3.xpose.msk.msra.mxu0 %vm783_vm4, %v756_v57 }
 0x4e1   :  { %5321 = vmatprep.subr.mxu0 %v6382_v41 }
 0x4e2   :  { %v752_v58 = vpop.permute.xlu1 %751 }
 0x4e3   :  { %5302 = vmatpush3.xpose.msk.msra.mxu1 %vm783_vm4, %v752_v58  ;;  %v746_v2 = vpop.permute.xlu0 %745 }
 0x4e4   :  { %5306 = vmatprep.subr.mxu1 %v6382_v41 }
 0x4e6   :  { %v758_v59 = vpop.permute.xlu1 %757  ;;  %5304 = vmatmul.mubr.msk.f32.vlgmr.msra.gmra.mrb[8].mxu1 %vm783_vm4, %v738_v55 }
 0x4e7   :  { %5307 = vmatpush3.xpose.msk.msra.mxu1 %vm783_vm4, %v754_v56  ;;  %5308 = vmatprep.mubr.msk.f32.mxu1 %vm6383_vm3, %v6382_v41 }
 0x4e8   :  { %5316 = vmatprep.subr.mxu1 %v6382_v41 }
 0x4ea   :  { %v742_v60 = vpop.permute.xlu1 %741  ;;  %5309 = vmatmul.mubr.msk.f32.vlgmr.msra.gmra.mrb[10].mxu1 %vm783_vm4, %v740_v54 }
 0x4eb   :  { %5314 = vmatmul.mubr.msk.f32.vlgmr.msra.gmra.mrb[4].mxu0 %vm783_vm4, %v742_v60  ;;  %5317 = vmatpush3.xpose.msk.msra.mxu1 %vm783_vm4, %v758_v59 }
 0x4ec   :  { %5318 = vmatprep.mubr.msk.f32.mxu1 %vm6383_vm3, %v6382_v41  ;;  %5326 = vmatprep.subr.mxu1 %v6382_v41 }
 0x4ed   :  { %5323 = vmatprep.mubr.msk.f32.mxu0 %vm6383_vm3, %v6382_v41 }
 0x4ee   :  { %v744_v61 = vpop.permute.xlu1 %743 }
 0x4ef   :  { %5319 = vmatmul.mubr.msk.f32.vlgmr.msra.gmra.mrb[12].mxu1 %vm783_vm4, %v744_v61 }
 0x4f0   :  { %5328 = vmatprep.mubr.msk.f32.mxu1 %vm6383_vm3, %v6382_v41 }
 0x4f2   :  { %v762_v62 = vpop.permute.xlu1 %761 }
 0x4f3   :  { %5327 = vmatpush3.xpose.msk.msra.mxu1 %vm783_vm4, %v762_v62  ;;  %v6946_v62 = vrot.slane %v454_v53, %v1386_v20 }
 0x4f4   :  { %5336 = vmatprep.subr.mxu1 %v6382_v41 }
 0x4f6   :  { %v760_v0 = vpop.permute.xlu1 %759 }
 0x4f7   :  { %5322 = vmatpush3.xpose.msk.msra.mxu0 %vm783_vm4, %v760_v0 }
 0x4f8   :  { %5331 = vmatprep.subr.mxu0 %v6382_v41 }
 0x4fa   :  { %5324 = vmatmul.mubr.msk.f32.vlgmr.msra.gmra.mrb[6].mxu0 %vm783_vm4, %v746_v2  ;;  %v748_v4 = vpop.permute.xlu1 %747 }
 0x4fb   :  { %5329 = vmatmul.mubr.msk.f32.vlgmr.msra.gmra.mrb[14].mxu1 %vm783_vm4, %v748_v4  ;;  %5332 = vmatpush3.msra.mxu0 %v6905_v1 }
 0x4fc   :  { %5337 = vmatpush3.msra.mxu1 %v6908_v3  ;;  %5338 = vmatprep.mubr.msk.f32.mxu1 %vm6383_vm3, %v6382_v41 }
 0x4fd   :  { %5346 = vmatprep.subr.mxu1 %v6382_v41  ;;  %5333 = vmatprep.mubr.msk.f32.mxu0 %vm6383_vm3, %v6382_v41 }
 0x4fe   :  { %5341 = vmatprep.subr.mxu0 %v6382_v41 }
 0x543   :  { %v854_v25 = vpop.f32.mrb[4].mxu1 }
 0x544   :  { %v1376_v26 = vmul.f32 0.25, %v854_v25  ;;  %v5295_v29 = vpop.f32.mrb[5].mxu1 }
 0x546   :  { %v6928_v30 = vadd.f32 %v6925_v23, %v1376_v26 }
 0x547   :  { %v928_v31 = vpop.f32.mrb[6].mxu1 }
 0x548   :  { %v1377_v32 = vmul.f32 0.25, %v928_v31  ;;  %v5300_v34 = vpop.f32.mrb[7].mxu1  ;;  %v1433_v35 = vsel %vm1432_vm8, %v6928_v30, -inf }
 0x549   :  { %1434 = vmax.xlane.f32.xlu0 %v1433_v35 }
 0x54a   :  { %v1425_v36 = vadd.f32 %v6930_v27, %v1377_v32 }
 0x54c   :  { %v1436_v37 = vsel %vm1432_vm8, %v1425_v36, -inf }
 0x54d   :  { %1437 = vmax.xlane.f32.xlu1 %v1436_v37 }
 0x5b9   :  { %v1002_v44 = vpop.f32.mrb[8].mxu1 }
 0x5ba   :  { %v1378_v47 = vmul.f32 0.25, %v1002_v44  ;;  %v5305_v48 = vpop.f32.mrb[9].mxu1 }
 0x5bc   :  { %v1426_v49 = vadd.f32 %v6936_v42, %v1378_v47 }
 0x5bd   :  { %v1076_v51 = vpop.f32.mrb[10].mxu1 }
 0x5be   :  { %v1379_v54 = vmul.f32 0.25, %v1076_v51  ;;  %v5310_v55 = vpop.f32.mrb[11].mxu1  ;;  %v1150_v56 = vpop.f32.mrb[4].mxu0  ;;  %v1439_v57 = vsel %vm1432_vm8, %v1426_v49, -inf }
 0x5bf   :  { %v1380_v58 = vmul.f32 0.25, %v1150_v56  ;;  %v5315_v59 = vpop.f32.mrb[5].mxu0  ;;  %1440 = vmax.xlane.f32.xlu0 %v1439_v57 }
 0x5c0   :  { %v1427_v60 = vadd.f32 %v6939_v50, %v1379_v54 }
 0x5c1   :  { %v1428_v61 = vadd.f32 %v6941_v52, %v1380_v58 }
 0x5c2   :  { %v1224_v63 = vpop.f32.mrb[12].mxu1  ;;  %v1442_v0 = vsel %vm1432_vm8, %v1427_v60, -inf }
 0x5c3   :  { %v1381_v2 = vmul.f32 0.25, %v1224_v63  ;;  %1443 = vmax.xlane.f32.xlu0 %v1442_v0  ;;  %v5320_v4 = vpop.f32.mrb[13].mxu1  ;;  %v1445_v5 = vsel %vm1432_vm8, %v1428_v61, -inf }
 0x5c4   :  { %1446 = vmax.xlane.f32.xlu1 %v1445_v5 }
 0x5c5   :  { %v1429_v6 = vadd.f32 %v6946_v62, %v1381_v2 }
 0x5c7   :  { %v1448_v7 = vsel %vm1432_vm8, %v1429_v6, -inf }
 0x5c8   :  { %1449 = vmax.xlane.f32.xlu0 %v1448_v7 }
 0x5cd   :  { %v1298_v11 = vpop.f32.mrb[6].mxu0 }
 0x5ce   :  { %v1382_v13 = vmul.f32 0.25, %v1298_v11  ;;  %v5325_v14 = vpop.f32.mrb[7].mxu0  ;;  %v1372_v15 = vpop.f32.mrb[14].mxu1 }
 0x5cf   :  { %v1383_v16 = vmul.f32 0.25, %v1372_v15  ;;  %v5330_v17 = vpop.f32.mrb[15].mxu1 }
 0x5d0   :  { %v1430_v18 = vadd.f32 %v6952_v10, %v1382_v13 }
 0x5d1   :  { %v1431_v19 = vadd.f32 %v6954_v12, %v1383_v16 }
 0x5d2   :  { %v1451_v21 = vsel %vm1432_vm8, %v1430_v18, -inf }
 0x5d3   :  { %1452 = vmax.xlane.f32.xlu1 %v1451_v21  ;;  %v1454_v22 = vsel %vm1432_vm8, %v1431_v19, -inf }
 0x5d4   :  { %1455 = vmax.xlane.f32.xlu0 %v1454_v22 }
 0x5d6   :  { %v1435_v25 = vpop.xlane.xlu0 %1434 }
 0x5d7   :  { %v1457_v29 = vsub.f32 %v6928_v30, %v1435_v25 }
 0x5d9   :  { %v1465_v31 = vmul.f32 1.442695, %v1457_v29 }
 0x5da   :  { %v1438_v20 = vpop.xlane.xlu1 %1437 }
 0x5db   :  { %v1458_v24 = vsub.f32 %v1425_v36, %v1438_v20 }
 0x5dd   :  { %v1467_v26 = vmul.f32 1.442695, %v1458_v24 }
 0x5df   :  { %5997 = vpow2.f32 %v1467_v26 }
 0x5e0   :  { %5999 = vpow2.f32 %v1465_v31 }
 0x5e4   :  { %765 = vrot.lane.b32.xlu1 %v6905_v1, %s6384_s24 }
 0x5e8   :  { %771 = vrot.lane.b32.xlu1 %v6905_v1, %s6385_s7 }
 0x5e9   :  { %v5998_v32 = vpop.eup %5997 }
 0x5ea   :  { %767 = vrot.lane.b32.xlu0 %v6908_v3, %s6384_s24  ;;  %v1484_v34 = vsel %vm1432_vm8, %v5998_v32, 0.0  ;;  %v6000_v35 = vpop.eup %5999 }
 0x5eb   :  { %v1481_v37 = vsel %vm1432_vm8, %v6000_v35, 0.0 }
 0x5ec   :  { %773 = vrot.lane.b32.xlu1 %v6908_v3, %s6385_s7 }
 0x609   :  { %1485 = vadd.xlane.f32.xlu0 %v1484_v34 }
 0x610   :  { %1482 = vadd.xlane.f32.xlu1 %v1481_v37 }
 0x64c   :  { %v1441_v38 = vpop.xlane.xlu0 %1440 }
 0x64d   :  { %v1459_v39 = vsub.f32 %v1426_v49, %v1441_v38 }
 0x64f   :  { %v1469_v40 = vmul.f32 1.442695, %v1459_v39 }
 0x650   :  { %v1444_v43 = vpop.xlane.xlu0 %1443 }
 0x651   :  { %6001 = vpow2.f32 %v1469_v40  ;;  %v1460_v36 = vsub.f32 %v1427_v60, %v1444_v43  ;;  %v1447_v44 = vpop.xlane.xlu1 %1446 }
 0x652   :  { %v1461_v45 = vsub.f32 %v1428_v61, %v1447_v44 }
 0x653   :  { %v1471_v30 = vmul.f32 1.442695, %v1460_v36 }
 0x654   :  { %v1473_v46 = vmul.f32 1.442695, %v1461_v45 }
 0x655   :  { %6003 = vpow2.f32 %v1471_v30  ;;  %v1450_v47 = vpop.xlane.xlu0 %1449 }
 0x656   :  { %6005 = vpow2.f32 %v1473_v46  ;;  %v1462_v48 = vsub.f32 %v1429_v6, %v1450_v47 }
 0x658   :  { %v1475_v51 = vmul.f32 1.442695, %v1462_v48 }
 0x65a   :  { %6007 = vpow2.f32 %v1475_v51  ;;  %v2137_v51 = vld [vmem:[%s7603_s13] sm:$0xff] }
 0x65b   :  { %v6002_v53 = vpop.eup %6001 }
 0x65c   :  { %v1487_v54 = vsel %vm1432_vm8, %v6002_v53, 0.0 }
 0x65d   :  { %1488 = vadd.xlane.f32.xlu1 %v1487_v54 }
 0x65f   :  { %v6004_v55 = vpop.eup %6003 }
 0x660   :  { %v6006_v49 = vpop.eup %6005  ;;  %v1453_v56 = vpop.xlane.xlu1 %1452  ;;  %v1490_v57 = vsel %vm1432_vm8, %v6004_v55, 0.0 }
 0x661   :  { %v1463_v58 = vsub.f32 %v1430_v18, %v1453_v56  ;;  %1491 = vadd.xlane.f32.xlu0 %v1490_v57  ;;  %v1456_v59 = vpop.xlane.xlu0 %1455  ;;  %v1493_v60 = vsel %vm1432_vm8, %v6006_v49, 0.0  ;;  %v2141_v57 = vld [vmem:[%s7603_s13 + $0x20] sm:$0xff] }
 0x662   :  { %v1464_v61 = vsub.f32 %v1431_v19, %v1456_v59  ;;  %1494 = vadd.xlane.f32.xlu1 %v1493_v60  ;;  %v2143_v60 = vld [vmem:[%s7603_s13 + $0x30] sm:$0xff] }
 0x663   :  { %v1477_v63 = vmul.f32 1.442695, %v1463_v58  ;;  %v2142_v58 = vld [vmem:[%s7603_s13 + $0x28] sm:$0xff] }
 0x664   :  { %v6008_v0 = vpop.eup %6007  ;;  %v1479_v2 = vmul.f32 1.442695, %v1464_v61  ;;  %v766_v9 = vpop.permute.xlu1 %765  ;;  %v5778_v59 = vpack.c.bf16 %v2142_v58, %v2141_v57  ;;  %v2144_v61 = vld [vmem:[%s7603_s13 + $0x38] sm:$0xff]  ;;  %v2283_v57 = vld [vmem:[%s7607_s17 + $0x20] sm:$0xff]  ;;  %v2284_v58 = vld [vmem:[%s7607_s17 + $0x28] sm:$0xff] }
 0x665   :  { %6009 = vpow2.f32 %v1477_v63  ;;  %v1496_v4 = vsel %vm1432_vm8, %v6008_v0, 0.0  ;;  %v768_v11 = vpop.permute.xlu0 %767 }
 0x666   :  { %6011 = vpow2.f32 %v1479_v2  ;;  %1497 = vadd.xlane.f32.xlu0 %v1496_v4  ;;  %v5782_v2 = vpack.c.bf16 %v2144_v61, %v2143_v60  ;;  %v2285_v60 = vld [vmem:[%s7607_s17 + $0x30] sm:$0xff]  ;;  %v2286_v61 = vld [vmem:[%s7607_s17 + $0x38] sm:$0xff] }
 0x668   :  { %v772_v13 = vpop.permute.xlu1 %771 }
 0x66c   :  { %v774_v15 = vpop.permute.xlu1 %773 }
 0x66f   :  { %v6975_v5 = vpop.eup %6009 }
 0x670   :  { %v6977_v6 = vpop.eup %6011  ;;  %v1499_v7 = vsel %vm1432_vm8, %v6975_v5, 0.0 }
 0x671   :  { %1500 = vadd.xlane.f32.xlu1 %v1499_v7  ;;  %v1502_v8 = vsel %vm1432_vm8, %v6977_v6, 0.0 }
 0x672   :  { %1503 = vadd.xlane.f32.xlu0 %v1502_v8 }
 0x682   :  { %779 = vrot.lane.b32.xlu1 %v6908_v3, %s6386_s12 }
 0x688   :  { %777 = vrot.lane.b32.xlu0 %v6905_v1, %s6386_s12 }
 0x696   :  { %v1486_v14 = vpop.xlane.xlu0 %1485 }
 0x697   :  { %6013 = vrcp.f32 %v1486_v14 }
 0x69d   :  { %v1483_v16 = vpop.xlane.xlu1 %1482 }
 0x69e   :  { %6015 = vrcp.f32 %v1483_v16 }
 0x6a1   :  { %v6014_v17 = vpop.eup %6013 }
 0x6a2   :  { %v1514_v18 = vmul.f32 %v6014_v17, %v5998_v32 }
 0x6a4   :  { %5339 = vmatmul.mubr.msk.f32.vlgmr.msra.gmra.mrb[16].mxu1 %vm1432_vm8, %v1514_v18 }
 0x6a5   :  { %5347 = vmatpush3.msra.mxu1 %v768_v11  ;;  %5348 = vmatprep.mubr.msk.f32.mxu1 %vm6383_vm3, %v6382_v41 }
 0x6a6   :  { %5356 = vmatprep.subr.mxu1 %v6382_v41 }
 0x6a8   :  { %v6016_v3 = vpop.eup %6015 }
 0x6a9   :  { %v1513_v1 = vmul.f32 %v6016_v3, %v6000_v35 }
 0x6ab   :  { %5334 = vmatmul.mubr.msk.f32.vlgmr.msra.gmra.mrb[8].mxu0 %vm1432_vm8, %v1513_v1 }
 0x6ac   :  { %5342 = vmatpush3.msra.mxu0 %v766_v9  ;;  %5343 = vmatprep.mubr.msk.f32.mxu0 %vm6383_vm3, %v6382_v41 }
 0x6ad   :  { %5351 = vmatprep.subr.mxu0 %v6382_v41 }
 0x6ea   :  { %v1489_v19 = vpop.xlane.xlu1 %1488 }
 0x6eb   :  { %6017 = vrcp.f32 %v1489_v19 }
 0x6ee   :  { %v1492_v21 = vpop.xlane.xlu0 %1491 }
 0x6ef   :  { %6019 = vrcp.f32 %v1492_v21  ;;  %v1495_v22 = vpop.xlane.xlu1 %1494 }
 0x6f0   :  { %6021 = vrcp.f32 %v1495_v22 }
 0x6f3   :  { %v1498_v20 = vpop.xlane.xlu0 %1497 }
 0x6f4   :  { %6023 = vrcp.f32 %v1498_v20 }
 0x6f5   :  { %v6018_v24 = vpop.eup %6017 }
 0x6f6   :  { %v1515_v25 = vmul.f32 %v6018_v24, %v6002_v53  ;;  %v2138_v53 = vld [vmem:[%s7603_s13 + $0x8] sm:$0xff] }
 0x6f7   :  { %v5770_v54 = vpack.c.bf16 %v2138_v53, %v2137_v51  ;;  %v2280_v53 = vld [vmem:[%s7607_s17 + $0x8] sm:$0xff] }
 0x6f8   :  { %5344 = vmatmul.mubr.msk.f32.vlgmr.msra.gmra.mrb[10].mxu0 %vm1432_vm8, %v1515_v25 }
 0x6f9   :  { %v6020_v26 = vpop.eup %6019  ;;  %5352 = vmatpush3.msra.mxu0 %v772_v13  ;;  %5353 = vmatprep.mubr.msk.f32.mxu0 %vm6383_vm3, %v6382_v41 }
 0x6fa   :  { %v6022_v29 = vpop.eup %6021  ;;  %v1516_v31 = vmul.f32 %v6020_v26, %v6004_v55  ;;  %5361 = vmatprep.subr.mxu0 %v6382_v41  ;;  %v2139_v55 = vld [vmem:[%s7603_s13 + $0x10] sm:$0xff] }
 0x6fb   :  { %v1517_v32 = vmul.f32 %v6022_v29, %v6006_v49  ;;  %v2140_v49 = vld [vmem:[%s7603_s13 + $0x18] sm:$0xff]  ;;  %v4845_v29 = vld [vmem:[#allocation10] ss:$0 sm:$0xff] }
 0x6fc   :  { %5349 = vmatmul.mubr.msk.f32.vlgmr.msra.gmra.mrb[18].mxu1 %vm1432_vm8, %v1516_v31  ;;  %v5774_v56 = vpack.c.bf16 %v2140_v49, %v2139_v55  ;;  %v2281_v55 = vld [vmem:[%s7607_s17 + $0x10] sm:$0xff]  ;;  %v2282_v49 = vld [vmem:[%s7607_s17 + $0x18] sm:$0xff] }
 0x6fd   :  { %5357 = vmatpush3.msra.mxu1 %v774_v15  ;;  %5354 = vmatmul.mubr.msk.f32.vlgmr.msra.gmra.mrb[12].mxu0 %vm1432_vm8, %v1517_v32 }
 0x6fe   :  { %v6024_v34 = vpop.eup %6023  ;;  %v1501_v35 = vpop.xlane.xlu1 %1500  ;;  %5358 = vmatprep.mubr.msk.f32.mxu1 %vm6383_vm3, %v6382_v41  ;;  %5366 = vmatprep.subr.mxu1 %v6382_v41 }
 0x6ff   :  { %v1518_v37 = vmul.f32 %v6024_v34, %v6008_v0  ;;  %6025 = vrcp.f32 %v1501_v35  ;;  %v1504_v38 = vpop.xlane.xlu0 %1503  ;;  %5363 = vmatprep.mubr.msk.f32.mxu0 %vm6383_vm3, %v6382_v41 }
 0x700   :  { %6027 = vrcp.f32 %v1504_v38 }
 0x701   :  { %5359 = vmatmul.mubr.msk.f32.vlgmr.msra.gmra.mrb[20].mxu1 %vm1432_vm8, %v1518_v37 }
 0x702   :  { %v780_v39 = vpop.permute.xlu1 %779  ;;  %5368 = vmatprep.mubr.msk.f32.mxu1 %vm6383_vm3, %v6382_v41 }
 0x703   :  { %5367 = vmatpush3.msra.mxu1 %v780_v39  ;;  %v778_v40 = vpop.permute.xlu0 %777 }
 0x704   :  { %5362 = vmatpush3.msra.mxu0 %v778_v40 }
 0x705   :  { %5771 = vmatprep.subr.bf16.mxu0 %v5770_v54 }
 0x709   :  { %v6026_v43 = vpop.eup %6025 }
 0x70a   :  { %v6028_v36 = vpop.eup %6027  ;;  %v1519_v44 = vmul.f32 %v6026_v43, %v6975_v5 }
 0x70b   :  { %v1520_v45 = vmul.f32 %v6028_v36, %v6977_v6 }
 0x70c   :  { %5364 = vmatmul.mubr.msk.f32.vlgmr.msra.gmra.mrb[14].mxu0 %vm1432_vm8, %v1519_v44 }
 0x70d   :  { %5369 = vmatmul.mubr.msk.f32.vlgmr.msra.gmra.mrb[22].mxu1 %vm1432_vm8, %v1520_v45  ;;  %5773 = vmatpush3.bf16.msra.mxu0 %v5770_v54 }
 0x70e   :  { %5775 = vmatprep.subr.bf16.mxu0 %v5774_v56 }
 0x711   :  { %5777 = vmatpush3.bf16.msra.mxu0 %v5774_v56  ;;  %v5790_v56 = vpack.c.bf16 %v2282_v49, %v2281_v55 }
 0x712   :  { %5779 = vmatprep.subr.bf16.mxu0 %v5778_v59 }
 0x715   :  { %5781 = vmatpush3.bf16.msra.mxu0 %v5778_v59  ;;  %v5794_v59 = vpack.c.bf16 %v2284_v58, %v2283_v57 }
 0x716   :  { %5783 = vmatprep.subr.bf16.mxu0 %v5782_v2 }
 0x719   :  { %5785 = vmatpush3.bf16.msra.mxu0 %v5782_v2  ;;  %v2394_v2 = vld [vmem:[%s7609_s19 + $0x8] sm:$0xff] }
 0x777   :  { %v1663_v30 = vpop.f32.mrb[16].mxu1 }
 0x778   :  { %v5340_v46 = vpop.f32.mrb[17].mxu1 }
 0x77e   :  { %v1590_v47 = vpop.f32.mrb[8].mxu0 }
 0x77f   :  { %v5335_v48 = vpop.f32.mrb[9].mxu0 }
 0x7cb   :  { %v1736_v63 = vpop.f32.mrb[10].mxu0 }
 0x7cc   :  { %v5345_v0 = vpop.f32.mrb[11].mxu0  ;;  %2107 = vrot.lane.b32.xlu0 %v1736_v63, %s6370_s9  ;;  %v5798_v63 = vpack.c.bf16 %v2286_v61, %v2285_v60 }
 0x7cd   :  { %v2393_v0 = vld [vmem:[%s7609_s19] sm:$0xff] }
 0x7cf   :  { %v1809_v4 = vpop.f32.mrb[18].mxu1 }
 0x7d0   :  { %v1882_v5 = vpop.f32.mrb[12].mxu0  ;;  %2109 = vrot.lane.b32.xlu1 %v1809_v4, %s6370_s9  ;;  %v5350_v6 = vpop.f32.mrb[19].mxu1  ;;  %v5802_v4 = vpack.c.bf16 %v2394_v2, %v2393_v0 }
 0x7d1   :  { %v5355_v7 = vpop.f32.mrb[13].mxu0  ;;  %2115 = vrot.lane.b32.xlu0 %v1882_v5, %s6388_s4 }
 0x7d2   :  { %5803 = vmatprep.subr.bf16.mxu0 %v5802_v4 }
 0x7d4   :  { %v1955_v8 = vpop.f32.mrb[20].mxu1 }
 0x7d5   :  { %2117 = vrot.lane.b32.xlu1 %v1955_v8, %s6388_s4  ;;  %v5360_v9 = vpop.f32.mrb[21].mxu1 }
 0x7df   :  { %v2028_v11 = vpop.f32.mrb[14].mxu0 }
 0x7e0   :  { %2123 = vrot.lane.b32.xlu0 %v2028_v11, %s6389_s0  ;;  %v5365_v13 = vpop.f32.mrb[15].mxu0  ;;  %v2101_v14 = vpop.f32.mrb[22].mxu1 }
 0x7e1   :  { %2125 = vrot.lane.b32.xlu1 %v2101_v14, %s6389_s0  ;;  %v5370_v15 = vpop.f32.mrb[23].mxu1  ;;  %v4848_v14 = vld [vmem:[%s7605_s15] ss:$0 sm:$0xff] }
 0x83e   :  { %v2108_v16 = vpop.permute.xlu0 %2107 }
 0x83f   :  { %v2129_v1 = vsel %vm783_vm4, %v1590_v47, %v2108_v16  ;;  %v4849_v16 = vld [vmem:[#allocation11] ss:$0 sm:$0xff] }
 0x842   :  { %v2110_v17 = vpop.permute.xlu1 %2109 }
 0x843   :  { %v2116_v18 = vpop.permute.xlu0 %2115  ;;  %v2130_v19 = vsel %vm783_vm4, %v1663_v30, %v2110_v17 }
 0x844   :  { %v2132_v21 = vsel %vm2131_vm9, %v2129_v1, %v2116_v18 }
 0x847   :  { %v2118_v3 = vpop.permute.xlu1 %2117 }
 0x848   :  { %v2133_v20 = vsel %vm2131_vm9, %v2130_v19, %v2118_v3 }
 0x852   :  { %v2124_v22 = vpop.permute.xlu0 %2123 }
 0x853   :  { %v2135_v24 = vsel %vm2134_vm10, %v2132_v21, %v2124_v22  ;;  %v2126_v25 = vpop.permute.xlu1 %2125  ;;  %v2395_v22 = vld [vmem:[%s7609_s19 + $0x10] sm:$0xff] }
 0x854   :  { %v2136_v26 = vsel %vm2134_vm10, %v2133_v20, %v2126_v25  ;;  %5387 = vmatprep.mubr.msk.f32.mxu0 %vm349_vm2, %v2135_v24  ;;  %v2396_v20 = vld [vmem:[%s7609_s19 + $0x18] sm:$0xff]  ;;  %v2397_v25 = vld [vmem:[%s7609_s19 + $0x20] sm:$0xff] }
 0x855   :  { %5388 = vmatmul.mubr.msk.f32.vlgmr.msra.gmra.mrb[16].mxu0 %vm349_vm2, %v2136_v26  ;;  %v5806_v24 = vpack.c.bf16 %v2396_v20, %v2395_v22  ;;  %v2398_v26 = vld [vmem:[%s7609_s19 + $0x28] sm:$0xff] }
 0x856   :  { %5805 = vmatpush3.bf16.msra.mxu0 %v5802_v4 }
 0x857   :  { %5807 = vmatprep.subr.bf16.mxu0 %v5806_v24 }
 0x85a   :  { %5809 = vmatpush3.bf16.msra.mxu0 %v5806_v24 }
 0x928   :  { %v5389_v31 = vpop.f32.mrb[16].mxu0 }
 0x929   :  { %v2230_v32 = vadd.f32 %v5389_v31, %v4845_v29  ;;  %v2224_v34 = vpop.f32.mrb[17].mxu0  ;;  %v2399_v31 = vld [vmem:[%s7609_s19 + $0x30] sm:$0xff] }
 0x92a   :  { %v2225_v35 = vadd.f32 %v4845_v29, %v2224_v34  ;;  %v5810_v29 = vpack.c.bf16 %v2398_v26, %v2397_v25 }
 0x92b   :  { %v2234_v37 = vadd.f32 %v2230_v32, %v6826_v33  ;;  %v2400_v32 = vld [vmem:[%s7609_s19 + $0x38] sm:$0xff] }
 0x92c   :  { %v2233_v38 = vadd.f32 %v2225_v35, %v6813_v28  ;;  %v2279_v28 = vld [vmem:[%s7607_s17] sm:$0xff]  ;;  %5811 = vmatprep.subr.bf16.mxu0 %v5810_v29  ;;  %v5814_v34 = vpack.c.bf16 %v2400_v32, %v2399_v31 }
 0x92d   :  { %v2240_v39 = vsel %vm349_vm2, %v2234_v37, 0.0  ;;  %v5786_v54 = vpack.c.bf16 %v2280_v53, %v2279_v28  ;;  %5813 = vmatpush3.bf16.msra.mxu0 %v5810_v29  ;;  %v2401_v35 = vld [vmem:[%s7609_s19 + $0x40] sm:$0xff] }
 0x92e   :  { %2241 = vadd.xlane.f32.xlu1 %v2240_v39  ;;  %v2237_v40 = vsel %vm349_vm2, %v2233_v38, 0.0  ;;  %v2403_v39 = vld [vmem:[%s7609_s19 + $0x50] sm:$0xff]  ;;  %5815 = vmatprep.subr.bf16.mxu0 %v5814_v34 }
 0x92f   :  { %2238 = vadd.xlane.f32.xlu0 %v2237_v40  ;;  %5787 = vmatprep.subr.bf16.mxu1 %v5786_v54  ;;  %v2404_v40 = vld [vmem:[%s7609_s19 + $0x58] sm:$0xff] }
 0x930   :  { %5789 = vmatpush3.bf16.msra.mxu1 %v5786_v54 }
 0x931   :  { %5791 = vmatprep.subr.bf16.mxu1 %v5790_v56  ;;  %5817 = vmatpush3.bf16.msra.mxu0 %v5814_v34  ;;  %v4856_v34 = vld [vmem:[%s7646_s10 + $0x40] sm:$0xff] }
 0x934   :  { %5793 = vmatpush3.bf16.msra.mxu1 %v5790_v56 }
 0x935   :  { %5795 = vmatprep.subr.bf16.mxu1 %v5794_v59 }
 0x938   :  { %5797 = vmatpush3.bf16.msra.mxu1 %v5794_v59 }
 0x939   :  { %5799 = vmatprep.subr.bf16.mxu1 %v5798_v63 }
 0x93c   :  { %5801 = vmatpush3.bf16.msra.mxu1 %v5798_v63 }
 0x9bb   :  { %v2242_v43 = vpop.xlane.xlu1 %2241 }
 0x9bc   :  { %v2244_v36 = vmul.f32 0.015625, %v2242_v43  ;;  %v2239_v44 = vpop.xlane.xlu0 %2238  ;;  %v5822_v43 = vpack.c.bf16 %v2404_v40, %v2403_v39  ;;  %v4880_v39 = vld [vmem:[%s7647_s18 + $0x48] sm:$0xff] }
 0x9bd   :  { %v2243_v45 = vmul.f32 0.015625, %v2239_v44  ;;  %v2406_v44 = vld [vmem:[%s7609_s19 + $0x68] sm:$0xff] }
 0x9be   :  { %v2246_v30 = vsub.f32 %v2234_v37, %v2244_v36  ;;  %v2402_v37 = vld [vmem:[%s7609_s19 + $0x48] sm:$0xff]  ;;  %v2405_v36 = vld [vmem:[%s7609_s19 + $0x60] sm:$0xff] }
 0x9bf   :  { %v2245_v46 = vsub.f32 %v2233_v38, %v2243_v45  ;;  %v5818_v38 = vpack.c.bf16 %v2402_v37, %v2401_v35  ;;  %v5826_v45 = vpack.c.bf16 %v2406_v44, %v2405_v36  ;;  %v4857_v35 = vld [vmem:[%s7646_s10 + $0x48] sm:$0xff]  ;;  %v4859_v36 = vld [vmem:[%s7646_s10 + $0x58] sm:$0xff] }
 0x9c0   :  { %v2248_v51 = vmul.f32 %v2246_v30, %v2246_v30  ;;  %v5834_v37 = vpack.c.bf16 %v4857_v35, %v4856_v34 }
 0x9c1   :  { %v2247_v47 = vmul.f32 %v2245_v46, %v2245_v46  ;;  %5819 = vmatprep.subr.bf16.mxu0 %v5818_v38 }
 0x9c2   :  { %v2252_v33 = vsel %vm349_vm2, %v2248_v51, 0.0  ;;  %5821 = vmatpush3.bf16.msra.mxu0 %v5818_v38  ;;  %v4879_v38 = vld [vmem:[%s7647_s18 + $0x40] sm:$0xff]  ;;  %5835 = vmatprep.subr.bf16.mxu1 %v5834_v37 }
 0x9c3   :  { %v2249_v48 = vsel %vm349_vm2, %v2247_v47, 0.0  ;;  %5823 = vmatprep.subr.bf16.mxu0 %v5822_v43  ;;  %v5866_v40 = vpack.c.bf16 %v4880_v39, %v4879_v38  ;;  %v4876_v39 = vld [vmem:[#allocation7 + $0x1] ss:$0 sm:$0xff] }
 0x9c4   :  { %2250 = vadd.xlane.f32.xlu0 %v2249_v48  ;;  %v4850_v48 = vld [vmem:[#allocation13] ss:$0 sm:$0xff] }
 0x9c6   :  { %5825 = vmatpush3.bf16.msra.mxu0 %v5822_v43  ;;  %v4858_v43 = vld [vmem:[%s7646_s10 + $0x50] sm:$0xff] }
 0x9c7   :  { %5827 = vmatprep.subr.bf16.mxu0 %v5826_v45  ;;  %v5838_v44 = vpack.c.bf16 %v4859_v36, %v4858_v43 }
 0x9c8   :  { %2253 = vadd.xlane.f32.xlu0 %v2252_v33 }
 0x9ca   :  { %5829 = vmatpush3.bf16.msra.mxu0 %v5826_v45  ;;  %v4881_v45 = vld [vmem:[%s7647_s18 + $0x50] sm:$0xff] }
 0xa51   :  { %v2251_v5 = vpop.xlane.xlu0 %2250 }
 0xa52   :  { %v2255_v6 = vmul.f32 0.015625, %v2251_v5 }
 0xa54   :  { %v2257_v7 = vadd.f32 1e-12, %v2255_v6 }
 0xa55   :  { %v2254_v8 = vpop.xlane.xlu0 %2253 }
 0xa56   :  { %6029 = vrsqrt.f32 %v2257_v7  ;;  %v2256_v9 = vmul.f32 0.015625, %v2254_v8 }
 0xa58   :  { %v2258_v11 = vadd.f32 1e-12, %v2256_v9 }
 0xa5a   :  { %6031 = vrsqrt.f32 %v2258_v11  ;;  %v4853_v11 = vld [vmem:[#allocation14] ss:$0 sm:$0xff] }
 0xa60   :  { %v6030_v13 = vpop.eup %6029 }
 0xa61   :  { %v2261_v15 = vmul.f32 %v6030_v13, %v2245_v46  ;;  %v2408_v46 = vld [vmem:[%s7609_s19 + $0x78] sm:$0xff] }
 0xa63   :  { %v2269_v17 = vmul.f32 %v4848_v14, %v2261_v15 }
 0xa64   :  { %v6032_v18 = vpop.eup %6031 }
 0xa65   :  { %v2262_v3 = vmul.f32 %v6032_v18, %v2246_v30  ;;  %v7090_v1 = vadd.f32 %v4849_v16, %v2269_v17  ;;  %v2407_v30 = vld [vmem:[%s7609_s19 + $0x70] sm:$0xff] }
 0xa66   :  { %v5830_v47 = vpack.c.bf16 %v2408_v46, %v2407_v30  ;;  %v4882_v30 = vld [vmem:[%s7647_s18 + $0x58] sm:$0xff] }
 0xa67   :  { %v2270_v19 = vmul.f32 %v4848_v14, %v2262_v3  ;;  %5406 = vmatprep.mubr.msk.f32.mxu1 %vm349_vm2, %v7090_v1  ;;  %v5870_v46 = vpack.c.bf16 %v4882_v30, %v4881_v45 }
 0xa68   :  { %5831 = vmatprep.subr.bf16.mxu0 %v5830_v47 }
 0xa69   :  { %v7094_v21 = vadd.f32 %v4849_v16, %v2270_v19  ;;  %5833 = vmatpush3.bf16.msra.mxu0 %v5830_v47  ;;  %v4860_v47 = vld [vmem:[%s7646_s10 + $0x60] sm:$0xff] }
 0xa6a   :  { %5867 = vmatprep.subr.bf16.mxu0 %v5866_v40 }
 0xa6b   :  { %5407 = vmatmul.mubr.msk.f32.vlgmr.msra.gmra.mrb[24].mxu1 %vm349_vm2, %v7094_v21 }
 0xa6c   :  { %5837 = vmatpush3.bf16.msra.mxu1 %v5834_v37 }
 0xa6d   :  { %5839 = vmatprep.subr.bf16.mxu1 %v5838_v44 }
 0xa70   :  { %5841 = vmatpush3.bf16.msra.mxu1 %v5838_v44 }
 0xb3e   :  { %v5408_v51 = vpop.f32.mrb[24].mxu1 }
 0xb3f   :  { %v2372_v33 = vadd.f32 %v5408_v51, %v4850_v48  ;;  %v2366_v28 = vpop.f32.mrb[25].mxu1 }
 0xb40   :  { %v2367_v53 = vadd.f32 %v4850_v48, %v2366_v28  ;;  %v4861_v48 = vld [vmem:[%s7646_s10 + $0x68] sm:$0xff] }
 0xb41   :  { %v2378_v54 = vmul.f32 0.044715, %v2372_v33  ;;  %v2376_v7 = vmul.f32 0.5, %v2372_v33  ;;  %v5842_v51 = vpack.c.bf16 %v4861_v48, %v4860_v47  ;;  %v4884_v28 = vld [vmem:[%s7647_s18 + $0x68] sm:$0xff] }
 0xb42   :  { %v2377_v55 = vmul.f32 0.044715, %v2367_v53  ;;  %v2375_v5 = vmul.f32 0.5, %v2367_v53 }
 0xb43   :  { %v2380_v49 = vmul.f32 %v2378_v54, %v2372_v33  ;;  %5843 = vmatprep.subr.bf16.mxu1 %v5842_v51  ;;  %v4862_v54 = vld [vmem:[%s7646_s10 + $0x70] sm:$0xff] }
 0xb44   :  { %v2379_v56 = vmul.f32 %v2377_v55, %v2367_v53  ;;  %v4863_v55 = vld [vmem:[%s7646_s10 + $0x78] sm:$0xff]  ;;  %5845 = vmatpush3.bf16.msra.mxu1 %v5842_v51 }
 0xb45   :  { %v2382_v57 = vmul.f32 %v2380_v49, %v2372_v33  ;;  %v4885_v49 = vld [vmem:[%s7647_s18 + $0x70] sm:$0xff] }
 0xb46   :  { %v2381_v58 = vmul.f32 %v2379_v56, %v2367_v53  ;;  %v5846_v56 = vpack.c.bf16 %v4863_v55, %v4862_v54 }
 0xb47   :  { %v2384_v59 = vadd.f32 %v2382_v57, %v2372_v33  ;;  %v4883_v33 = vld [vmem:[%s7647_s18 + $0x60] sm:$0xff]  ;;  %v4886_v57 = vld [vmem:[%s7647_s18 + $0x78] sm:$0xff] }
 0xb48   :  { %v2383_v60 = vadd.f32 %v2381_v58, %v2367_v53  ;;  %v5874_v53 = vpack.c.bf16 %v4884_v28, %v4883_v33  ;;  %v5878_v58 = vpack.c.bf16 %v4886_v57, %v4885_v49  ;;  %5847 = vmatprep.subr.bf16.mxu1 %v5846_v56  ;;  %v4887_v28 = vld [vmem:[#allocation8 + $0x1] ss:$0 sm:$0xff] }
 0xb49   :  { %v2386_v61 = vmul.f32 0.7978846, %v2384_v59  ;;  %5849 = vmatpush3.bf16.msra.mxu1 %v5846_v56  ;;  %v4868_v59 = vld [vmem:[%s7648_s5 + $0x40] sm:$0xff] }
 0xb4a   :  { %v2385_v63 = vmul.f32 0.7978846, %v2383_v60  ;;  %v4869_v60 = vld [vmem:[%s7648_s5 + $0x48] sm:$0xff] }
 0xb4b   :  { %6033 = vtanh.f32 %v2386_v61  ;;  %v5850_v61 = vpack.c.bf16 %v4869_v60, %v4868_v59 }
 0xb4c   :  { %6035 = vtanh.f32 %v2385_v63 }
 0xb4d   :  { %5851 = vmatprep.subr.bf16.mxu1 %v5850_v61 }
 0xb55   :  { %v6034_v0 = vpop.eup %6033 }
 0xb56   :  { %v6036_v2 = vpop.eup %6035  ;;  %v2390_v4 = vadd.f32 1.0, %v6034_v0 }
 0xb57   :  { %v2389_v6 = vadd.f32 1.0, %v6036_v2 }
 0xb58   :  { %v2392_v9 = vmul.f32 %v2390_v4, %v2376_v7 }
 0xb59   :  { %v2391_v8 = vmul.f32 %v2389_v6, %v2375_v5 }
 0xb5b   :  { %5441 = vmatprep.mubr.f32.mxu0 %v2391_v8  ;;  %v4854_v8 = vld [vmem:[%s7611_s21] ss:$0 sm:$0xff] }
 0xb5c   :  { %5442 = vmatmul.mubr.f32.vlgmr.msra.gmra.mrb[18].mxu0 %v2392_v9 }
 0xb5d   :  { %5869 = vmatpush3.bf16.msra.mxu0 %v5866_v40 }
 0xb5e   :  { %5871 = vmatprep.subr.bf16.mxu0 %v5870_v46 }
 0xb61   :  { %5873 = vmatpush3.bf16.msra.mxu0 %v5870_v46 }
 0xb62   :  { %5875 = vmatprep.subr.bf16.mxu0 %v5874_v53 }
 0xb65   :  { %5877 = vmatpush3.bf16.msra.mxu0 %v5874_v53 }
 0xb66   :  { %5879 = vmatprep.subr.bf16.mxu0 %v5878_v58 }
 0xb69   :  { %5881 = vmatpush3.bf16.msra.mxu0 %v5878_v58 }
 0xb6a   :  { %5521 = vmatprep.subr.mxu0 %v6382_v41 }
 0xc2f   :  { %v5443_v13 = vpop.f32.mrb[18].mxu0 }
 0xc30   :  { %v2488_v14 = vadd.f32 %v5443_v13, %v4853_v11  ;;  %v2482_v15 = vpop.f32.mrb[19].mxu0 }
 0xc31   :  { %v2483_v16 = vadd.f32 %v4853_v11, %v2482_v15 }
 0xc32   :  { %v2492_v17 = vadd.f32 %v2488_v14, %v7094_v21  ;;  %v4855_v14 = vld [vmem:[#allocation16] ss:$0 sm:$0xff] }
 0xc33   :  { %v2491_v18 = vadd.f32 %v2483_v16, %v7090_v1 }
 0xc34   :  { %v2498_v3 = vsel %vm349_vm2, %v2492_v17, 0.0 }
 0xc35   :  { %2499 = vadd.xlane.f32.xlu0 %v2498_v3  ;;  %v2495_v19 = vsel %vm349_vm2, %v2491_v18, 0.0 }
 0xc36   :  { %2496 = vadd.xlane.f32.xlu1 %v2495_v19 }
 0xcc2   :  { %v2500_v22 = vpop.xlane.xlu0 %2499 }
 0xcc3   :  { %v2502_v20 = vmul.f32 0.015625, %v2500_v22  ;;  %v2497_v24 = vpop.xlane.xlu1 %2496 }
 0xcc4   :  { %v2501_v25 = vmul.f32 0.015625, %v2497_v24  ;;  %v4873_v24 = vld [vmem:[%s7648_s5 + $0x68] sm:$0xff] }
 0xcc5   :  { %v7144_v26 = vsub.f32 %v2492_v17, %v2502_v20  ;;  %v4870_v17 = vld [vmem:[%s7648_s5 + $0x50] sm:$0xff]  ;;  %v4872_v20 = vld [vmem:[%s7648_s5 + $0x60] sm:$0xff] }
 0xcc6   :  { %v7146_v29 = vsub.f32 %v2491_v18, %v2501_v25  ;;  %v4871_v18 = vld [vmem:[%s7648_s5 + $0x58] sm:$0xff]  ;;  %v5858_v25 = vpack.c.bf16 %v4873_v24, %v4872_v20 }
 0xcc7   :  { %v2506_v31 = vmul.f32 %v7144_v26, %v7144_v26  ;;  %v5854_v22 = vpack.c.bf16 %v4871_v18, %v4870_v17 }
 0xcc8   :  { %v2505_v1 = vmul.f32 %v7146_v29, %v7146_v29 }
 0xcc9   :  { %v2510_v21 = vsel %vm349_vm2, %v2506_v31, 0.0 }
 0xcca   :  { %2511 = vadd.xlane.f32.xlu0 %v2510_v21  ;;  %v2507_v32 = vsel %vm349_vm2, %v2505_v1, 0.0  ;;  %v4865_v1 = vld [vmem:[%s7649_s14 + $0x1] ss:$0 sm:$0xff] }
 0xccb   :  { %2508 = vadd.xlane.f32.xlu1 %v2507_v32 }
 0xd57   :  { %v2512_v63 = vpop.xlane.xlu0 %2511 }
 0xd58   :  { %v2514_v0 = vmul.f32 0.015625, %v2512_v63  ;;  %v2509_v2 = vpop.xlane.xlu1 %2508 }
 0xd59   :  { %v2513_v4 = vmul.f32 0.015625, %v2509_v2 }
 0xd5a   :  { %v2516_v5 = vadd.f32 1e-12, %v2514_v0 }
 0xd5b   :  { %v2515_v6 = vadd.f32 1e-12, %v2513_v4 }
 0xd5c   :  { %6037 = vrsqrt.f32 %v2516_v5 }
 0xd5d   :  { %6039 = vrsqrt.f32 %v2515_v6 }
 0xd66   :  { %v6038_v7 = vpop.eup %6037 }
 0xd67   :  { %v6040_v9 = vpop.eup %6039  ;;  %v2520_v11 = vmul.f32 %v6038_v7, %v7144_v26  ;;  %v4874_v26 = vld [vmem:[%s7648_s5 + $0x70] sm:$0xff] }
 0xd68   :  { %v2519_v13 = vmul.f32 %v6040_v9, %v7146_v29  ;;  %v4875_v29 = vld [vmem:[%s7648_s5 + $0x78] sm:$0xff] }
 0xd69   :  { %v2528_v15 = vmul.f32 %v4854_v8, %v2520_v11  ;;  %v5862_v31 = vpack.c.bf16 %v4875_v29, %v4874_v26 }
 0xd6a   :  { %v2527_v16 = vmul.f32 %v4854_v8, %v2519_v13 }
 0xd6b   :  { %v7222_v19 = vadd.f32 %v4855_v14, %v2528_v15 }
 0xd6c   :  { %v7220_v3 = vadd.f32 %v4855_v14, %v2527_v16 }
 0xd6e   :  { %5460 = vmatprep.mubr.msk.f32.mxu1 %vm349_vm2, %v7220_v3  ;;  %5498 = vmatprep.mubr.msk.f32.mxu0 %vm349_vm2, %v7220_v3 }
 0xd6f   :  { %5461 = vmatmul.mubr.msk.f32.vlgmr.msra.gmra.mrb[26].mxu1 %vm349_vm2, %v7222_v19  ;;  %5499 = vmatmul.mubr.msk.f32.vlgmr.msra.gmra.mrb[20].mxu0 %vm349_vm2, %v7222_v19 }
 0xd70   :  { %5853 = vmatpush3.bf16.msra.mxu1 %v5850_v61  ;;  %5479 = vmatprep.mubr.msk.f32.mxu1 %vm349_vm2, %v7220_v3 }
 0xd71   :  { %5855 = vmatprep.subr.bf16.mxu1 %v5854_v22  ;;  %5523 = vmatprep.mubr.msk.f32.mxu0 %vm6383_vm3, %v6382_v41 }
 0xd74   :  { %5857 = vmatpush3.bf16.msra.mxu1 %v5854_v22 }
 0xd75   :  { %5859 = vmatprep.subr.bf16.mxu1 %v5858_v25 }
 0xd78   :  { %5861 = vmatpush3.bf16.msra.mxu1 %v5858_v25 }
 0xd79   :  { %5863 = vmatprep.subr.bf16.mxu1 %v5862_v31 }
 0xd7c   :  { %5865 = vmatpush3.bf16.msra.mxu1 %v5862_v31 }
 0xd7d   :  { %5501 = vmatprep.subr.mxu1 %v6382_v41 }
 0xd7f   :  { %5480 = vmatmul.mubr.msk.f32.vlgmr.msra.gmra.mrb[28].mxu1 %vm349_vm2, %v7222_v19 }
 0xd80   :  { %5503 = vmatprep.mubr.msk.f32.mxu1 %vm6383_vm3, %v6382_v41 }
 0xe42   :  { %v5462_v21 = vpop.f32.mrb[26].mxu1  ;;  %v7256_v32 = vpop.f32.mrb[20].mxu0 }
 0xe43   :  { %v2632_v34 = vadd.f32 %v5462_v21, %v4865_v1  ;;  %v2626_v35 = vpop.f32.mrb[27].mxu1  ;;  %v2810_v37 = vpop.f32.mrb[21].mxu0  ;;  %v7312_v57 = vadd.f32 %v7256_v32, %v4887_v28 }
 0xe44   :  { %v2627_v38 = vadd.f32 %v4865_v1, %v2626_v35  ;;  %v7290_v54 = vadd.f32 %v4887_v28, %v2810_v37 }
 0xe45   :  { %2823 = vrot.lane.b32.xlu1 %v2632_v34, %s6384_s24 }
 0xe46   :  { %2821 = vrot.lane.b32.xlu0 %v2627_v38, %s6384_s24 }
 0xe4a   :  { %2825 = vrot.lane.b32.xlu0 %v2627_v38, %s6385_s7 }
 0xe52   :  { %v5481_v40 = vpop.f32.mrb[28].mxu1 }
 0xe53   :  { %v2724_v43 = vadd.f32 %v5481_v40, %v4876_v39  ;;  %v2718_v36 = vpop.f32.mrb[29].mxu1 }
 0xe54   :  { %v2719_v44 = vadd.f32 %v4876_v39, %v2718_v36 }
 0xe55   :  { %2837 = vrot.lane.b32.xlu1 %v2724_v43, %s6384_s24 }
 0xe56   :  { %5502 = vmatpush3.xpose.msk.msra.mxu1 %vm783_vm4, %v2719_v44  ;;  %2839 = vrot.lane.b32.xlu0 %v2719_v44, %s6385_s7 }
 0xe57   :  { %5506 = vmatprep.subr.mxu1 %v6382_v41 }
 0xe59   :  { %2835 = vrot.lane.b32.xlu1 %v2719_v44, %s6384_s24  ;;  %5504 = vmatmul.mubr.msk.f32.vlgmr.msra.gmra.mrb[30].mxu1 %vm783_vm4, %v2627_v38 }
 0xe5a   :  { %2843 = vrot.lane.b32.xlu0 %v2719_v44, %s6386_s12  ;;  %5507 = vmatpush3.xpose.msk.msra.mxu1 %vm783_vm4, %v2724_v43 }
 0xe5b   :  { %5508 = vmatprep.mubr.msk.f32.mxu1 %vm6383_vm3, %v6382_v41  ;;  %5511 = vmatprep.subr.mxu1 %v6382_v41 }
 0xe5d   :  { %2841 = vrot.lane.b32.xlu1 %v2724_v43, %s6385_s7  ;;  %5509 = vmatmul.mubr.msk.f32.vlgmr.msra.gmra.mrb[32].mxu1 %vm783_vm4, %v2632_v34 }
 0xe5e   :  { %2829 = vrot.lane.b32.xlu0 %v2627_v38, %s6386_s12  ;;  %5513 = vmatprep.mubr.msk.f32.mxu1 %vm6383_vm3, %v6382_v41 }
 0xe61   :  { %2827 = vrot.lane.b32.xlu1 %v2632_v34, %s6385_s7 }
 0xe65   :  { %2845 = vrot.lane.b32.xlu1 %v2724_v43, %s6386_s12 }
 0xe69   :  { %2831 = vrot.lane.b32.xlu1 %v2632_v34, %s6386_s12 }
 0xeb7   :  { %v2824_v30 = vpop.permute.xlu1 %2823 }
 0xeb8   :  { %v2822_v45 = vpop.permute.xlu0 %2821 }
 0xebc   :  { %v2826_v46 = vpop.permute.xlu0 %2825 }
 0xec7   :  { %v2838_v47 = vpop.permute.xlu1 %2837 }
 0xec8   :  { %v2840_v48 = vpop.permute.xlu0 %2839 }
 0xec9   :  { %5522 = vmatpush3.xpose.msk.msra.mxu0 %vm783_vm4, %v2840_v48 }
 0xeca   :  { %5531 = vmatprep.subr.mxu0 %v6382_v41 }
 0xecb   :  { %v2836_v51 = vpop.permute.xlu1 %2835 }
 0xecc   :  { %5524 = vmatmul.mubr.msk.f32.vlgmr.msra.gmra.mrb[22].mxu0 %vm783_vm4, %v2826_v46  ;;  %v2844_v33 = vpop.permute.xlu0 %2843  ;;  %5512 = vmatpush3.xpose.msk.msra.mxu1 %vm783_vm4, %v2836_v51 }
 0xecd   :  { %5532 = vmatpush3.xpose.msk.msra.mxu0 %vm783_vm4, %v2844_v33  ;;  %5516 = vmatprep.subr.mxu1 %v6382_v41 }
 0xece   :  { %5533 = vmatprep.mubr.msk.f32.mxu0 %vm6383_vm3, %v6382_v41  ;;  %5541 = vmatprep.subr.mxu0 %v6382_v41 }
 0xecf   :  { %v2842_v53 = vpop.permute.xlu1 %2841  ;;  %5514 = vmatmul.mubr.msk.f32.vlgmr.msra.gmra.mrb[34].mxu1 %vm783_vm4, %v2822_v45 }
 0xed0   :  { %v2830_v55 = vpop.permute.xlu0 %2829  ;;  %5517 = vmatpush3.xpose.msk.msra.mxu1 %vm783_vm4, %v2838_v47  ;;  %5518 = vmatprep.mubr.msk.f32.mxu1 %vm6383_vm3, %v6382_v41 }
 0xed1   :  { %5534 = vmatmul.mubr.msk.f32.vlgmr.msra.gmra.mrb[24].mxu0 %vm783_vm4, %v2830_v55  ;;  %5526 = vmatprep.subr.mxu1 %v6382_v41 }
 0xed2   :  { %5542 = vmatpush3.msra.mxu0 %v7290_v54  ;;  %5543 = vmatprep.mubr.msk.f32.mxu0 %vm6383_vm3, %v6382_v41 }
 0xed3   :  { %v2828_v49 = vpop.permute.xlu1 %2827  ;;  %5519 = vmatmul.mubr.msk.f32.vlgmr.msra.gmra.mrb[36].mxu1 %vm783_vm4, %v2824_v30  ;;  %5551 = vmatprep.subr.mxu0 %v6382_v41 }
 0xed4   :  { %5527 = vmatpush3.xpose.msk.msra.mxu1 %vm783_vm4, %v2842_v53  ;;  %5528 = vmatprep.mubr.msk.f32.mxu1 %vm6383_vm3, %v6382_v41 }
 0xed5   :  { %5536 = vmatprep.subr.mxu1 %v6382_v41 }
 0xed7   :  { %v2846_v56 = vpop.permute.xlu1 %2845  ;;  %5529 = vmatmul.mubr.msk.f32.vlgmr.msra.gmra.mrb[38].mxu1 %vm783_vm4, %v2828_v49 }
 0xed8   :  { %5537 = vmatpush3.xpose.msk.msra.mxu1 %vm783_vm4, %v2846_v56  ;;  %5538 = vmatprep.mubr.msk.f32.mxu1 %vm6383_vm3, %v6382_v41 }
 0xed9   :  { %5546 = vmatprep.subr.mxu1 %v6382_v41 }
 0xedb   :  { %v2832_v58 = vpop.permute.xlu1 %2831 }
 0xedc   :  { %5539 = vmatmul.mubr.msk.f32.vlgmr.msra.gmra.mrb[40].mxu1 %vm783_vm4, %v2832_v58 }
 0xedd   :  { %5547 = vmatpush3.msra.mxu1 %v7312_v57  ;;  %5548 = vmatprep.mubr.msk.f32.mxu1 %vm6383_vm3, %v6382_v41 }
 0xede   :  { %5556 = vmatprep.subr.mxu1 %v6382_v41 }
 0xf2c   :  { %v2937_v59 = vpop.f32.mrb[30].mxu1 }
 0xf2d   :  { %v3459_v60 = vmul.f32 0.25, %v2937_v59  ;;  %v5505_v61 = vpop.f32.mrb[31].mxu1 }
 0xf2f   :  { %v3467_v63 = vadd.f32 %v3459_v60, %v6925_v23 }
 0xf30   :  { %v3011_v0 = vpop.f32.mrb[32].mxu1 }
 0xf31   :  { %v3460_v2 = vmul.f32 0.25, %v3011_v0  ;;  %v5510_v4 = vpop.f32.mrb[33].mxu1  ;;  %v3475_v5 = vsel %vm1432_vm8, %v3467_v63, -inf }
 0xf32   :  { %3476 = vmax.xlane.f32.xlu0 %v3475_v5 }
 0xf33   :  { %v3468_v6 = vadd.f32 %v3460_v2, %v6930_v27 }
 0xf35   :  { %v3478_v7 = vsel %vm1432_vm8, %v3468_v6, -inf }
 0xf36   :  { %3479 = vmax.xlane.f32.xlu1 %v3478_v7 }
 0xf9f   :  { %v3233_v8 = vpop.f32.mrb[22].mxu0 }
 0xfa0   :  { %v3463_v9 = vmul.f32 0.25, %v3233_v8  ;;  %v5525_v11 = vpop.f32.mrb[23].mxu0 }
 0xfa2   :  { %v3085_v13 = vpop.f32.mrb[34].mxu1  ;;  %v3471_v14 = vadd.f32 %v3463_v9, %v6941_v52 }
 0xfa3   :  { %v3461_v15 = vmul.f32 0.25, %v3085_v13  ;;  %v5515_v16 = vpop.f32.mrb[35].mxu1 }
 0xfa4   :  { %v3381_v23 = vpop.f32.mrb[24].mxu0  ;;  %v3487_v17 = vsel %vm1432_vm8, %v3471_v14, -inf }
 0xfa5   :  { %v3465_v18 = vmul.f32 0.25, %v3381_v23  ;;  %v5535_v22 = vpop.f32.mrb[25].mxu0  ;;  %3488 = vmax.xlane.f32.xlu1 %v3487_v17  ;;  %v3469_v20 = vadd.f32 %v3461_v15, %v6936_v42 }
 0xfa6   :  { %v3159_v27 = vpop.f32.mrb[36].mxu1 }
 0xfa7   :  { %v3462_v24 = vmul.f32 0.25, %v3159_v27  ;;  %v5520_v25 = vpop.f32.mrb[37].mxu1  ;;  %v3481_v26 = vsel %vm1432_vm8, %v3469_v20, -inf  ;;  %v3473_v29 = vadd.f32 %v3465_v18, %v6952_v10 }
 0xfa8   :  { %3482 = vmax.xlane.f32.xlu0 %v3481_v26 }
 0xfa9   :  { %v3493_v52 = vsel %vm1432_vm8, %v3473_v29, -inf  ;;  %v3470_v31 = vadd.f32 %v3462_v24, %v6939_v50 }
 0xfaa   :  { %3494 = vmax.xlane.f32.xlu1 %v3493_v52  ;;  %v3307_v1 = vpop.f32.mrb[38].mxu1 }
 0xfab   :  { %v3464_v21 = vmul.f32 0.25, %v3307_v1  ;;  %v5530_v32 = vpop.f32.mrb[39].mxu1  ;;  %v3484_v34 = vsel %vm1432_vm8, %v3470_v31, -inf }
 0xfac   :  { %3485 = vmax.xlane.f32.xlu0 %v3484_v34 }
 0xfad   :  { %v3472_v42 = vadd.f32 %v3464_v21, %v6946_v62 }
 0xfaf   :  { %v3455_v35 = vpop.f32.mrb[40].mxu1  ;;  %v3490_v37 = vsel %vm1432_vm8, %v3472_v42, -inf }
 0xfb0   :  { %v3466_v38 = vmul.f32 0.25, %v3455_v35  ;;  %3491 = vmax.xlane.f32.xlu0 %v3490_v37  ;;  %v5540_v10 = vpop.f32.mrb[41].mxu1 }
 0xfb2   :  { %v3474_v39 = vadd.f32 %v3466_v38, %v6954_v12 }
 0xfb4   :  { %v3496_v40 = vsel %vm1432_vm8, %v3474_v39, -inf }
 0xfb5   :  { %3497 = vmax.xlane.f32.xlu0 %v3496_v40 }
 0xfbb   :  { %2849 = vrot.lane.b32.xlu1 %v7290_v54, %s6384_s24 }
 0xfbf   :  { %2855 = vrot.lane.b32.xlu1 %v7290_v54, %s6385_s7  ;;  %v3477_v50 = vpop.xlane.xlu0 %3476 }
 0xfc0   :  { %v3499_v62 = vsub.f32 %v3467_v63, %v3477_v50 }
 0xfc2   :  { %v3507_v12 = vmul.f32 1.442695, %v3499_v62 }
 0xfc3   :  { %2857 = vrot.lane.b32.xlu1 %v7312_v57, %s6385_s7  ;;  %v3480_v43 = vpop.xlane.xlu1 %3479 }
 0xfc4   :  { %v3500_v36 = vsub.f32 %v3468_v6, %v3480_v43  ;;  %6041 = vpow2.f32 %v3507_v12 }
 0xfc6   :  { %v3509_v44 = vmul.f32 1.442695, %v3500_v36 }
 0xfc8   :  { %6043 = vpow2.f32 %v3509_v44 }
 0xfcb   :  { %2851 = vrot.lane.b32.xlu0 %v7312_v57, %s6384_s24 }
 0xfce   :  { %v6042_v45 = vpop.eup %6041 }
 0xfcf   :  { %v3523_v46 = vsel %vm1432_vm8, %v6042_v45, 0.0 }
 0xfd2   :  { %v6044_v30 = vpop.eup %6043 }
 0xfd3   :  { %v3526_v47 = vsel %vm1432_vm8, %v6044_v30, 0.0 }
 0xfe7   :  { %3524 = vadd.xlane.f32.xlu1 %v3523_v46 }
 0xfea   :  { %3527 = vadd.xlane.f32.xlu0 %v3526_v47  ;;  %v4914_v47 = vld [vmem:[%s7603_s13 + $0x40] sm:$0xff] }
0x1032   :  { %v3489_v48 = vpop.xlane.xlu1 %3488 }
0x1033   :  { %v3503_v51 = vsub.f32 %v3471_v14, %v3489_v48  ;;  %v4915_v48 = vld [vmem:[%s7603_s13 + $0x48] sm:$0xff] }
0x1035   :  { %v3483_v33 = vpop.xlane.xlu0 %3482  ;;  %v3515_v55 = vmul.f32 1.442695, %v3503_v51  ;;  %v5882_v51 = vpack.c.bf16 %v4915_v48, %v4914_v47  ;;  %v4931_v47 = vld [vmem:[%s7607_s17 + $0x58] sm:$0xff] }
0x1036   :  { %v3501_v28 = vsub.f32 %v3469_v20, %v3483_v33 }
0x1037   :  { %v3495_v53 = vpop.xlane.xlu1 %3494 }
0x1038   :  { %v3511_v49 = vmul.f32 1.442695, %v3501_v28  ;;  %v3505_v56 = vsub.f32 %v3473_v29, %v3495_v53 }
0x1039   :  { %v3486_v58 = vpop.xlane.xlu0 %3485 }
0x103a   :  { %6045 = vpow2.f32 %v3511_v49  ;;  %v3502_v59 = vsub.f32 %v3470_v31, %v3486_v58  ;;  %v3519_v60 = vmul.f32 1.442695, %v3505_v56  ;;  %v4916_v49 = vld [vmem:[%s7603_s13 + $0x50] sm:$0xff]  ;;  %v4917_v56 = vld [vmem:[%s7603_s13 + $0x58] sm:$0xff] }
0x103b   :  { %6047 = vpow2.f32 %v3515_v55  ;;  %v2850_v20 = vpop.permute.xlu1 %2849  ;;  %v5886_v58 = vpack.c.bf16 %v4917_v56, %v4916_v49  ;;  %v4939_v56 = vld [vmem:[%s7609_s19 + $0x80] sm:$0xff] }
0x103c   :  { %v3513_v61 = vmul.f32 1.442695, %v3502_v59  ;;  %v4918_v59 = vld [vmem:[%s7603_s13 + $0x60] sm:$0xff] }
0x103d   :  { %v3492_v63 = vpop.xlane.xlu0 %3491 }
0x103e   :  { %6049 = vpow2.f32 %v3513_v61  ;;  %v3504_v0 = vsub.f32 %v3472_v42, %v3492_v63  ;;  %v4920_v63 = vld [vmem:[%s7603_s13 + $0x70] sm:$0xff] }
0x103f   :  { %6051 = vpow2.f32 %v3519_v60  ;;  %v2856_v27 = vpop.permute.xlu1 %2855  ;;  %v4919_v60 = vld [vmem:[%s7603_s13 + $0x68] sm:$0xff] }
0x1040   :  { %v3517_v2 = vmul.f32 1.442695, %v3504_v0  ;;  %v5890_v61 = vpack.c.bf16 %v4919_v60, %v4918_v59  ;;  %v4921_v0 = vld [vmem:[%s7603_s13 + $0x78] sm:$0xff]  ;;  %s6391_s13 = smov [#allocation20]  }
0x1042   :  { %6053 = vpow2.f32 %v3517_v2  ;;  %v3498_v4 = vpop.xlane.xlu0 %3497  ;;  %v5894_v2 = vpack.c.bf16 %v4921_v0, %v4920_v63 }
0x1043   :  { %v3506_v5 = vsub.f32 %v3474_v39, %v3498_v4  ;;  %v2858_v24 = vpop.permute.xlu1 %2857 }
0x1044   :  { %v6046_v6 = vpop.eup %6045 }
0x1045   :  { %v3521_v7 = vmul.f32 1.442695, %v3506_v5  ;;  %v3529_v8 = vsel %vm1432_vm8, %v6046_v6, 0.0  ;;  %v6048_v9 = vpop.eup %6047 }
0x1046   :  { %3530 = vadd.xlane.f32.xlu1 %v3529_v8  ;;  %v3535_v13 = vsel %vm1432_vm8, %v6048_v9, 0.0  ;;  %v2852_v25 = vpop.permute.xlu0 %2851 }
0x1047   :  { %6055 = vpow2.f32 %v3521_v7 }
0x1048   :  { %v6050_v11 = vpop.eup %6049 }
0x1049   :  { %v3532_v14 = vsel %vm1432_vm8, %v6050_v11, 0.0  ;;  %v6052_v15 = vpop.eup %6051 }
0x104a   :  { %3536 = vadd.xlane.f32.xlu1 %v3535_v13  ;;  %3533 = vadd.xlane.f32.xlu0 %v3532_v14  ;;  %v3541_v23 = vsel %vm1432_vm8, %v6052_v15, 0.0 }
0x104c   :  { %v6054_v16 = vpop.eup %6053 }
0x104d   :  { %v3538_v17 = vsel %vm1432_vm8, %v6054_v16, 0.0 }
0x104e   :  { %3542 = vadd.xlane.f32.xlu1 %v3541_v23  ;;  %3539 = vadd.xlane.f32.xlu0 %v3538_v17 }
0x1051   :  { %v7350_v18 = vpop.eup %6055 }
0x1052   :  { %v3544_v22 = vsel %vm1432_vm8, %v7350_v18, 0.0 }
0x1053   :  { %3545 = vadd.xlane.f32.xlu0 %v3544_v22 }
0x105f   :  { %2863 = vrot.lane.b32.xlu1 %v7312_v57, %s6386_s12 }
0x1069   :  { %2861 = vrot.lane.b32.xlu0 %v7290_v54, %s6386_s12 }
0x1074   :  { %v3525_v26 = vpop.xlane.xlu1 %3524 }
0x1075   :  { %6057 = vrcp.f32 %v3525_v26 }
0x1077   :  { %v3528_v29 = vpop.xlane.xlu0 %3527 }
0x1078   :  { %6059 = vrcp.f32 %v3528_v29 }
0x107f   :  { %v6058_v52 = vpop.eup %6057 }
0x1080   :  { %v3555_v31 = vmul.f32 %v6058_v52, %v6042_v45 }
0x1082   :  { %v6060_v1 = vpop.eup %6059  ;;  %5544 = vmatmul.mubr.msk.f32.vlgmr.msra.gmra.mrb[26].mxu0 %vm1432_vm8, %v3555_v31 }
0x1083   :  { %v3556_v21 = vmul.f32 %v6060_v1, %v6044_v30  ;;  %5552 = vmatpush3.msra.mxu0 %v2850_v20  ;;  %5553 = vmatprep.mubr.msk.f32.mxu0 %vm6383_vm3, %v6382_v41 }
0x1084   :  { %5561 = vmatprep.subr.mxu0 %v6382_v41 }
0x1085   :  { %5549 = vmatmul.mubr.msk.f32.vlgmr.msra.gmra.mrb[42].mxu1 %vm1432_vm8, %v3556_v21  ;;  %v4922_v21 = vld [vmem:[#allocation10 + $0x1] ss:$0 sm:$0xff] }
0x1086   :  { %5557 = vmatpush3.msra.mxu1 %v2852_v25  ;;  %5558 = vmatprep.mubr.msk.f32.mxu1 %vm6383_vm3, %v6382_v41 }
0x1087   :  { %5566 = vmatprep.subr.mxu1 %v6382_v41 }
0x10d3   :  { %v3531_v54 = vpop.xlane.xlu1 %3530 }
0x10d4   :  { %6061 = vrcp.f32 %v3531_v54 }
0x10d7   :  { %v3537_v57 = vpop.xlane.xlu1 %3536  ;;  %v3534_v32 = vpop.xlane.xlu0 %3533 }
0x10d8   :  { %6063 = vrcp.f32 %v3537_v57 }
0x10d9   :  { %6065 = vrcp.f32 %v3534_v32 }
0x10db   :  { %v3543_v34 = vpop.xlane.xlu1 %3542  ;;  %v3540_v42 = vpop.xlane.xlu0 %3539 }
0x10dc   :  { %6067 = vrcp.f32 %v3543_v34 }
0x10dd   :  { %6069 = vrcp.f32 %v3540_v42 }
0x10de   :  { %v6062_v35 = vpop.eup %6061 }
0x10df   :  { %v3557_v37 = vmul.f32 %v6062_v35, %v6046_v6  ;;  %v2864_v45 = vpop.permute.xlu1 %2863 }
0x10e0   :  { %v3546_v38 = vpop.xlane.xlu0 %3545 }
0x10e1   :  { %6071 = vrcp.f32 %v3546_v38  ;;  %5554 = vmatmul.mubr.msk.f32.vlgmr.msra.gmra.mrb[28].mxu0 %vm1432_vm8, %v3557_v37 }
0x10e2   :  { %v6064_v10 = vpop.eup %6063  ;;  %5562 = vmatpush3.msra.mxu0 %v2856_v27  ;;  %5563 = vmatprep.mubr.msk.f32.mxu0 %vm6383_vm3, %v6382_v41 }
0x10e3   :  { %v6066_v39 = vpop.eup %6065  ;;  %v3559_v40 = vmul.f32 %v6064_v10, %v6048_v9  ;;  %5571 = vmatprep.subr.mxu0 %v6382_v41 }
0x10e4   :  { %v3558_v50 = vmul.f32 %v6066_v39, %v6050_v11  ;;  %v2862_v62 = vpop.permute.xlu0 %2861 }
0x10e5   :  { %5564 = vmatmul.mubr.msk.f32.vlgmr.msra.gmra.mrb[30].mxu0 %vm1432_vm8, %v3559_v40 }
0x10e6   :  { %v6068_v43 = vpop.eup %6067  ;;  %5559 = vmatmul.mubr.msk.f32.vlgmr.msra.gmra.mrb[44].mxu1 %vm1432_vm8, %v3558_v50  ;;  %5572 = vmatpush3.msra.mxu0 %v2862_v62 }
0x10e7   :  { %v6070_v36 = vpop.eup %6069  ;;  %v3561_v12 = vmul.f32 %v6068_v43, %v6052_v15  ;;  %5567 = vmatpush3.msra.mxu1 %v2858_v24  ;;  %5568 = vmatprep.mubr.msk.f32.mxu1 %vm6383_vm3, %v6382_v41 }
0x10e8   :  { %v3560_v44 = vmul.f32 %v6070_v36, %v6054_v16  ;;  %5573 = vmatprep.mubr.msk.f32.mxu0 %vm6383_vm3, %v6382_v41  ;;  %5576 = vmatprep.subr.mxu1 %v6382_v41 }
0x10e9   :  { %5574 = vmatmul.mubr.msk.f32.vlgmr.msra.gmra.mrb[32].mxu0 %vm1432_vm8, %v3561_v12  ;;  %5883 = vmatprep.subr.bf16.mxu0 %v5882_v51 }
0x10ea   :  { %5569 = vmatmul.mubr.msk.f32.vlgmr.msra.gmra.mrb[46].mxu1 %vm1432_vm8, %v3560_v44  ;;  %5885 = vmatpush3.bf16.msra.mxu0 %v5882_v51  ;;  %v4932_v51 = vld [vmem:[%s7607_s17 + $0x60] sm:$0xff] }
0x10eb   :  { %v6072_v30 = vpop.eup %6071  ;;  %5577 = vmatpush3.msra.mxu1 %v2864_v45  ;;  %5578 = vmatprep.mubr.msk.f32.mxu1 %vm6383_vm3, %v6382_v41  ;;  %v4929_v45 = vld [vmem:[%s7607_s17 + $0x48] sm:$0xff] }
0x10ec   :  { %v3562_v46 = vmul.f32 %v6072_v30, %v7350_v18  ;;  %5887 = vmatprep.subr.bf16.mxu0 %v5886_v58 }
0x10ee   :  { %5579 = vmatmul.mubr.msk.f32.vlgmr.msra.gmra.mrb[48].mxu1 %vm1432_vm8, %v3562_v46  ;;  %5889 = vmatpush3.bf16.msra.mxu0 %v5886_v58  ;;  %v4930_v46 = vld [vmem:[%s7607_s17 + $0x50] sm:$0xff]  ;;  %v4940_v58 = vld [vmem:[%s7609_s19 + $0x88] sm:$0xff] }
0x10ef   :  { %5891 = vmatprep.subr.bf16.mxu0 %v5890_v61  ;;  %v5902_v48 = vpack.c.bf16 %v4931_v47, %v4930_v46  ;;  %v5914_v59 = vpack.c.bf16 %v4940_v58, %v4939_v56  ;;  %v4955_v56 = vld [vmem:[#allocation14 + $0x1] ss:$0 sm:$0xff] }
0x10f2   :  { %5893 = vmatpush3.bf16.msra.mxu0 %v5890_v61 }
0x10f3   :  { %5895 = vmatprep.subr.bf16.mxu0 %v5894_v2 }
0x10f6   :  { %5897 = vmatpush3.bf16.msra.mxu0 %v5894_v2 }
0x10f7   :  { %5915 = vmatprep.subr.bf16.mxu0 %v5914_v59 }
0x1155   :  { %v3632_v33 = vpop.f32.mrb[26].mxu0 }
0x1156   :  { %v5545_v28 = vpop.f32.mrb[27].mxu0 }
0x1158   :  { %v3705_v53 = vpop.f32.mrb[42].mxu1 }
0x1159   :  { %v5550_v55 = vpop.f32.mrb[43].mxu1 }
0x115a   :  { %v4935_v55 = vld [vmem:[%s7607_s17 + $0x78] sm:$0xff] }
0x11b4   :  { %v3778_v4 = vpop.f32.mrb[28].mxu0 }
0x11b5   :  { %v5555_v5 = vpop.f32.mrb[29].mxu0  ;;  %4149 = vrot.lane.b32.xlu0 %v3778_v4, %s6370_s9 }
0x11b8   :  { %v3924_v6 = vpop.f32.mrb[30].mxu0 }
0x11b9   :  { %v3851_v7 = vpop.f32.mrb[44].mxu1  ;;  %v5565_v8 = vpop.f32.mrb[31].mxu0  ;;  %4157 = vrot.lane.b32.xlu0 %v3924_v6, %s6388_s4  ;;  %v4926_v6 = vld [vmem:[%s7605_s15 + $0x1] ss:$0 sm:$0xff] }
0x11ba   :  { %4151 = vrot.lane.b32.xlu1 %v3851_v7, %s6370_s9  ;;  %v5560_v9 = vpop.f32.mrb[45].mxu1  ;;  %v4927_v8 = vld [vmem:[#allocation11 + $0x1] ss:$0 sm:$0xff]  ;;  %s4791_s9 = sshll.u32 %s6391_s13, 4  ;;  %s4792_s9 = int_to_ptr.vmem [resolvable:$true] %s4791_s9 }
0x11bb   :  { %p6336_p5 = scmp.lt.s32.totalorder %s4792_s9, %s4792_s9 }
0x11bc   :  { %v4070_v11 = vpop.f32.mrb[32].mxu0 }
0x11bd   :  { %v3997_v13 = vpop.f32.mrb[46].mxu1  ;;  %4165 = vrot.lane.b32.xlu0 %v4070_v11, %s6389_s0  ;;  %v5575_v14 = vpop.f32.mrb[33].mxu0 }
0x11be   :  { %4159 = vrot.lane.b32.xlu1 %v3997_v13, %s6388_s4  ;;  %v5570_v15 = vpop.f32.mrb[47].mxu1  ;;  %s6331_s4 = scalar_lea.vmem %s4792_s9, 32 }
0x11bf   :  { %p6332_p4 = scmp.ne.s32.totalorder %s4792_s9, %s6331_s4  ;;  %p6337_p6 = scmp.lt.s32.totalorder %s6331_s4, %s6331_s4 }
0x11c1   :  { %v4143_v16 = vpop.f32.mrb[48].mxu1  ;;  %p6338_p7 = por %p6337_p6, %p6336_p5 }
0x11c2   :  { %4167 = vrot.lane.b32.xlu1 %v4143_v16, %s6389_s0  ;;  %v5580_v23 = vpop.f32.mrb[49].mxu1 }
0x11c3   :  { %v4941_v23 = vld [vmem:[%s7609_s19 + $0x90] sm:$0xff]  ;;  %p6339_p8 = pnand %p6338_p7, %p6332_p4 }
0x1227   :  { %v4150_v17 = vpop.permute.xlu0 %4149 }
0x1228   :  { %v4171_v20 = vsel %vm783_vm4, %v3632_v33, %v4150_v17  ;;  %v4933_v33 = vld [vmem:[%s7607_s17 + $0x68] sm:$0xff]  ;;  %v4942_v17 = vld [vmem:[%s7609_s19 + $0x98] sm:$0xff] }
0x1229   :  { %v5906_v28 = vpack.c.bf16 %v4933_v33, %v4932_v51 }
0x122b   :  { %v4158_v18 = vpop.permute.xlu0 %4157 }
0x122c   :  { %v4152_v22 = vpop.permute.xlu1 %4151  ;;  %v4173_v27 = vsel %vm2131_vm9, %v4171_v20, %v4158_v18  ;;  %v5918_v18 = vpack.c.bf16 %v4942_v17, %v4941_v23  ;;  %v4944_v20 = vld [vmem:[%s7609_s19 + $0xa8] sm:$0xff] }
0x122d   :  { %v4172_v29 = vsel %vm783_vm4, %v3705_v53, %v4152_v22  ;;  %v4934_v53 = vld [vmem:[%s7607_s17 + $0x70] sm:$0xff]  ;;  %v4943_v22 = vld [vmem:[%s7609_s19 + $0xa0] sm:$0xff]  ;;  %v4593_v17 = vld [vmem:[%s7613_s23 + $0x8] sm:$0xff] }
0x122e   :  { %v5910_v49 = vpack.c.bf16 %v4935_v55, %v4934_v53 }
0x122f   :  { %v4166_v24 = vpop.permute.xlu0 %4165 }
0x1230   :  { %v4175_v25 = vsel %vm2134_vm10, %v4173_v27, %v4166_v24  ;;  %v4160_v26 = vpop.permute.xlu1 %4159  ;;  %v5922_v27 = vpack.c.bf16 %v4944_v20, %v4943_v22  ;;  %v4945_v24 = vld [vmem:[%s7609_s19 + $0xb0] sm:$0xff]  ;;  %v6390_v22 = vmov 0.0|0.0  }
0x1231   :  { %5597 = vmatprep.mubr.msk.f32.mxu0 %vm349_vm2, %v4175_v25  ;;  %v4174_v52 = vsel %vm2131_vm9, %v4172_v29, %v4160_v26  ;;  %v4946_v25 = vld [vmem:[%s7609_s19 + $0xb8] sm:$0xff]  ;;  %v4947_v26 = vld [vmem:[%s7609_s19 + $0xc0] sm:$0xff]  ;;  %v4594_v20 = vld [vmem:[%s7613_s23 + $0x10] sm:$0xff] }
0x1232   :  { %v5926_v29 = vpack.c.bf16 %v4946_v25, %v4945_v24  ;;  %v4596_v25 = vld [vmem:[%s7613_s23 + $0x20] sm:$0xff] }
0x1234   :  { %v4168_v31 = vpop.permute.xlu1 %4167 }
0x1235   :  { %v4176_v1 = vsel %vm2134_vm10, %v4174_v52, %v4168_v31  ;;  %v4948_v52 = vld [vmem:[%s7609_s19 + $0xc8] sm:$0xff] }
0x1236   :  { %5598 = vmatmul.mubr.msk.f32.vlgmr.msra.gmra.mrb[34].mxu0 %vm349_vm2, %v4176_v1  ;;  %v5930_v31 = vpack.c.bf16 %v4948_v52, %v4947_v26  ;;  %v4949_v1 = vld [vmem:[%s7609_s19 + $0xd0] sm:$0xff]  ;;  %v4597_v26 = vld [vmem:[%s7613_s23 + $0x28] sm:$0xff] }
0x1237   :  { %5917 = vmatpush3.bf16.msra.mxu0 %v5914_v59  ;;  %v5953_v52 = vpack.c.bf16 %v4597_v26, %v4596_v25 }
0x1238   :  { %5919 = vmatprep.subr.bf16.mxu0 %v5918_v18 }
0x123b   :  { %5921 = vmatpush3.bf16.msra.mxu0 %v5918_v18 }
0x123c   :  { %5923 = vmatprep.subr.bf16.mxu0 %v5922_v27 }
0x123f   :  { %5925 = vmatpush3.bf16.msra.mxu0 %v5922_v27  ;;  %v4595_v27 = vld [vmem:[%s7613_s23 + $0x18] sm:$0xff] }
0x1240   :  { %5927 = vmatprep.subr.bf16.mxu0 %v5926_v29  ;;  %v5950_v24 = vpack.c.bf16 %v4595_v27, %v4594_v20 }
0x1243   :  { %5929 = vmatpush3.bf16.msra.mxu0 %v5926_v29  ;;  %v4598_v29 = vld [vmem:[%s7613_s23 + $0x30] sm:$0xff] }
0x1244   :  { %5931 = vmatprep.subr.bf16.mxu0 %v5930_v31 }
0x1247   :  { %5933 = vmatpush3.bf16.msra.mxu0 %v5930_v31  ;;  %v4599_v31 = vld [vmem:[%s7613_s23 + $0x38] sm:$0xff] }
0x1309   :  { %v5599_v54 = vpop.f32.mrb[34].mxu0 }
0x130a   :  { %v4272_v57 = vadd.f32 %v5599_v54, %v4922_v21  ;;  %v4266_v32 = vpop.f32.mrb[35].mxu0 }
0x130b   :  { %v4267_v34 = vadd.f32 %v4922_v21, %v4266_v32  ;;  %v4950_v21 = vld [vmem:[%s7609_s19 + $0xd8] sm:$0xff]  ;;  %v4952_v32 = vld [vmem:[%s7609_s19 + $0xe8] sm:$0xff] }
0x130c   :  { %v4276_v42 = vadd.f32 %v4272_v57, %v7222_v19  ;;  %v5934_v54 = vpack.c.bf16 %v4950_v21, %v4949_v1  ;;  %v4951_v57 = vld [vmem:[%s7609_s19 + $0xe0] sm:$0xff]  ;;  %v5956_v1 = vpack.c.bf16 %v4599_v31, %v4598_v29 }
0x130d   :  { %v4275_v35 = vadd.f32 %v4267_v34, %v7220_v3  ;;  %v4928_v3 = vld [vmem:[%s7607_s17 + $0x40] sm:$0xff]  ;;  %v5938_v34 = vpack.c.bf16 %v4952_v32, %v4951_v57 }
0x130e   :  { %v4284_v37 = vsel %vm349_vm2, %v4276_v42, 0.0  ;;  %v5898_v30 = vpack.c.bf16 %v4929_v45, %v4928_v3  ;;  %5935 = vmatprep.subr.bf16.mxu0 %v5934_v54 }
0x130f   :  { %4285 = vadd.xlane.f32.xlu1 %v4284_v37  ;;  %v4281_v38 = vsel %vm349_vm2, %v4275_v35, 0.0  ;;  %5937 = vmatpush3.bf16.msra.mxu0 %v5934_v54 }
0x1310   :  { %4282 = vadd.xlane.f32.xlu0 %v4281_v38  ;;  %5899 = vmatprep.subr.bf16.mxu1 %v5898_v30  ;;  %v4936_v38 = vld [vmem:[#allocation13 + $0x1] ss:$0 sm:$0xff] }
0x1311   :  { %5901 = vmatpush3.bf16.msra.mxu1 %v5898_v30  ;;  %5939 = vmatprep.subr.bf16.mxu0 %v5938_v34 }
0x1312   :  { %5903 = vmatprep.subr.bf16.mxu1 %v5902_v48 }
0x1313   :  { %5941 = vmatpush3.bf16.msra.mxu0 %v5938_v34 }
0x1315   :  { %5905 = vmatpush3.bf16.msra.mxu1 %v5902_v48 }
0x1316   :  { %5907 = vmatprep.subr.bf16.mxu1 %v5906_v28 }
0x1319   :  { %5909 = vmatpush3.bf16.msra.mxu1 %v5906_v28 }
0x131a   :  { %5911 = vmatprep.subr.bf16.mxu1 %v5910_v49 }
0x131d   :  { %5913 = vmatpush3.bf16.msra.mxu1 %v5910_v49 }
0x131e   :  { %5946 = vmatprep.subr.bf16.mxu1 %v6390_v22 }
0x139c   :  { %v4286_v10 = vpop.xlane.xlu1 %4285 }
0x139d   :  { %v4288_v39 = vmul.f32 0.015625, %v4286_v10  ;;  %v4283_v40 = vpop.xlane.xlu0 %4282 }
0x139e   :  { %v4287_v50 = vmul.f32 0.015625, %v4283_v40 }
0x139f   :  { %v4290_v62 = vsub.f32 %v4276_v42, %v4288_v39  ;;  %v4953_v42 = vld [vmem:[%s7609_s19 + $0xf0] sm:$0xff] }
0x13a0   :  { %v4289_v43 = vsub.f32 %v4275_v35, %v4287_v50  ;;  %v4954_v35 = vld [vmem:[%s7609_s19 + $0xf8] sm:$0xff] }
0x13a1   :  { %v4292_v44 = vmul.f32 %v4290_v62, %v4290_v62  ;;  %v5942_v37 = vpack.c.bf16 %v4954_v35, %v4953_v42 }
0x13a2   :  { %v4291_v36 = vmul.f32 %v4289_v43, %v4289_v43 }
0x13a3   :  { %v4296_v19 = vsel %vm349_vm2, %v4292_v44, 0.0  ;;  %5943 = vmatprep.subr.bf16.mxu0 %v5942_v37 }
0x13a4   :  { %v4293_v12 = vsel %vm349_vm2, %v4291_v36, 0.0  ;;  %5945 = vmatpush3.bf16.msra.mxu0 %v5942_v37  ;;  %v4957_v37 = vld [vmem:[%s7611_s21 + $0x1] ss:$0 sm:$0xff] }
0x13a5   :  { %4294 = vadd.xlane.f32.xlu0 %v4293_v12 }
0x13a9   :  { %4297 = vadd.xlane.f32.xlu0 %v4296_v19 }
0x1432   :  { %v4295_v60 = vpop.xlane.xlu0 %4294 }
0x1433   :  { %v4299_v61 = vmul.f32 0.015625, %v4295_v60 }
0x1435   :  { %v4301_v63 = vadd.f32 1e-12, %v4299_v61 }
0x1436   :  { %v4298_v0 = vpop.xlane.xlu0 %4297 }
0x1437   :  { %6073 = vrsqrt.f32 %v4301_v63  ;;  %v4300_v2 = vmul.f32 0.015625, %v4298_v0 }
0x1439   :  { %v4302_v4 = vadd.f32 1e-12, %v4300_v2 }
0x143b   :  { %6075 = vrsqrt.f32 %v4302_v4 }
0x1441   :  { %v6074_v5 = vpop.eup %6073 }
0x1442   :  { %v4305_v7 = vmul.f32 %v6074_v5, %v4289_v43 }
0x1444   :  { %v4313_v9 = vmul.f32 %v4926_v6, %v4305_v7 }
0x1445   :  { %v6076_v11 = vpop.eup %6075 }
0x1446   :  { %v4306_v13 = vmul.f32 %v6076_v11, %v4290_v62  ;;  %v7460_v14 = vadd.f32 %v4927_v8, %v4313_v9 }
0x1448   :  { %v4314_v15 = vmul.f32 %v4926_v6, %v4306_v13  ;;  %5616 = vmatprep.mubr.msk.f32.mxu1 %vm349_vm2, %v7460_v14 }
0x144a   :  { %v7464_v16 = vadd.f32 %v4927_v8, %v4314_v15 }
0x144c   :  { %5617 = vmatmul.mubr.msk.f32.vlgmr.msra.gmra.mrb[50].mxu1 %vm349_vm2, %v7464_v16 }
0x144d   :  { %5670 = vmatprep.mubr.msk.f32.mxu1 %vm6383_vm3, %v6382_v41 }
0x151f   :  { %v5618_v10 = vpop.f32.mrb[50].mxu1 }
0x1520   :  { %v4418_v39 = vadd.f32 %v5618_v10, %v4936_v38  ;;  %v4412_v40 = vpop.f32.mrb[51].mxu1 }
0x1521   :  { %v4413_v50 = vadd.f32 %v4936_v38, %v4412_v40  ;;  %v4958_v40 = vld [vmem:[#allocation16 + $0x1] ss:$0 sm:$0xff] }
0x1522   :  { %v4424_v62 = vmul.f32 0.044715, %v4418_v39  ;;  %v4422_v53 = vmul.f32 0.5, %v4418_v39 }
0x1523   :  { %v4423_v43 = vmul.f32 0.044715, %v4413_v50  ;;  %v4421_v33 = vmul.f32 0.5, %v4413_v50 }
0x1524   :  { %v4426_v36 = vmul.f32 %v4424_v62, %v4418_v39 }
0x1525   :  { %v4425_v12 = vmul.f32 %v4423_v43, %v4413_v50 }
0x1526   :  { %v4428_v44 = vmul.f32 %v4426_v36, %v4418_v39 }
0x1527   :  { %v4427_v19 = vmul.f32 %v4425_v12, %v4413_v50 }
0x1528   :  { %v4430_v3 = vadd.f32 %v4428_v44, %v4418_v39 }
0x1529   :  { %v4429_v45 = vadd.f32 %v4427_v19, %v4413_v50  ;;  %v4959_v19 = vld [vmem:[#allocation17] ss:$0 sm:$0xff] }
0x152a   :  { %v4432_v30 = vmul.f32 0.7978846, %v4430_v3 }
0x152b   :  { %v4431_v46 = vmul.f32 0.7978846, %v4429_v45 }
0x152c   :  { %6077 = vtanh.f32 %v4432_v30 }
0x152d   :  { %6079 = vtanh.f32 %v4431_v46 }
0x1536   :  { %v6078_v47 = vpop.eup %6077 }
0x1537   :  { %v6080_v48 = vpop.eup %6079  ;;  %v4436_v51 = vadd.f32 1.0, %v6078_v47 }
0x1538   :  { %v4435_v28 = vadd.f32 1.0, %v6080_v48 }
0x1539   :  { %v4438_v49 = vmul.f32 %v4436_v51, %v4422_v53  ;;  %v4692_v53 = vld [vmem:[%s7615_s25] sm:$0xff] }
0x153a   :  { %v4437_v55 = vmul.f32 %v4435_v28, %v4421_v33 }
0x153c   :  { %5651 = vmatprep.mubr.f32.mxu0 %v4437_v55  ;;  %v4693_v55 = vld [vmem:[%s7615_s25 + $0x8] sm:$0xff] }
0x153d   :  { %5652 = vmatmul.mubr.f32.vlgmr.msra.gmra.mrb[36].mxu0 %v4438_v49  ;;  %v5959_v49 = vpack.c.bf16 %v4693_v55, %v4692_v53 }
0x1610   :  { %v5653_v58 = vpop.f32.mrb[36].mxu0 }
0x1611   :  { %v4536_v59 = vadd.f32 %v5653_v58, %v4955_v56  ;;  %v4530_v60 = vpop.f32.mrb[37].mxu0  ;;  %v4695_v58 = vld [vmem:[%s7615_s25 + $0x18] sm:$0xff] }
0x1612   :  { %v4531_v61 = vadd.f32 %v4955_v56, %v4530_v60  ;;  %v4694_v56 = vld [vmem:[%s7615_s25 + $0x10] sm:$0xff]  ;;  %v4696_v60 = vld [vmem:[%s7615_s25 + $0x20] sm:$0xff] }
0x1613   :  { %v4540_v63 = vadd.f32 %v4536_v59, %v7464_v16  ;;  %v5962_v59 = vpack.c.bf16 %v4695_v58, %v4694_v56 }
0x1614   :  { %v4539_v0 = vadd.f32 %v4531_v61, %v7460_v14  ;;  %v4592_v14 = vld [vmem:[%s7613_s23] sm:$0xff]  ;;  %v4697_v61 = vld [vmem:[%s7615_s25 + $0x28] sm:$0xff] }
0x1615   :  { %v4548_v2 = vsel %vm349_vm2, %v4540_v63, 0.0  ;;  %v5947_v18 = vpack.c.bf16 %v4593_v17, %v4592_v14 }
0x1616   :  { %4549 = vadd.xlane.f32.xlu1 %v4548_v2  ;;  %v4545_v4 = vsel %vm349_vm2, %v4539_v0, 0.0 }
0x1617   :  { %4546 = vadd.xlane.f32.xlu0 %v4545_v4  ;;  %5948 = vmatpush3.bf16.msra.mxu1 %v5947_v18 }
0x1618   :  { %5949 = vmatprep.subr.bf16.mxu1 %v6390_v22 }
0x161b   :  { %5951 = vmatpush3.bf16.msra.mxu1 %v5950_v24 }
0x161c   :  { %5952 = vmatprep.subr.bf16.mxu1 %v6390_v22 }
0x161f   :  { %5954 = vmatpush3.bf16.msra.mxu1 %v5953_v52 }
0x1620   :  { %5955 = vmatprep.subr.bf16.mxu1 %v6390_v22 }
0x1623   :  { %5957 = vmatpush3.bf16.msra.mxu1 %v5956_v1 }
0x1624   :  { %5958 = vmatprep.subr.bf16.mxu1 %v6390_v22 }
0x16a3   :  { %v4550_v5 = vpop.xlane.xlu1 %4549 }
0x16a4   :  { %v4552_v6 = vmul.f32 0.015625, %v4550_v5  ;;  %v4547_v7 = vpop.xlane.xlu0 %4546 }
0x16a5   :  { %v4551_v8 = vmul.f32 0.015625, %v4547_v7 }
0x16a6   :  { %v4554_v9 = vsub.f32 %v4540_v63, %v4552_v6  ;;  %v5965_v63 = vpack.c.bf16 %v4697_v61, %v4696_v60  ;;  %v4961_v6 = vld [vmem:[#allocation19] ss:$0 sm:$0xff] }
0x16a7   :  { %v4553_v11 = vsub.f32 %v4539_v0, %v4551_v8  ;;  %v4698_v0 = vld [vmem:[%s7615_s25 + $0x30] sm:$0x3] }
0x16a8   :  { %v4556_v13 = vmul.f32 %v4554_v9, %v4554_v9 }
0x16a9   :  { %v4555_v15 = vmul.f32 %v4553_v11, %v4553_v11 }
0x16aa   :  { %v4560_v23 = vsel %vm349_vm2, %v4556_v13, 0.0 }
0x16ab   :  { %4561 = vadd.xlane.f32.xlu1 %v4560_v23  ;;  %v4557_v16 = vsel %vm349_vm2, %v4555_v15, 0.0 }
0x16ac   :  { %4558 = vadd.xlane.f32.xlu0 %v4557_v16 }
0x1738   :  { %v4562_v21 = vpop.xlane.xlu1 %4561 }
0x1739   :  { %v4564_v54 = vmul.f32 0.015625, %v4562_v21  ;;  %v4559_v57 = vpop.xlane.xlu0 %4558 }
0x173a   :  { %v4563_v32 = vmul.f32 0.015625, %v4559_v57 }
0x173b   :  { %v4566_v34 = vadd.f32 1e-12, %v4564_v54 }
0x173c   :  { %v4565_v42 = vadd.f32 1e-12, %v4563_v32 }
0x173d   :  { %6081 = vrsqrt.f32 %v4566_v34 }
0x173e   :  { %6083 = vrsqrt.f32 %v4565_v42 }
0x1747   :  { %v6082_v35 = vpop.eup %6081 }
0x1748   :  { %v6084_v38 = vpop.eup %6083  ;;  %v4570_v10 = vmul.f32 %v6082_v35, %v4554_v9 }
0x1749   :  { %v4569_v39 = vmul.f32 %v6084_v38, %v4553_v11 }
0x174a   :  { %v4578_v50 = vmul.f32 %v4957_v37, %v4570_v10 }
0x174b   :  { %v4577_v62 = vmul.f32 %v4957_v37, %v4569_v39 }
0x174c   :  { %v4586_v43 = vadd.f32 %v4958_v40, %v4578_v50 }
0x174d   :  { %v4585_v36 = vadd.f32 %v4958_v40, %v4577_v62 }
0x174e   :  { %v4588_v12 = vrot.slane %v4586_v43, 7 }
0x1750   :  { %v4591_v44 = vsel %vm4590_vm11, %v4585_v36, %v4588_v12 }
0x1751   :  { %5671 = vmatmul.mubr.msk.f32.vlgmr.msra.gmra.mrb[52].mxu1 %vm349_vm2, %v4591_v44 }
0x1752   :  { %5687 = vmatprep.mubr.msk.f32.mxu1 %vm6383_vm3, %v6382_v41  ;;  %5960 = vmatpush3.bf16.msra.mxu1 %v5959_v49 }
0x1753   :  { %5961 = vmatprep.subr.bf16.mxu1 %v6390_v22 }
0x1756   :  { %5963 = vmatpush3.bf16.msra.mxu1 %v5962_v59 }
0x1757   :  { %5964 = vmatprep.subr.bf16.mxu1 %v6390_v22 }
0x175a   :  { %5966 = vmatpush3.bf16.msra.mxu1 %v5965_v63 }
0x175b   :  { %5685 = vmatprep.subr.mxu1 %v6382_v41 }
0x175e   :  { %5686 = vmatpush3.msk.msra.mxu1 %vm403_vm5, %v4698_v0 }
0x1824   :  { %v4676_v3 = vpop.f32.mrb[52].mxu1 }
0x1825   :  { %v4677_v45 = vadd.f32 %v4959_v19, %v4676_v3  ;;  %v5672_v30 = vpop.f32.mrb[53].mxu1 }
0x1827   :  { %v4681_v46 = vsel %vm4680_vm12, %v4677_v45, -inf }
0x1828   :  { %4682 = vmax.xlane.f32.xlu1 %v4681_v46 }
0x18b5   :  { %v4683_v47 = vpop.xlane.xlu1 %4682 }
0x18b6   :  { %v4684_v48 = vsub.f32 %v4677_v45, %v4683_v47 }
0x18b8   :  { %v4685_v51 = vmul.f32 1.442695, %v4684_v48 }
0x18ba   :  { %6085 = vpow2.f32 %v4685_v51 }
0x18c4   :  { %v6086_v33 = vpop.eup %6085 }
0x18c5   :  { %v4687_v28 = vsel %vm4680_vm12, %v6086_v33, 0.0 }
0x18c6   :  { %4688 = vadd.xlane.f32.xlu0 %v4687_v28 }
0x1953   :  { %v4689_v2 = vpop.xlane.xlu0 %4688 }
0x1954   :  { %6087 = vrcp.f32 %v4689_v2 }
0x195e   :  { %v6088_v4 = vpop.eup %6087 }
0x195f   :  { %v4691_v5 = vmul.f32 %v6088_v4, %v6086_v33 }
0x1961   :  { %5688 = vmatmul.mubr.msk.f32.vlgmr.msra.gmra.mrb[54].mxu1 %vm4706_vm13, %v4691_v5 }
0x1a34   :  { %v4779_v7 = vpop.f32.mrb[54].mxu1 }
0x1a35   :  { %v4780_v8 = vadd.f32 %v4961_v6, %v4779_v7  ;;  %v5689_v9 = vpop.f32.mrb[55].mxu1 }
0x1a37   :  { %4784 = vst.msk [vmem:[#allocation20] sm:$0x3] %vm4783_vm14, %v4780_v8 }
0x1a38   :  { %6342 = shalt.err (!%p6339_p8)
}
0x1a39   :  { %s6343_s8 = scalar_lea.hbm %s7617_s27, 32 }
0x1a3a   :  { %p6344_p9 = scmp.ne.s32.totalorder %s7617_s27, %s6343_s8  ;;  %p6347_p10 = scmp.lt.u32.totalorder %s6343_s8, %s7617_s27 }
0x1a3c   :  { %p6349_p11 = pnand %p6347_p10, %p6344_p9 }
0x1a3e   :  { %6352 = shalt.err (!%p6349_p11)
}
0x1a3f   :  { %4794 = dma.vmem_to_hbm [thread:$0]  %s4792_s9, 32, %s7617_s27, [#allocation4]  }
0x1a40   :  { %6365 = dma.done.wait [#allocation4], 32  }
0x1a41   :  { %6366 = vsyncadd [#allocation4], 4294967264 }
0x1a42   :  { %4798 = vsyncpa [#allocation3], 1 }
0x1a43   :  { %4799 = vsyncpa [#allocation6], 1 }
0x1a44   :  { %4800 = vsyncpa [#allocation9], 1 }
0x1a45   :  { %4801 = vsyncpa [#allocation12], 1 }
0x1a46   :  { %4802 = vsyncpa [#allocation15], 1 }
0x1a47   :  { %4803 = vsyncpa [#allocation18], 1 }
0x1a48   :  { %4804 = vsyncpa [#allocation4], 1 }

</bundles_post_ra>
